<compile_context>
chip_gen: v6e
topology: v6e:2x2x1
jax: 0.10.0
libtpu: 0.0.40
codegen_flags: <defaults>
</compile_context>

<pallas_src>
import random

import jax
import jax.numpy as jnp
from jax import lax
from jax.experimental import pallas as pl
from jax.experimental.pallas import tpu as pltpu

# ---- problem sizes (small, consistent with the module's forward) -----------
B = 2        # batch
S = 8        # source sequence length
T = 8        # target sequence length
V = 16       # vocab size (source & target) == decoder.output_size
E = 32       # embedding dim
H = 32       # LSTM hidden dim (4H = 128 -> lane-aligned gate matmul)
VP = 128     # padded vocab width (lane-dense logits / projection)

_VMEM = pl.BlockSpec(memory_space=pltpu.MemorySpace.VMEM)
_SMEM = pl.BlockSpec(memory_space=pltpu.MemorySpace.SMEM)


# ---- fused kernel -----------------------------------------------------------
def seq2seq_kernel(tf_ref, src_ref, tgt_ref,
                   enc_w_ref, enc_b_ref, dec_w_ref, dec_b_ref,
                   wout_ref, bout_ref, emb_ref,
                   out_ref):
    # Load weights once; hoist bias broadcasts out of the time loops.
    enc_w = enc_w_ref[...]                                  # (E+H, 4H)
    dec_w = dec_w_ref[...]                                  # (E+H, 4H)
    enc_b = jnp.broadcast_to(enc_b_ref[...], (B, 4 * H))
    dec_b = jnp.broadcast_to(dec_b_ref[...], (B, 4 * H))
    wout = wout_ref[...]                                    # (H, VP) zero-padded
    bout = jnp.broadcast_to(bout_ref[...], (B, VP))
    emb = emb_ref[...]                                      # (VP, E) zero-padded
    lane = lax.broadcasted_iota(jnp.int32, (B, VP), 1)

    def cell(x, h, c, w, b):
        xh = jnp.concatenate([x, h], axis=1)                # (B, E+H) -> one matmul
        gates = jnp.dot(xh, w, preferred_element_type=jnp.float32) + b
        i = jax.nn.sigmoid(gates[:, 0 * H:1 * H])
        f = jax.nn.sigmoid(gates[:, 1 * H:2 * H])
        g = jnp.tanh(gates[:, 2 * H:3 * H])
        o = jax.nn.sigmoid(gates[:, 3 * H:4 * H])
        c_new = f * c + i * g
        h_new = o * jnp.tanh(c_new)
        return h_new, c_new

    # -------- encoder: fold the whole source sequence ------------------------
    def enc_body(s, carry):
        h, c = carry
        return cell(src_ref[s], h, c, enc_w, enc_b)

    h, c = lax.fori_loop(
        0, S, enc_body,
        (jnp.zeros((B, H), jnp.float32), jnp.zeros((B, H), jnp.float32)),
        unroll=True)

    # -------- decoder: teacher-forced / greedy rollout ------------------------
    out_ref[0] = jnp.zeros((B, VP), jnp.float32)   # outputs[:, 0] stays zero

    def dec_body(t, carry):
        x, h, c = carry
        h, c = cell(x, h, c, dec_w, dec_b)
        logits = jnp.dot(h, wout, preferred_element_type=jnp.float32) + bout
        out_ref[t] = logits                        # full 128-lane store

        # argmax over the real vocab lanes (first-max index, like torch).
        masked = jnp.where(lane < V, logits, -jnp.inf)
        m = jnp.max(masked, axis=1, keepdims=True)
        cand = jnp.where(masked == m, lane, VP)
        top1 = jnp.min(cand, axis=1, keepdims=True)          # (B, 1) int32
        onehot = (lane == top1).astype(jnp.float32)          # (B, VP)
        x_gen = jnp.dot(onehot, emb, preferred_element_type=jnp.float32)  # (B, E)

        # teacher forcing: pick target embedding vs generated-token embedding.
        tf = (tf_ref[t] != 0).astype(jnp.float32)
        x_next = tf * tgt_ref[t] + (1.0 - tf) * x_gen
        return x_next, h, c

    lax.fori_loop(1, T, dec_body, (tgt_ref[0], h, c), unroll=True)


def _forward_impl(source, target, tf_flags,
                  enc_emb, enc_w, enc_b, dec_w, dec_b,
                  wout_pad, bout_pad, dec_emb_pad):
    # One gather each for source / target embeddings, time-major so the kernel
    # indexes the leading axis per step.
    src_emb = jnp.transpose(enc_emb[source], (1, 0, 2))       # (S, B, E)
    tgt_emb = jnp.transpose(dec_emb_pad[target], (1, 0, 2))   # (T, B, E)

    out = pl.pallas_call(
        seq2seq_kernel,
        out_shape=jax.ShapeDtypeStruct((T, B, VP), jnp.float32),
        in_specs=[_SMEM] + [_VMEM] * 9,
        out_specs=_VMEM,
    )(tf_flags, src_emb, tgt_emb, enc_w, enc_b, dec_w, dec_b,
      wout_pad, bout_pad, dec_emb_pad)

    return jnp.transpose(out, (1, 0, 2))[:, :, :V]            # (B, T, V)


_forward = jax.jit(_forward_impl)


# ---- Encoder / Decoder / Seq2Seq parameter containers (glue) -----------------
class Encoder:
    def __init__(self, emb, wih, whh, b):
        self.emb = emb                                          # (V, E)
        self.w = jnp.concatenate([wih, whh], axis=0)            # (E+H, 4H)
        self.b = b                                              # (1, 4H)


class Decoder:
    output_size = V

    def __init__(self, emb, wih, whh, b, wout, bout):
        self.emb_pad = jnp.pad(emb, ((0, VP - V), (0, 0)))      # (VP, E)
        self.w = jnp.concatenate([wih, whh], axis=0)            # (E+H, 4H)
        self.b = b                                              # (1, 4H)
        self.wout_pad = jnp.pad(wout, ((0, 0), (0, VP - V)))    # (H, VP)
        self.bout_pad = jnp.pad(bout, ((0, 0), (0, VP - V)))    # (1, VP)


class Seq2Seq:
    def __init__(self, encoder, decoder):
        self.encoder = encoder
        self.decoder = decoder

    def forward(self, source, target, teacher_forcing_ratio=0.5):
        target_len = target.shape[1]
        # Precompute teacher-forcing decisions with the same Python RNG
        # consumption order as the reference loop (one draw per step t >= 1).
        tf = [0] * target_len
        for t in range(1, target_len):
            tf[t] = 1 if random.random() < teacher_forcing_ratio else 0
        tf_flags = jnp.asarray(tf, dtype=jnp.int32)
        return _forward(source, target, tf_flags,
                        self.encoder.emb, self.encoder.w, self.encoder.b,
                        self.decoder.w, self.decoder.b,
                        self.decoder.wout_pad, self.decoder.bout_pad,
                        self.decoder.emb_pad)


# ---- deterministic parameter init & example run ------------------------------
def _init_params(key):
    ks = jax.random.split(key, 10)
    scale = 0.1
    enc_emb = scale * jax.random.normal(ks[0], (V, E), jnp.float32)
    enc_wih = scale * jax.random.normal(ks[1], (E, 4 * H), jnp.float32)
    enc_whh = scale * jax.random.normal(ks[2], (H, 4 * H), jnp.float32)
    enc_b = scale * jax.random.normal(ks[3], (1, 4 * H), jnp.float32)
    dec_emb = scale * jax.random.normal(ks[4], (V, E), jnp.float32)
    dec_wih = scale * jax.random.normal(ks[5], (E, 4 * H), jnp.float32)
    dec_whh = scale * jax.random.normal(ks[6], (H, 4 * H), jnp.float32)
    dec_b = scale * jax.random.normal(ks[7], (1, 4 * H), jnp.float32)
    dec_wout = scale * jax.random.normal(ks[8], (H, V), jnp.float32)
    dec_bout = scale * jax.random.normal(ks[9], (1, V), jnp.float32)
    return (Encoder(enc_emb, enc_wih, enc_whh, enc_b),
            Decoder(dec_emb, dec_wih, dec_whh, dec_b, dec_wout, dec_bout))


if __name__ == "__main__":
    random.seed(0)                      # deterministic teacher forcing
    key = jax.random.PRNGKey(0)
    k_src, k_tgt, k_par = jax.random.split(key, 3)

    source = jax.random.randint(k_src, (B, S), 0, V, dtype=jnp.int32)
    target = jax.random.randint(k_tgt, (B, T), 0, V, dtype=jnp.int32)

    encoder, decoder = _init_params(k_par)
    model = Seq2Seq(encoder, decoder)

    outputs = model.forward(source, target, teacher_forcing_ratio=0.5)
    outputs = jax.block_until_ready(outputs)
    assert outputs.shape == (B, T, V)
    print("KERNEL_OK")
</pallas_src>

<mosaic_0001>
module attributes {stable_mosaic.version = 11 : i64} {
  func.func @seq2seq_kernel(%arg0: memref<8xi32, #tpu.memory_space<smem>>, %arg1: memref<8x2x32xf32, #tpu.memory_space<vmem>>, %arg2: memref<8x2x32xf32, #tpu.memory_space<vmem>>, %arg3: memref<64x128xf32, #tpu.memory_space<vmem>>, %arg4: memref<1x128xf32, #tpu.memory_space<vmem>>, %arg5: memref<64x128xf32, #tpu.memory_space<vmem>>, %arg6: memref<1x128xf32, #tpu.memory_space<vmem>>, %arg7: memref<32x128xf32, #tpu.memory_space<vmem>>, %arg8: memref<1x128xf32, #tpu.memory_space<vmem>>, %arg9: memref<128x32xf32, #tpu.memory_space<vmem>>, %arg10: memref<8x2x128xf32, #tpu.memory_space<vmem>>) attributes {dimension_semantics = [], scalar_prefetch = 0 : i64, scratch_operands = 0 : i64, tpu.core_type = #tpu.core_type<tc>} {
    %c0 = arith.constant 0 : index
    %c0_0 = arith.constant 0 : index
    %0 = vector.load %arg3[%c0, %c0_0] : memref<64x128xf32, #tpu.memory_space<vmem>>, vector<64x128xf32>
    %c0_1 = arith.constant 0 : index
    %c0_2 = arith.constant 0 : index
    %1 = vector.load %arg5[%c0_1, %c0_2] : memref<64x128xf32, #tpu.memory_space<vmem>>, vector<64x128xf32>
    %c0_3 = arith.constant 0 : index
    %c0_4 = arith.constant 0 : index
    %2 = vector.load %arg4[%c0_3, %c0_4] : memref<1x128xf32, #tpu.memory_space<vmem>>, vector<1x128xf32>
    %3 = vector.shape_cast %2 : vector<1x128xf32> to vector<1x128xf32>
    %4 = vector.broadcast %3 : vector<1x128xf32> to vector<2x128xf32>
    %c0_5 = arith.constant 0 : index
    %c0_6 = arith.constant 0 : index
    %5 = vector.load %arg6[%c0_5, %c0_6] : memref<1x128xf32, #tpu.memory_space<vmem>>, vector<1x128xf32>
    %6 = vector.shape_cast %5 : vector<1x128xf32> to vector<1x128xf32>
    %7 = vector.broadcast %6 : vector<1x128xf32> to vector<2x128xf32>
    %c0_7 = arith.constant 0 : index
    %c0_8 = arith.constant 0 : index
    %8 = vector.load %arg7[%c0_7, %c0_8] : memref<32x128xf32, #tpu.memory_space<vmem>>, vector<32x128xf32>
    %c0_9 = arith.constant 0 : index
    %c0_10 = arith.constant 0 : index
    %9 = vector.load %arg8[%c0_9, %c0_10] : memref<1x128xf32, #tpu.memory_space<vmem>>, vector<1x128xf32>
    %10 = vector.shape_cast %9 : vector<1x128xf32> to vector<1x128xf32>
    %11 = vector.broadcast %10 : vector<1x128xf32> to vector<2x128xf32>
    %c0_11 = arith.constant 0 : index
    %c0_12 = arith.constant 0 : index
    %12 = vector.load %arg9[%c0_11, %c0_12] : memref<128x32xf32, #tpu.memory_space<vmem>>, vector<128x32xf32>
    %13 = tpu.iota {dimensions = array<i32: 1>} : vector<2x128xi32>
    %cst = arith.constant 0.000000e+00 : f32
    %14 = vector.broadcast %cst : f32 to vector<2x32xf32>
    %cst_13 = arith.constant 0.000000e+00 : f32
    %15 = vector.broadcast %cst_13 : f32 to vector<2x32xf32>
    %c0_i32 = arith.constant 0 : i32
    %16 = arith.index_cast %c0_i32 : i32 to index
    %c0_14 = arith.constant 0 : index
    %c0_15 = arith.constant 0 : index
    %17 = vector.load %arg1[%16, %c0_14, %c0_15] : memref<8x2x32xf32, #tpu.memory_space<vmem>>, vector<1x2x32xf32>
    %18 = vector.shape_cast %17 : vector<1x2x32xf32> to vector<2x32xf32>
    %19 = tpu.concatenate %18, %14 in 1 : vector<2x32xf32>, vector<2x32xf32> -> vector<2x64xf32>
    %cst_16 = arith.constant dense<0.000000e+00> : vector<2x128xf32>
    %20 = tpu.matmul %19, %0, %cst_16 {dimension_numbers = #tpu.dot_dimension_numbers<[1], [0], [0], [1], [0, 0, 1, 1], [], []>} : vector<2x64xf32>, vector<64x128xf32>, vector<2x128xf32> -> vector<2x128xf32>
    %21 = arith.addf %20, %4 : vector<2x128xf32>
    %22 = vector.extract_strided_slice %21 {offsets = [0, 0], sizes = [2, 32], strides = [1, 1]} : vector<2x128xf32> to vector<2x32xf32>
    %23 = arith.negf %22 : vector<2x32xf32>
    %24 = math.exp %23 : vector<2x32xf32>
    %cst_17 = arith.constant 1.000000e+00 : f32
    %25 = vector.broadcast %cst_17 : f32 to vector<2x32xf32>
    %26 = arith.addf %25, %24 : vector<2x32xf32>
    %27 = arith.divf %25, %26 : vector<2x32xf32>
    %28 = vector.extract_strided_slice %21 {offsets = [0, 32], sizes = [2, 32], strides = [1, 1]} : vector<2x128xf32> to vector<2x32xf32>
    %29 = arith.negf %28 : vector<2x32xf32>
    %30 = math.exp %29 : vector<2x32xf32>
    %cst_18 = arith.constant 1.000000e+00 : f32
    %31 = vector.broadcast %cst_18 : f32 to vector<2x32xf32>
    %32 = arith.addf %31, %30 : vector<2x32xf32>
    %33 = arith.divf %31, %32 : vector<2x32xf32>
    %34 = vector.extract_strided_slice %21 {offsets = [0, 64], sizes = [2, 32], strides = [1, 1]} : vector<2x128xf32> to vector<2x32xf32>
    %35 = math.tanh %34 : vector<2x32xf32>
    %36 = vector.extract_strided_slice %21 {offsets = [0, 96], sizes = [2, 32], strides = [1, 1]} : vector<2x128xf32> to vector<2x32xf32>
    %37 = arith.negf %36 : vector<2x32xf32>
    %38 = math.exp %37 : vector<2x32xf32>
    %cst_19 = arith.constant 1.000000e+00 : f32
    %39 = vector.broadcast %cst_19 : f32 to vector<2x32xf32>
    %40 = arith.addf %39, %38 : vector<2x32xf32>
    %41 = arith.divf %39, %40 : vector<2x32xf32>
    %42 = arith.mulf %33, %15 : vector<2x32xf32>
    %43 = arith.mulf %27, %35 : vector<2x32xf32>
    %44 = arith.addf %42, %43 : vector<2x32xf32>
    %45 = math.tanh %44 : vector<2x32xf32>
    %46 = arith.mulf %41, %45 : vector<2x32xf32>
    %c1_i32 = arith.constant 1 : i32
    %47 = arith.index_cast %c1_i32 : i32 to index
    %c0_20 = arith.constant 0 : index
    %c0_21 = arith.constant 0 : index
    %48 = vector.load %arg1[%47, %c0_20, %c0_21] : memref<8x2x32xf32, #tpu.memory_space<vmem>>, vector<1x2x32xf32>
    %49 = vector.shape_cast %48 : vector<1x2x32xf32> to vector<2x32xf32>
    %50 = tpu.concatenate %49, %46 in 1 : vector<2x32xf32>, vector<2x32xf32> -> vector<2x64xf32>
    %cst_22 = arith.constant dense<0.000000e+00> : vector<2x128xf32>
    %51 = tpu.matmul %50, %0, %cst_22 {dimension_numbers = #tpu.dot_dimension_numbers<[1], [0], [0], [1], [0, 0, 1, 1], [], []>} : vector<2x64xf32>, vector<64x128xf32>, vector<2x128xf32> -> vector<2x128xf32>
    %52 = arith.addf %51, %4 : vector<2x128xf32>
    %53 = vector.extract_strided_slice %52 {offsets = [0, 0], sizes = [2, 32], strides = [1, 1]} : vector<2x128xf32> to vector<2x32xf32>
    %54 = arith.negf %53 : vector<2x32xf32>
    %55 = math.exp %54 : vector<2x32xf32>
    %cst_23 = arith.constant 1.000000e+00 : f32
    %56 = vector.broadcast %cst_23 : f32 to vector<2x32xf32>
    %57 = arith.addf %56, %55 : vector<2x32xf32>
    %58 = arith.divf %56, %57 : vector<2x32xf32>
    %59 = vector.extract_strided_slice %52 {offsets = [0, 32], sizes = [2, 32], strides = [1, 1]} : vector<2x128xf32> to vector<2x32xf32>
    %60 = arith.negf %59 : vector<2x32xf32>
    %61 = math.exp %60 : vector<2x32xf32>
    %cst_24 = arith.constant 1.000000e+00 : f32
    %62 = vector.broadcast %cst_24 : f32 to vector<2x32xf32>
    %63 = arith.addf %62, %61 : vector<2x32xf32>
    %64 = arith.divf %62, %63 : vector<2x32xf32>
    %65 = vector.extract_strided_slice %52 {offsets = [0, 64], sizes = [2, 32], strides = [1, 1]} : vector<2x128xf32> to vector<2x32xf32>
    %66 = math.tanh %65 : vector<2x32xf32>
    %67 = vector.extract_strided_slice %52 {offsets = [0, 96], sizes = [2, 32], strides = [1, 1]} : vector<2x128xf32> to vector<2x32xf32>
    %68 = arith.negf %67 : vector<2x32xf32>
    %69 = math.exp %68 : vector<2x32xf32>
    %cst_25 = arith.constant 1.000000e+00 : f32
    %70 = vector.broadcast %cst_25 : f32 to vector<2x32xf32>
    %71 = arith.addf %70, %69 : vector<2x32xf32>
    %72 = arith.divf %70, %71 : vector<2x32xf32>
    %73 = arith.mulf %64, %44 : vector<2x32xf32>
    %74 = arith.mulf %58, %66 : vector<2x32xf32>
    %75 = arith.addf %73, %74 : vector<2x32xf32>
    %76 = math.tanh %75 : vector<2x32xf32>
    %77 = arith.mulf %72, %76 : vector<2x32xf32>
    %c2_i32 = arith.constant 2 : i32
    %78 = arith.index_cast %c2_i32 : i32 to index
    %c0_26 = arith.constant 0 : index
    %c0_27 = arith.constant 0 : index
    %79 = vector.load %arg1[%78, %c0_26, %c0_27] : memref<8x2x32xf32, #tpu.memory_space<vmem>>, vector<1x2x32xf32>
    %80 = vector.shape_cast %79 : vector<1x2x32xf32> to vector<2x32xf32>
    %81 = tpu.concatenate %80, %77 in 1 : vector<2x32xf32>, vector<2x32xf32> -> vector<2x64xf32>
    %cst_28 = arith.constant dense<0.000000e+00> : vector<2x128xf32>
    %82 = tpu.matmul %81, %0, %cst_28 {dimension_numbers = #tpu.dot_dimension_numbers<[1], [0], [0], [1], [0, 0, 1, 1], [], []>} : vector<2x64xf32>, vector<64x128xf32>, vector<2x128xf32> -> vector<2x128xf32>
    %83 = arith.addf %82, %4 : vector<2x128xf32>
    %84 = vector.extract_strided_slice %83 {offsets = [0, 0], sizes = [2, 32], strides = [1, 1]} : vector<2x128xf32> to vector<2x32xf32>
    %85 = arith.negf %84 : vector<2x32xf32>
    %86 = math.exp %85 : vector<2x32xf32>
    %cst_29 = arith.constant 1.000000e+00 : f32
    %87 = vector.broadcast %cst_29 : f32 to vector<2x32xf32>
    %88 = arith.addf %87, %86 : vector<2x32xf32>
    %89 = arith.divf %87, %88 : vector<2x32xf32>
    %90 = vector.extract_strided_slice %83 {offsets = [0, 32], sizes = [2, 32], strides = [1, 1]} : vector<2x128xf32> to vector<2x32xf32>
    %91 = arith.negf %90 : vector<2x32xf32>
    %92 = math.exp %91 : vector<2x32xf32>
    %cst_30 = arith.constant 1.000000e+00 : f32
    %93 = vector.broadcast %cst_30 : f32 to vector<2x32xf32>
    %94 = arith.addf %93, %92 : vector<2x32xf32>
    %95 = arith.divf %93, %94 : vector<2x32xf32>
    %96 = vector.extract_strided_slice %83 {offsets = [0, 64], sizes = [2, 32], strides = [1, 1]} : vector<2x128xf32> to vector<2x32xf32>
    %97 = math.tanh %96 : vector<2x32xf32>
    %98 = vector.extract_strided_slice %83 {offsets = [0, 96], sizes = [2, 32], strides = [1, 1]} : vector<2x128xf32> to vector<2x32xf32>
    %99 = arith.negf %98 : vector<2x32xf32>
    %100 = math.exp %99 : vector<2x32xf32>
    %cst_31 = arith.constant 1.000000e+00 : f32
    %101 = vector.broadcast %cst_31 : f32 to vector<2x32xf32>
    %102 = arith.addf %101, %100 : vector<2x32xf32>
    %103 = arith.divf %101, %102 : vector<2x32xf32>
    %104 = arith.mulf %95, %75 : vector<2x32xf32>
    %105 = arith.mulf %89, %97 : vector<2x32xf32>
    %106 = arith.addf %104, %105 : vector<2x32xf32>
    %107 = math.tanh %106 : vector<2x32xf32>
    %108 = arith.mulf %103, %107 : vector<2x32xf32>
    %c3_i32 = arith.constant 3 : i32
    %109 = arith.index_cast %c3_i32 : i32 to index
    %c0_32 = arith.constant 0 : index
    %c0_33 = arith.constant 0 : index
    %110 = vector.load %arg1[%109, %c0_32, %c0_33] : memref<8x2x32xf32, #tpu.memory_space<vmem>>, vector<1x2x32xf32>
    %111 = vector.shape_cast %110 : vector<1x2x32xf32> to vector<2x32xf32>
    %112 = tpu.concatenate %111, %108 in 1 : vector<2x32xf32>, vector<2x32xf32> -> vector<2x64xf32>
    %cst_34 = arith.constant dense<0.000000e+00> : vector<2x128xf32>
    %113 = tpu.matmul %112, %0, %cst_34 {dimension_numbers = #tpu.dot_dimension_numbers<[1], [0], [0], [1], [0, 0, 1, 1], [], []>} : vector<2x64xf32>, vector<64x128xf32>, vector<2x128xf32> -> vector<2x128xf32>
    %114 = arith.addf %113, %4 : vector<2x128xf32>
    %115 = vector.extract_strided_slice %114 {offsets = [0, 0], sizes = [2, 32], strides = [1, 1]} : vector<2x128xf32> to vector<2x32xf32>
    %116 = arith.negf %115 : vector<2x32xf32>
    %117 = math.exp %116 : vector<2x32xf32>
    %cst_35 = arith.constant 1.000000e+00 : f32
    %118 = vector.broadcast %cst_35 : f32 to vector<2x32xf32>
    %119 = arith.addf %118, %117 : vector<2x32xf32>
    %120 = arith.divf %118, %119 : vector<2x32xf32>
    %121 = vector.extract_strided_slice %114 {offsets = [0, 32], sizes = [2, 32], strides = [1, 1]} : vector<2x128xf32> to vector<2x32xf32>
    %122 = arith.negf %121 : vector<2x32xf32>
    %123 = math.exp %122 : vector<2x32xf32>
    %cst_36 = arith.constant 1.000000e+00 : f32
    %124 = vector.broadcast %cst_36 : f32 to vector<2x32xf32>
    %125 = arith.addf %124, %123 : vector<2x32xf32>
    %126 = arith.divf %124, %125 : vector<2x32xf32>
    %127 = vector.extract_strided_slice %114 {offsets = [0, 64], sizes = [2, 32], strides = [1, 1]} : vector<2x128xf32> to vector<2x32xf32>
    %128 = math.tanh %127 : vector<2x32xf32>
    %129 = vector.extract_strided_slice %114 {offsets = [0, 96], sizes = [2, 32], strides = [1, 1]} : vector<2x128xf32> to vector<2x32xf32>
    %130 = arith.negf %129 : vector<2x32xf32>
    %131 = math.exp %130 : vector<2x32xf32>
    %cst_37 = arith.constant 1.000000e+00 : f32
    %132 = vector.broadcast %cst_37 : f32 to vector<2x32xf32>
    %133 = arith.addf %132, %131 : vector<2x32xf32>
    %134 = arith.divf %132, %133 : vector<2x32xf32>
    %135 = arith.mulf %126, %106 : vector<2x32xf32>
    %136 = arith.mulf %120, %128 : vector<2x32xf32>
    %137 = arith.addf %135, %136 : vector<2x32xf32>
    %138 = math.tanh %137 : vector<2x32xf32>
    %139 = arith.mulf %134, %138 : vector<2x32xf32>
    %c4_i32 = arith.constant 4 : i32
    %140 = arith.index_cast %c4_i32 : i32 to index
    %c0_38 = arith.constant 0 : index
    %c0_39 = arith.constant 0 : index
    %141 = vector.load %arg1[%140, %c0_38, %c0_39] : memref<8x2x32xf32, #tpu.memory_space<vmem>>, vector<1x2x32xf32>
    %142 = vector.shape_cast %141 : vector<1x2x32xf32> to vector<2x32xf32>
    %143 = tpu.concatenate %142, %139 in 1 : vector<2x32xf32>, vector<2x32xf32> -> vector<2x64xf32>
    %cst_40 = arith.constant dense<0.000000e+00> : vector<2x128xf32>
    %144 = tpu.matmul %143, %0, %cst_40 {dimension_numbers = #tpu.dot_dimension_numbers<[1], [0], [0], [1], [0, 0, 1, 1], [], []>} : vector<2x64xf32>, vector<64x128xf32>, vector<2x128xf32> -> vector<2x128xf32>
    %145 = arith.addf %144, %4 : vector<2x128xf32>
    %146 = vector.extract_strided_slice %145 {offsets = [0, 0], sizes = [2, 32], strides = [1, 1]} : vector<2x128xf32> to vector<2x32xf32>
    %147 = arith.negf %146 : vector<2x32xf32>
    %148 = math.exp %147 : vector<2x32xf32>
    %cst_41 = arith.constant 1.000000e+00 : f32
    %149 = vector.broadcast %cst_41 : f32 to vector<2x32xf32>
    %150 = arith.addf %149, %148 : vector<2x32xf32>
    %151 = arith.divf %149, %150 : vector<2x32xf32>
    %152 = vector.extract_strided_slice %145 {offsets = [0, 32], sizes = [2, 32], strides = [1, 1]} : vector<2x128xf32> to vector<2x32xf32>
    %153 = arith.negf %152 : vector<2x32xf32>
    %154 = math.exp %153 : vector<2x32xf32>
    %cst_42 = arith.constant 1.000000e+00 : f32
    %155 = vector.broadcast %cst_42 : f32 to vector<2x32xf32>
    %156 = arith.addf %155, %154 : vector<2x32xf32>
    %157 = arith.divf %155, %156 : vector<2x32xf32>
    %158 = vector.extract_strided_slice %145 {offsets = [0, 64], sizes = [2, 32], strides = [1, 1]} : vector<2x128xf32> to vector<2x32xf32>
    %159 = math.tanh %158 : vector<2x32xf32>
    %160 = vector.extract_strided_slice %145 {offsets = [0, 96], sizes = [2, 32], strides = [1, 1]} : vector<2x128xf32> to vector<2x32xf32>
    %161 = arith.negf %160 : vector<2x32xf32>
    %162 = math.exp %161 : vector<2x32xf32>
    %cst_43 = arith.constant 1.000000e+00 : f32
    %163 = vector.broadcast %cst_43 : f32 to vector<2x32xf32>
    %164 = arith.addf %163, %162 : vector<2x32xf32>
    %165 = arith.divf %163, %164 : vector<2x32xf32>
    %166 = arith.mulf %157, %137 : vector<2x32xf32>
    %167 = arith.mulf %151, %159 : vector<2x32xf32>
    %168 = arith.addf %166, %167 : vector<2x32xf32>
    %169 = math.tanh %168 : vector<2x32xf32>
    %170 = arith.mulf %165, %169 : vector<2x32xf32>
    %c5_i32 = arith.constant 5 : i32
    %171 = arith.index_cast %c5_i32 : i32 to index
    %c0_44 = arith.constant 0 : index
    %c0_45 = arith.constant 0 : index
    %172 = vector.load %arg1[%171, %c0_44, %c0_45] : memref<8x2x32xf32, #tpu.memory_space<vmem>>, vector<1x2x32xf32>
    %173 = vector.shape_cast %172 : vector<1x2x32xf32> to vector<2x32xf32>
    %174 = tpu.concatenate %173, %170 in 1 : vector<2x32xf32>, vector<2x32xf32> -> vector<2x64xf32>
    %cst_46 = arith.constant dense<0.000000e+00> : vector<2x128xf32>
    %175 = tpu.matmul %174, %0, %cst_46 {dimension_numbers = #tpu.dot_dimension_numbers<[1], [0], [0], [1], [0, 0, 1, 1], [], []>} : vector<2x64xf32>, vector<64x128xf32>, vector<2x128xf32> -> vector<2x128xf32>
    %176 = arith.addf %175, %4 : vector<2x128xf32>
    %177 = vector.extract_strided_slice %176 {offsets = [0, 0], sizes = [2, 32], strides = [1, 1]} : vector<2x128xf32> to vector<2x32xf32>
    %178 = arith.negf %177 : vector<2x32xf32>
    %179 = math.exp %178 : vector<2x32xf32>
    %cst_47 = arith.constant 1.000000e+00 : f32
    %180 = vector.broadcast %cst_47 : f32 to vector<2x32xf32>
    %181 = arith.addf %180, %179 : vector<2x32xf32>
    %182 = arith.divf %180, %181 : vector<2x32xf32>
    %183 = vector.extract_strided_slice %176 {offsets = [0, 32], sizes = [2, 32], strides = [1, 1]} : vector<2x128xf32> to vector<2x32xf32>
    %184 = arith.negf %183 : vector<2x32xf32>
    %185 = math.exp %184 : vector<2x32xf32>
    %cst_48 = arith.constant 1.000000e+00 : f32
    %186 = vector.broadcast %cst_48 : f32 to vector<2x32xf32>
    %187 = arith.addf %186, %185 : vector<2x32xf32>
    %188 = arith.divf %186, %187 : vector<2x32xf32>
    %189 = vector.extract_strided_slice %176 {offsets = [0, 64], sizes = [2, 32], strides = [1, 1]} : vector<2x128xf32> to vector<2x32xf32>
    %190 = math.tanh %189 : vector<2x32xf32>
    %191 = vector.extract_strided_slice %176 {offsets = [0, 96], sizes = [2, 32], strides = [1, 1]} : vector<2x128xf32> to vector<2x32xf32>
    %192 = arith.negf %191 : vector<2x32xf32>
    %193 = math.exp %192 : vector<2x32xf32>
    %cst_49 = arith.constant 1.000000e+00 : f32
    %194 = vector.broadcast %cst_49 : f32 to vector<2x32xf32>
    %195 = arith.addf %194, %193 : vector<2x32xf32>
    %196 = arith.divf %194, %195 : vector<2x32xf32>
    %197 = arith.mulf %188, %168 : vector<2x32xf32>
    %198 = arith.mulf %182, %190 : vector<2x32xf32>
    %199 = arith.addf %197, %198 : vector<2x32xf32>
    %200 = math.tanh %199 : vector<2x32xf32>
    %201 = arith.mulf %196, %200 : vector<2x32xf32>
    %c6_i32 = arith.constant 6 : i32
    %202 = arith.index_cast %c6_i32 : i32 to index
    %c0_50 = arith.constant 0 : index
    %c0_51 = arith.constant 0 : index
    %203 = vector.load %arg1[%202, %c0_50, %c0_51] : memref<8x2x32xf32, #tpu.memory_space<vmem>>, vector<1x2x32xf32>
    %204 = vector.shape_cast %203 : vector<1x2x32xf32> to vector<2x32xf32>
    %205 = tpu.concatenate %204, %201 in 1 : vector<2x32xf32>, vector<2x32xf32> -> vector<2x64xf32>
    %cst_52 = arith.constant dense<0.000000e+00> : vector<2x128xf32>
    %206 = tpu.matmul %205, %0, %cst_52 {dimension_numbers = #tpu.dot_dimension_numbers<[1], [0], [0], [1], [0, 0, 1, 1], [], []>} : vector<2x64xf32>, vector<64x128xf32>, vector<2x128xf32> -> vector<2x128xf32>
    %207 = arith.addf %206, %4 : vector<2x128xf32>
    %208 = vector.extract_strided_slice %207 {offsets = [0, 0], sizes = [2, 32], strides = [1, 1]} : vector<2x128xf32> to vector<2x32xf32>
    %209 = arith.negf %208 : vector<2x32xf32>
    %210 = math.exp %209 : vector<2x32xf32>
    %cst_53 = arith.constant 1.000000e+00 : f32
    %211 = vector.broadcast %cst_53 : f32 to vector<2x32xf32>
    %212 = arith.addf %211, %210 : vector<2x32xf32>
    %213 = arith.divf %211, %212 : vector<2x32xf32>
    %214 = vector.extract_strided_slice %207 {offsets = [0, 32], sizes = [2, 32], strides = [1, 1]} : vector<2x128xf32> to vector<2x32xf32>
    %215 = arith.negf %214 : vector<2x32xf32>
    %216 = math.exp %215 : vector<2x32xf32>
    %cst_54 = arith.constant 1.000000e+00 : f32
    %217 = vector.broadcast %cst_54 : f32 to vector<2x32xf32>
    %218 = arith.addf %217, %216 : vector<2x32xf32>
    %219 = arith.divf %217, %218 : vector<2x32xf32>
    %220 = vector.extract_strided_slice %207 {offsets = [0, 64], sizes = [2, 32], strides = [1, 1]} : vector<2x128xf32> to vector<2x32xf32>
    %221 = math.tanh %220 : vector<2x32xf32>
    %222 = vector.extract_strided_slice %207 {offsets = [0, 96], sizes = [2, 32], strides = [1, 1]} : vector<2x128xf32> to vector<2x32xf32>
    %223 = arith.negf %222 : vector<2x32xf32>
    %224 = math.exp %223 : vector<2x32xf32>
    %cst_55 = arith.constant 1.000000e+00 : f32
    %225 = vector.broadcast %cst_55 : f32 to vector<2x32xf32>
    %226 = arith.addf %225, %224 : vector<2x32xf32>
    %227 = arith.divf %225, %226 : vector<2x32xf32>
    %228 = arith.mulf %219, %199 : vector<2x32xf32>
    %229 = arith.mulf %213, %221 : vector<2x32xf32>
    %230 = arith.addf %228, %229 : vector<2x32xf32>
    %231 = math.tanh %230 : vector<2x32xf32>
    %232 = arith.mulf %227, %231 : vector<2x32xf32>
    %c7_i32 = arith.constant 7 : i32
    %233 = arith.index_cast %c7_i32 : i32 to index
    %c0_56 = arith.constant 0 : index
    %c0_57 = arith.constant 0 : index
    %234 = vector.load %arg1[%233, %c0_56, %c0_57] : memref<8x2x32xf32, #tpu.memory_space<vmem>>, vector<1x2x32xf32>
    %235 = vector.shape_cast %234 : vector<1x2x32xf32> to vector<2x32xf32>
    %236 = tpu.concatenate %235, %232 in 1 : vector<2x32xf32>, vector<2x32xf32> -> vector<2x64xf32>
    %cst_58 = arith.constant dense<0.000000e+00> : vector<2x128xf32>
    %237 = tpu.matmul %236, %0, %cst_58 {dimension_numbers = #tpu.dot_dimension_numbers<[1], [0], [0], [1], [0, 0, 1, 1], [], []>} : vector<2x64xf32>, vector<64x128xf32>, vector<2x128xf32> -> vector<2x128xf32>
    %238 = arith.addf %237, %4 : vector<2x128xf32>
    %239 = vector.extract_strided_slice %238 {offsets = [0, 0], sizes = [2, 32], strides = [1, 1]} : vector<2x128xf32> to vector<2x32xf32>
    %240 = arith.negf %239 : vector<2x32xf32>
    %241 = math.exp %240 : vector<2x32xf32>
    %cst_59 = arith.constant 1.000000e+00 : f32
    %242 = vector.broadcast %cst_59 : f32 to vector<2x32xf32>
    %243 = arith.addf %242, %241 : vector<2x32xf32>
    %244 = arith.divf %242, %243 : vector<2x32xf32>
    %245 = vector.extract_strided_slice %238 {offsets = [0, 32], sizes = [2, 32], strides = [1, 1]} : vector<2x128xf32> to vector<2x32xf32>
    %246 = arith.negf %245 : vector<2x32xf32>
    %247 = math.exp %246 : vector<2x32xf32>
    %cst_60 = arith.constant 1.000000e+00 : f32
    %248 = vector.broadcast %cst_60 : f32 to vector<2x32xf32>
    %249 = arith.addf %248, %247 : vector<2x32xf32>
    %250 = arith.divf %248, %249 : vector<2x32xf32>
    %251 = vector.extract_strided_slice %238 {offsets = [0, 64], sizes = [2, 32], strides = [1, 1]} : vector<2x128xf32> to vector<2x32xf32>
    %252 = math.tanh %251 : vector<2x32xf32>
    %253 = vector.extract_strided_slice %238 {offsets = [0, 96], sizes = [2, 32], strides = [1, 1]} : vector<2x128xf32> to vector<2x32xf32>
    %254 = arith.negf %253 : vector<2x32xf32>
    %255 = math.exp %254 : vector<2x32xf32>
    %cst_61 = arith.constant 1.000000e+00 : f32
    %256 = vector.broadcast %cst_61 : f32 to vector<2x32xf32>
    %257 = arith.addf %256, %255 : vector<2x32xf32>
    %258 = arith.divf %256, %257 : vector<2x32xf32>
    %259 = arith.mulf %250, %230 : vector<2x32xf32>
    %260 = arith.mulf %244, %252 : vector<2x32xf32>
    %261 = arith.addf %259, %260 : vector<2x32xf32>
    %262 = math.tanh %261 : vector<2x32xf32>
    %263 = arith.mulf %258, %262 : vector<2x32xf32>
    %c8_i32 = arith.constant 8 : i32
    %cst_62 = arith.constant 0.000000e+00 : f32
    %264 = vector.broadcast %cst_62 : f32 to vector<2x128xf32>
    %c0_63 = arith.constant 0 : index
    %c0_64 = arith.constant 0 : index
    %c0_65 = arith.constant 0 : index
    %265 = vector.load %arg10[%c0_63, %c0_64, %c0_65] : memref<8x2x128xf32, #tpu.memory_space<vmem>>, vector<1x2x128xf32>
    %266 = vector.shape_cast %265 : vector<1x2x128xf32> to vector<2x128xf32>
    %267 = vector.shape_cast %264 : vector<2x128xf32> to vector<1x2x128xf32>
    tpu.vector_store %arg10[%c0_63, %c0_64, %c0_65], %267 {strides = array<i32>} : memref<8x2x128xf32, #tpu.memory_space<vmem>>, vector<1x2x128xf32>,
    %c0_66 = arith.constant 0 : index
    %c0_67 = arith.constant 0 : index
    %c0_68 = arith.constant 0 : index
    %268 = vector.load %arg2[%c0_66, %c0_67, %c0_68] : memref<8x2x32xf32, #tpu.memory_space<vmem>>, vector<1x2x32xf32>
    %269 = vector.shape_cast %268 : vector<1x2x32xf32> to vector<2x32xf32>
    %c1_i32_69 = arith.constant 1 : i32
    %270 = tpu.concatenate %269, %263 in 1 : vector<2x32xf32>, vector<2x32xf32> -> vector<2x64xf32>
    %cst_70 = arith.constant dense<0.000000e+00> : vector<2x128xf32>
    %271 = tpu.matmul %270, %1, %cst_70 {dimension_numbers = #tpu.dot_dimension_numbers<[1], [0], [0], [1], [0, 0, 1, 1], [], []>} : vector<2x64xf32>, vector<64x128xf32>, vector<2x128xf32> -> vector<2x128xf32>
    %272 = arith.addf %271, %7 : vector<2x128xf32>
    %273 = vector.extract_strided_slice %272 {offsets = [0, 0], sizes = [2, 32], strides = [1, 1]} : vector<2x128xf32> to vector<2x32xf32>
    %274 = arith.negf %273 : vector<2x32xf32>
    %275 = math.exp %274 : vector<2x32xf32>
    %cst_71 = arith.constant 1.000000e+00 : f32
    %276 = vector.broadcast %cst_71 : f32 to vector<2x32xf32>
    %277 = arith.addf %276, %275 : vector<2x32xf32>
    %278 = arith.divf %276, %277 : vector<2x32xf32>
    %279 = vector.extract_strided_slice %272 {offsets = [0, 32], sizes = [2, 32], strides = [1, 1]} : vector<2x128xf32> to vector<2x32xf32>
    %280 = arith.negf %279 : vector<2x32xf32>
    %281 = math.exp %280 : vector<2x32xf32>
    %cst_72 = arith.constant 1.000000e+00 : f32
    %282 = vector.broadcast %cst_72 : f32 to vector<2x32xf32>
    %283 = arith.addf %282, %281 : vector<2x32xf32>
    %284 = arith.divf %282, %283 : vector<2x32xf32>
    %285 = vector.extract_strided_slice %272 {offsets = [0, 64], sizes = [2, 32], strides = [1, 1]} : vector<2x128xf32> to vector<2x32xf32>
    %286 = math.tanh %285 : vector<2x32xf32>
    %287 = vector.extract_strided_slice %272 {offsets = [0, 96], sizes = [2, 32], strides = [1, 1]} : vector<2x128xf32> to vector<2x32xf32>
    %288 = arith.negf %287 : vector<2x32xf32>
    %289 = math.exp %288 : vector<2x32xf32>
    %cst_73 = arith.constant 1.000000e+00 : f32
    %290 = vector.broadcast %cst_73 : f32 to vector<2x32xf32>
    %291 = arith.addf %290, %289 : vector<2x32xf32>
    %292 = arith.divf %290, %291 : vector<2x32xf32>
    %293 = arith.mulf %284, %261 : vector<2x32xf32>
    %294 = arith.mulf %278, %286 : vector<2x32xf32>
    %295 = arith.addf %293, %294 : vector<2x32xf32>
    %296 = math.tanh %295 : vector<2x32xf32>
    %297 = arith.mulf %292, %296 : vector<2x32xf32>
    %cst_74 = arith.constant dense<0.000000e+00> : vector<2x128xf32>
    %298 = tpu.matmul %297, %8, %cst_74 {dimension_numbers = #tpu.dot_dimension_numbers<[1], [0], [0], [1], [0, 0, 1, 1], [], []>} : vector<2x32xf32>, vector<32x128xf32>, vector<2x128xf32> -> vector<2x128xf32>
    %299 = arith.addf %298, %11 : vector<2x128xf32>
    %300 = arith.index_cast %c1_i32_69 : i32 to index
    %c0_75 = arith.constant 0 : index
    %c0_76 = arith.constant 0 : index
    %301 = vector.load %arg10[%300, %c0_75, %c0_76] : memref<8x2x128xf32, #tpu.memory_space<vmem>>, vector<1x2x128xf32>
    %302 = vector.shape_cast %301 : vector<1x2x128xf32> to vector<2x128xf32>
    %303 = vector.shape_cast %299 : vector<2x128xf32> to vector<1x2x128xf32>
    tpu.vector_store %arg10[%300, %c0_75, %c0_76], %303 {strides = array<i32>} : memref<8x2x128xf32, #tpu.memory_space<vmem>>, vector<1x2x128xf32>,
    %c16_i32 = arith.constant 16 : i32
    %304 = vector.broadcast %c16_i32 : i32 to vector<2x128xi32>
    %305 = arith.cmpi slt, %13, %304 : vector<2x128xi32>
    %cst_77 = arith.constant 0xFF800000 : f32
    %306 = vector.broadcast %cst_77 : f32 to vector<2x128xf32>
    %307 = arith.select %305, %299, %306 : vector<2x128xi1>, vector<2x128xf32>
    %cst_78 = arith.constant dense<0xFF800000> : vector<2xf32>
    %308 = vector.multi_reduction <maximumf>, %307, %cst_78 [1] : vector<2x128xf32> to vector<2xf32>
    %309 = vector.shape_cast %308 : vector<2xf32> to vector<2x1xf32>
    %310 = vector.broadcast %309 : vector<2x1xf32> to vector<2x128xf32>
    %311 = arith.cmpf oeq, %307, %310 : vector<2x128xf32>
    %c128_i32 = arith.constant 128 : i32
    %312 = vector.broadcast %c128_i32 : i32 to vector<2x128xi32>
    %313 = arith.select %311, %13, %312 : vector<2x128xi1>, vector<2x128xi32>
    %cst_79 = arith.constant dense<2147483647> : vector<2xi32>
    %314 = vector.multi_reduction <minsi>, %313, %cst_79 [1] : vector<2x128xi32> to vector<2xi32>
    %315 = vector.shape_cast %314 : vector<2xi32> to vector<2x1xi32>
    %316 = vector.broadcast %315 : vector<2x1xi32> to vector<2x128xi32>
    %317 = arith.cmpi eq, %13, %316 : vector<2x128xi32>
    %318 = arith.extui %317 : vector<2x128xi1> to vector<2x128xi32>
    %319 = arith.sitofp %318 : vector<2x128xi32> to vector<2x128xf32>
    %cst_80 = arith.constant dense<0.000000e+00> : vector<2x32xf32>
    %320 = tpu.matmul %319, %12, %cst_80 {dimension_numbers = #tpu.dot_dimension_numbers<[1], [0], [0], [1], [0, 0, 1, 1], [], []>} : vector<2x128xf32>, vector<128x32xf32>, vector<2x32xf32> -> vector<2x32xf32>
    %321 = arith.index_cast %c1_i32_69 : i32 to index
    %322 = memref.load %arg0[%321] : memref<8xi32, #tpu.memory_space<smem>>
    %c0_i32_81 = arith.constant 0 : i32
    %323 = arith.cmpi ne, %322, %c0_i32_81 : i32
    %324 = arith.extui %323 : i1 to i32
    %325 = arith.sitofp %324 : i32 to f32
    %326 = arith.index_cast %c1_i32_69 : i32 to index
    %c0_82 = arith.constant 0 : index
    %c0_83 = arith.constant 0 : index
    %327 = vector.load %arg2[%326, %c0_82, %c0_83] : memref<8x2x32xf32, #tpu.memory_space<vmem>>, vector<1x2x32xf32>
    %328 = vector.shape_cast %327 : vector<1x2x32xf32> to vector<2x32xf32>
    %329 = vector.broadcast %325 : f32 to vector<2x32xf32>
    %330 = arith.mulf %329, %328 : vector<2x32xf32>
    %cst_84 = arith.constant 1.000000e+00 : f32
    %331 = arith.subf %cst_84, %325 : f32
    %332 = vector.broadcast %331 : f32 to vector<2x32xf32>
    %333 = arith.mulf %332, %320 : vector<2x32xf32>
    %334 = arith.addf %330, %333 : vector<2x32xf32>
    %c2_i32_85 = arith.constant 2 : i32
    %335 = tpu.concatenate %334, %297 in 1 : vector<2x32xf32>, vector<2x32xf32> -> vector<2x64xf32>
    %cst_86 = arith.constant dense<0.000000e+00> : vector<2x128xf32>
    %336 = tpu.matmul %335, %1, %cst_86 {dimension_numbers = #tpu.dot_dimension_numbers<[1], [0], [0], [1], [0, 0, 1, 1], [], []>} : vector<2x64xf32>, vector<64x128xf32>, vector<2x128xf32> -> vector<2x128xf32>
    %337 = arith.addf %336, %7 : vector<2x128xf32>
    %338 = vector.extract_strided_slice %337 {offsets = [0, 0], sizes = [2, 32], strides = [1, 1]} : vector<2x128xf32> to vector<2x32xf32>
    %339 = arith.negf %338 : vector<2x32xf32>
    %340 = math.exp %339 : vector<2x32xf32>
    %cst_87 = arith.constant 1.000000e+00 : f32
    %341 = vector.broadcast %cst_87 : f32 to vector<2x32xf32>
    %342 = arith.addf %341, %340 : vector<2x32xf32>
    %343 = arith.divf %341, %342 : vector<2x32xf32>
    %344 = vector.extract_strided_slice %337 {offsets = [0, 32], sizes = [2, 32], strides = [1, 1]} : vector<2x128xf32> to vector<2x32xf32>
    %345 = arith.negf %344 : vector<2x32xf32>
    %346 = math.exp %345 : vector<2x32xf32>
    %cst_88 = arith.constant 1.000000e+00 : f32
    %347 = vector.broadcast %cst_88 : f32 to vector<2x32xf32>
    %348 = arith.addf %347, %346 : vector<2x32xf32>
    %349 = arith.divf %347, %348 : vector<2x32xf32>
    %350 = vector.extract_strided_slice %337 {offsets = [0, 64], sizes = [2, 32], strides = [1, 1]} : vector<2x128xf32> to vector<2x32xf32>
    %351 = math.tanh %350 : vector<2x32xf32>
    %352 = vector.extract_strided_slice %337 {offsets = [0, 96], sizes = [2, 32], strides = [1, 1]} : vector<2x128xf32> to vector<2x32xf32>
    %353 = arith.negf %352 : vector<2x32xf32>
    %354 = math.exp %353 : vector<2x32xf32>
    %cst_89 = arith.constant 1.000000e+00 : f32
    %355 = vector.broadcast %cst_89 : f32 to vector<2x32xf32>
    %356 = arith.addf %355, %354 : vector<2x32xf32>
    %357 = arith.divf %355, %356 : vector<2x32xf32>
    %358 = arith.mulf %349, %295 : vector<2x32xf32>
    %359 = arith.mulf %343, %351 : vector<2x32xf32>
    %360 = arith.addf %358, %359 : vector<2x32xf32>
    %361 = math.tanh %360 : vector<2x32xf32>
    %362 = arith.mulf %357, %361 : vector<2x32xf32>
    %cst_90 = arith.constant dense<0.000000e+00> : vector<2x128xf32>
    %363 = tpu.matmul %362, %8, %cst_90 {dimension_numbers = #tpu.dot_dimension_numbers<[1], [0], [0], [1], [0, 0, 1, 1], [], []>} : vector<2x32xf32>, vector<32x128xf32>, vector<2x128xf32> -> vector<2x128xf32>
    %364 = arith.addf %363, %11 : vector<2x128xf32>
    %365 = arith.index_cast %c2_i32_85 : i32 to index
    %c0_91 = arith.constant 0 : index
    %c0_92 = arith.constant 0 : index
    %366 = vector.load %arg10[%365, %c0_91, %c0_92] : memref<8x2x128xf32, #tpu.memory_space<vmem>>, vector<1x2x128xf32>
    %367 = vector.shape_cast %366 : vector<1x2x128xf32> to vector<2x128xf32>
    %368 = vector.shape_cast %364 : vector<2x128xf32> to vector<1x2x128xf32>
    tpu.vector_store %arg10[%365, %c0_91, %c0_92], %368 {strides = array<i32>} : memref<8x2x128xf32, #tpu.memory_space<vmem>>, vector<1x2x128xf32>,
    %c16_i32_93 = arith.constant 16 : i32
    %369 = vector.broadcast %c16_i32_93 : i32 to vector<2x128xi32>
    %370 = arith.cmpi slt, %13, %369 : vector<2x128xi32>
    %cst_94 = arith.constant 0xFF800000 : f32
    %371 = vector.broadcast %cst_94 : f32 to vector<2x128xf32>
    %372 = arith.select %370, %364, %371 : vector<2x128xi1>, vector<2x128xf32>
    %cst_95 = arith.constant dense<0xFF800000> : vector<2xf32>
    %373 = vector.multi_reduction <maximumf>, %372, %cst_95 [1] : vector<2x128xf32> to vector<2xf32>
    %374 = vector.shape_cast %373 : vector<2xf32> to vector<2x1xf32>
    %375 = vector.broadcast %374 : vector<2x1xf32> to vector<2x128xf32>
    %376 = arith.cmpf oeq, %372, %375 : vector<2x128xf32>
    %c128_i32_96 = arith.constant 128 : i32
    %377 = vector.broadcast %c128_i32_96 : i32 to vector<2x128xi32>
    %378 = arith.select %376, %13, %377 : vector<2x128xi1>, vector<2x128xi32>
    %cst_97 = arith.constant dense<2147483647> : vector<2xi32>
    %379 = vector.multi_reduction <minsi>, %378, %cst_97 [1] : vector<2x128xi32> to vector<2xi32>
    %380 = vector.shape_cast %379 : vector<2xi32> to vector<2x1xi32>
    %381 = vector.broadcast %380 : vector<2x1xi32> to vector<2x128xi32>
    %382 = arith.cmpi eq, %13, %381 : vector<2x128xi32>
    %383 = arith.extui %382 : vector<2x128xi1> to vector<2x128xi32>
    %384 = arith.sitofp %383 : vector<2x128xi32> to vector<2x128xf32>
    %cst_98 = arith.constant dense<0.000000e+00> : vector<2x32xf32>
    %385 = tpu.matmul %384, %12, %cst_98 {dimension_numbers = #tpu.dot_dimension_numbers<[1], [0], [0], [1], [0, 0, 1, 1], [], []>} : vector<2x128xf32>, vector<128x32xf32>, vector<2x32xf32> -> vector<2x32xf32>
    %386 = arith.index_cast %c2_i32_85 : i32 to index
    %387 = memref.load %arg0[%386] : memref<8xi32, #tpu.memory_space<smem>>
    %c0_i32_99 = arith.constant 0 : i32
    %388 = arith.cmpi ne, %387, %c0_i32_99 : i32
    %389 = arith.extui %388 : i1 to i32
    %390 = arith.sitofp %389 : i32 to f32
    %391 = arith.index_cast %c2_i32_85 : i32 to index
    %c0_100 = arith.constant 0 : index
    %c0_101 = arith.constant 0 : index
    %392 = vector.load %arg2[%391, %c0_100, %c0_101] : memref<8x2x32xf32, #tpu.memory_space<vmem>>, vector<1x2x32xf32>
    %393 = vector.shape_cast %392 : vector<1x2x32xf32> to vector<2x32xf32>
    %394 = vector.broadcast %390 : f32 to vector<2x32xf32>
    %395 = arith.mulf %394, %393 : vector<2x32xf32>
    %cst_102 = arith.constant 1.000000e+00 : f32
    %396 = arith.subf %cst_102, %390 : f32
    %397 = vector.broadcast %396 : f32 to vector<2x32xf32>
    %398 = arith.mulf %397, %385 : vector<2x32xf32>
    %399 = arith.addf %395, %398 : vector<2x32xf32>
    %c3_i32_103 = arith.constant 3 : i32
    %400 = tpu.concatenate %399, %362 in 1 : vector<2x32xf32>, vector<2x32xf32> -> vector<2x64xf32>
    %cst_104 = arith.constant dense<0.000000e+00> : vector<2x128xf32>
    %401 = tpu.matmul %400, %1, %cst_104 {dimension_numbers = #tpu.dot_dimension_numbers<[1], [0], [0], [1], [0, 0, 1, 1], [], []>} : vector<2x64xf32>, vector<64x128xf32>, vector<2x128xf32> -> vector<2x128xf32>
    %402 = arith.addf %401, %7 : vector<2x128xf32>
    %403 = vector.extract_strided_slice %402 {offsets = [0, 0], sizes = [2, 32], strides = [1, 1]} : vector<2x128xf32> to vector<2x32xf32>
    %404 = arith.negf %403 : vector<2x32xf32>
    %405 = math.exp %404 : vector<2x32xf32>
    %cst_105 = arith.constant 1.000000e+00 : f32
    %406 = vector.broadcast %cst_105 : f32 to vector<2x32xf32>
    %407 = arith.addf %406, %405 : vector<2x32xf32>
    %408 = arith.divf %406, %407 : vector<2x32xf32>
    %409 = vector.extract_strided_slice %402 {offsets = [0, 32], sizes = [2, 32], strides = [1, 1]} : vector<2x128xf32> to vector<2x32xf32>
    %410 = arith.negf %409 : vector<2x32xf32>
    %411 = math.exp %410 : vector<2x32xf32>
    %cst_106 = arith.constant 1.000000e+00 : f32
    %412 = vector.broadcast %cst_106 : f32 to vector<2x32xf32>
    %413 = arith.addf %412, %411 : vector<2x32xf32>
    %414 = arith.divf %412, %413 : vector<2x32xf32>
    %415 = vector.extract_strided_slice %402 {offsets = [0, 64], sizes = [2, 32], strides = [1, 1]} : vector<2x128xf32> to vector<2x32xf32>
    %416 = math.tanh %415 : vector<2x32xf32>
    %417 = vector.extract_strided_slice %402 {offsets = [0, 96], sizes = [2, 32], strides = [1, 1]} : vector<2x128xf32> to vector<2x32xf32>
    %418 = arith.negf %417 : vector<2x32xf32>
    %419 = math.exp %418 : vector<2x32xf32>
    %cst_107 = arith.constant 1.000000e+00 : f32
    %420 = vector.broadcast %cst_107 : f32 to vector<2x32xf32>
    %421 = arith.addf %420, %419 : vector<2x32xf32>
    %422 = arith.divf %420, %421 : vector<2x32xf32>
    %423 = arith.mulf %414, %360 : vector<2x32xf32>
    %424 = arith.mulf %408, %416 : vector<2x32xf32>
    %425 = arith.addf %423, %424 : vector<2x32xf32>
    %426 = math.tanh %425 : vector<2x32xf32>
    %427 = arith.mulf %422, %426 : vector<2x32xf32>
    %cst_108 = arith.constant dense<0.000000e+00> : vector<2x128xf32>
    %428 = tpu.matmul %427, %8, %cst_108 {dimension_numbers = #tpu.dot_dimension_numbers<[1], [0], [0], [1], [0, 0, 1, 1], [], []>} : vector<2x32xf32>, vector<32x128xf32>, vector<2x128xf32> -> vector<2x128xf32>
    %429 = arith.addf %428, %11 : vector<2x128xf32>
    %430 = arith.index_cast %c3_i32_103 : i32 to index
    %c0_109 = arith.constant 0 : index
    %c0_110 = arith.constant 0 : index
    %431 = vector.load %arg10[%430, %c0_109, %c0_110] : memref<8x2x128xf32, #tpu.memory_space<vmem>>, vector<1x2x128xf32>
    %432 = vector.shape_cast %431 : vector<1x2x128xf32> to vector<2x128xf32>
    %433 = vector.shape_cast %429 : vector<2x128xf32> to vector<1x2x128xf32>
    tpu.vector_store %arg10[%430, %c0_109, %c0_110], %433 {strides = array<i32>} : memref<8x2x128xf32, #tpu.memory_space<vmem>>, vector<1x2x128xf32>,
    %c16_i32_111 = arith.constant 16 : i32
    %434 = vector.broadcast %c16_i32_111 : i32 to vector<2x128xi32>
    %435 = arith.cmpi slt, %13, %434 : vector<2x128xi32>
    %cst_112 = arith.constant 0xFF800000 : f32
    %436 = vector.broadcast %cst_112 : f32 to vector<2x128xf32>
    %437 = arith.select %435, %429, %436 : vector<2x128xi1>, vector<2x128xf32>
    %cst_113 = arith.constant dense<0xFF800000> : vector<2xf32>
    %438 = vector.multi_reduction <maximumf>, %437, %cst_113 [1] : vector<2x128xf32> to vector<2xf32>
    %439 = vector.shape_cast %438 : vector<2xf32> to vector<2x1xf32>
    %440 = vector.broadcast %439 : vector<2x1xf32> to vector<2x128xf32>
    %441 = arith.cmpf oeq, %437, %440 : vector<2x128xf32>
    %c128_i32_114 = arith.constant 128 : i32
    %442 = vector.broadcast %c128_i32_114 : i32 to vector<2x128xi32>
    %443 = arith.select %441, %13, %442 : vector<2x128xi1>, vector<2x128xi32>
    %cst_115 = arith.constant dense<2147483647> : vector<2xi32>
    %444 = vector.multi_reduction <minsi>, %443, %cst_115 [1] : vector<2x128xi32> to vector<2xi32>
    %445 = vector.shape_cast %444 : vector<2xi32> to vector<2x1xi32>
    %446 = vector.broadcast %445 : vector<2x1xi32> to vector<2x128xi32>
    %447 = arith.cmpi eq, %13, %446 : vector<2x128xi32>
    %448 = arith.extui %447 : vector<2x128xi1> to vector<2x128xi32>
    %449 = arith.sitofp %448 : vector<2x128xi32> to vector<2x128xf32>
    %cst_116 = arith.constant dense<0.000000e+00> : vector<2x32xf32>
    %450 = tpu.matmul %449, %12, %cst_116 {dimension_numbers = #tpu.dot_dimension_numbers<[1], [0], [0], [1], [0, 0, 1, 1], [], []>} : vector<2x128xf32>, vector<128x32xf32>, vector<2x32xf32> -> vector<2x32xf32>
    %451 = arith.index_cast %c3_i32_103 : i32 to index
    %452 = memref.load %arg0[%451] : memref<8xi32, #tpu.memory_space<smem>>
    %c0_i32_117 = arith.constant 0 : i32
    %453 = arith.cmpi ne, %452, %c0_i32_117 : i32
    %454 = arith.extui %453 : i1 to i32
    %455 = arith.sitofp %454 : i32 to f32
    %456 = arith.index_cast %c3_i32_103 : i32 to index
    %c0_118 = arith.constant 0 : index
    %c0_119 = arith.constant 0 : index
    %457 = vector.load %arg2[%456, %c0_118, %c0_119] : memref<8x2x32xf32, #tpu.memory_space<vmem>>, vector<1x2x32xf32>
    %458 = vector.shape_cast %457 : vector<1x2x32xf32> to vector<2x32xf32>
    %459 = vector.broadcast %455 : f32 to vector<2x32xf32>
    %460 = arith.mulf %459, %458 : vector<2x32xf32>
    %cst_120 = arith.constant 1.000000e+00 : f32
    %461 = arith.subf %cst_120, %455 : f32
    %462 = vector.broadcast %461 : f32 to vector<2x32xf32>
    %463 = arith.mulf %462, %450 : vector<2x32xf32>
    %464 = arith.addf %460, %463 : vector<2x32xf32>
    %c4_i32_121 = arith.constant 4 : i32
    %465 = tpu.concatenate %464, %427 in 1 : vector<2x32xf32>, vector<2x32xf32> -> vector<2x64xf32>
    %cst_122 = arith.constant dense<0.000000e+00> : vector<2x128xf32>
    %466 = tpu.matmul %465, %1, %cst_122 {dimension_numbers = #tpu.dot_dimension_numbers<[1], [0], [0], [1], [0, 0, 1, 1], [], []>} : vector<2x64xf32>, vector<64x128xf32>, vector<2x128xf32> -> vector<2x128xf32>
    %467 = arith.addf %466, %7 : vector<2x128xf32>
    %468 = vector.extract_strided_slice %467 {offsets = [0, 0], sizes = [2, 32], strides = [1, 1]} : vector<2x128xf32> to vector<2x32xf32>
    %469 = arith.negf %468 : vector<2x32xf32>
    %470 = math.exp %469 : vector<2x32xf32>
    %cst_123 = arith.constant 1.000000e+00 : f32
    %471 = vector.broadcast %cst_123 : f32 to vector<2x32xf32>
    %472 = arith.addf %471, %470 : vector<2x32xf32>
    %473 = arith.divf %471, %472 : vector<2x32xf32>
    %474 = vector.extract_strided_slice %467 {offsets = [0, 32], sizes = [2, 32], strides = [1, 1]} : vector<2x128xf32> to vector<2x32xf32>
    %475 = arith.negf %474 : vector<2x32xf32>
    %476 = math.exp %475 : vector<2x32xf32>
    %cst_124 = arith.constant 1.000000e+00 : f32
    %477 = vector.broadcast %cst_124 : f32 to vector<2x32xf32>
    %478 = arith.addf %477, %476 : vector<2x32xf32>
    %479 = arith.divf %477, %478 : vector<2x32xf32>
    %480 = vector.extract_strided_slice %467 {offsets = [0, 64], sizes = [2, 32], strides = [1, 1]} : vector<2x128xf32> to vector<2x32xf32>
    %481 = math.tanh %480 : vector<2x32xf32>
    %482 = vector.extract_strided_slice %467 {offsets = [0, 96], sizes = [2, 32], strides = [1, 1]} : vector<2x128xf32> to vector<2x32xf32>
    %483 = arith.negf %482 : vector<2x32xf32>
    %484 = math.exp %483 : vector<2x32xf32>
    %cst_125 = arith.constant 1.000000e+00 : f32
    %485 = vector.broadcast %cst_125 : f32 to vector<2x32xf32>
    %486 = arith.addf %485, %484 : vector<2x32xf32>
    %487 = arith.divf %485, %486 : vector<2x32xf32>
    %488 = arith.mulf %479, %425 : vector<2x32xf32>
    %489 = arith.mulf %473, %481 : vector<2x32xf32>
    %490 = arith.addf %488, %489 : vector<2x32xf32>
    %491 = math.tanh %490 : vector<2x32xf32>
    %492 = arith.mulf %487, %491 : vector<2x32xf32>
    %cst_126 = arith.constant dense<0.000000e+00> : vector<2x128xf32>
    %493 = tpu.matmul %492, %8, %cst_126 {dimension_numbers = #tpu.dot_dimension_numbers<[1], [0], [0], [1], [0, 0, 1, 1], [], []>} : vector<2x32xf32>, vector<32x128xf32>, vector<2x128xf32> -> vector<2x128xf32>
    %494 = arith.addf %493, %11 : vector<2x128xf32>
    %495 = arith.index_cast %c4_i32_121 : i32 to index
    %c0_127 = arith.constant 0 : index
    %c0_128 = arith.constant 0 : index
    %496 = vector.load %arg10[%495, %c0_127, %c0_128] : memref<8x2x128xf32, #tpu.memory_space<vmem>>, vector<1x2x128xf32>
    %497 = vector.shape_cast %496 : vector<1x2x128xf32> to vector<2x128xf32>
    %498 = vector.shape_cast %494 : vector<2x128xf32> to vector<1x2x128xf32>
    tpu.vector_store %arg10[%495, %c0_127, %c0_128], %498 {strides = array<i32>} : memref<8x2x128xf32, #tpu.memory_space<vmem>>, vector<1x2x128xf32>,
    %c16_i32_129 = arith.constant 16 : i32
    %499 = vector.broadcast %c16_i32_129 : i32 to vector<2x128xi32>
    %500 = arith.cmpi slt, %13, %499 : vector<2x128xi32>
    %cst_130 = arith.constant 0xFF800000 : f32
    %501 = vector.broadcast %cst_130 : f32 to vector<2x128xf32>
    %502 = arith.select %500, %494, %501 : vector<2x128xi1>, vector<2x128xf32>
    %cst_131 = arith.constant dense<0xFF800000> : vector<2xf32>
    %503 = vector.multi_reduction <maximumf>, %502, %cst_131 [1] : vector<2x128xf32> to vector<2xf32>
    %504 = vector.shape_cast %503 : vector<2xf32> to vector<2x1xf32>
    %505 = vector.broadcast %504 : vector<2x1xf32> to vector<2x128xf32>
    %506 = arith.cmpf oeq, %502, %505 : vector<2x128xf32>
    %c128_i32_132 = arith.constant 128 : i32
    %507 = vector.broadcast %c128_i32_132 : i32 to vector<2x128xi32>
    %508 = arith.select %506, %13, %507 : vector<2x128xi1>, vector<2x128xi32>
    %cst_133 = arith.constant dense<2147483647> : vector<2xi32>
    %509 = vector.multi_reduction <minsi>, %508, %cst_133 [1] : vector<2x128xi32> to vector<2xi32>
    %510 = vector.shape_cast %509 : vector<2xi32> to vector<2x1xi32>
    %511 = vector.broadcast %510 : vector<2x1xi32> to vector<2x128xi32>
    %512 = arith.cmpi eq, %13, %511 : vector<2x128xi32>
    %513 = arith.extui %512 : vector<2x128xi1> to vector<2x128xi32>
    %514 = arith.sitofp %513 : vector<2x128xi32> to vector<2x128xf32>
    %cst_134 = arith.constant dense<0.000000e+00> : vector<2x32xf32>
    %515 = tpu.matmul %514, %12, %cst_134 {dimension_numbers = #tpu.dot_dimension_numbers<[1], [0], [0], [1], [0, 0, 1, 1], [], []>} : vector<2x128xf32>, vector<128x32xf32>, vector<2x32xf32> -> vector<2x32xf32>
    %516 = arith.index_cast %c4_i32_121 : i32 to index
    %517 = memref.load %arg0[%516] : memref<8xi32, #tpu.memory_space<smem>>
    %c0_i32_135 = arith.constant 0 : i32
    %518 = arith.cmpi ne, %517, %c0_i32_135 : i32
    %519 = arith.extui %518 : i1 to i32
    %520 = arith.sitofp %519 : i32 to f32
    %521 = arith.index_cast %c4_i32_121 : i32 to index
    %c0_136 = arith.constant 0 : index
    %c0_137 = arith.constant 0 : index
    %522 = vector.load %arg2[%521, %c0_136, %c0_137] : memref<8x2x32xf32, #tpu.memory_space<vmem>>, vector<1x2x32xf32>
    %523 = vector.shape_cast %522 : vector<1x2x32xf32> to vector<2x32xf32>
    %524 = vector.broadcast %520 : f32 to vector<2x32xf32>
    %525 = arith.mulf %524, %523 : vector<2x32xf32>
    %cst_138 = arith.constant 1.000000e+00 : f32
    %526 = arith.subf %cst_138, %520 : f32
    %527 = vector.broadcast %526 : f32 to vector<2x32xf32>
    %528 = arith.mulf %527, %515 : vector<2x32xf32>
    %529 = arith.addf %525, %528 : vector<2x32xf32>
    %c5_i32_139 = arith.constant 5 : i32
    %530 = tpu.concatenate %529, %492 in 1 : vector<2x32xf32>, vector<2x32xf32> -> vector<2x64xf32>
    %cst_140 = arith.constant dense<0.000000e+00> : vector<2x128xf32>
    %531 = tpu.matmul %530, %1, %cst_140 {dimension_numbers = #tpu.dot_dimension_numbers<[1], [0], [0], [1], [0, 0, 1, 1], [], []>} : vector<2x64xf32>, vector<64x128xf32>, vector<2x128xf32> -> vector<2x128xf32>
    %532 = arith.addf %531, %7 : vector<2x128xf32>
    %533 = vector.extract_strided_slice %532 {offsets = [0, 0], sizes = [2, 32], strides = [1, 1]} : vector<2x128xf32> to vector<2x32xf32>
    %534 = arith.negf %533 : vector<2x32xf32>
    %535 = math.exp %534 : vector<2x32xf32>
    %cst_141 = arith.constant 1.000000e+00 : f32
    %536 = vector.broadcast %cst_141 : f32 to vector<2x32xf32>
    %537 = arith.addf %536, %535 : vector<2x32xf32>
    %538 = arith.divf %536, %537 : vector<2x32xf32>
    %539 = vector.extract_strided_slice %532 {offsets = [0, 32], sizes = [2, 32], strides = [1, 1]} : vector<2x128xf32> to vector<2x32xf32>
    %540 = arith.negf %539 : vector<2x32xf32>
    %541 = math.exp %540 : vector<2x32xf32>
    %cst_142 = arith.constant 1.000000e+00 : f32
    %542 = vector.broadcast %cst_142 : f32 to vector<2x32xf32>
    %543 = arith.addf %542, %541 : vector<2x32xf32>
    %544 = arith.divf %542, %543 : vector<2x32xf32>
    %545 = vector.extract_strided_slice %532 {offsets = [0, 64], sizes = [2, 32], strides = [1, 1]} : vector<2x128xf32> to vector<2x32xf32>
    %546 = math.tanh %545 : vector<2x32xf32>
    %547 = vector.extract_strided_slice %532 {offsets = [0, 96], sizes = [2, 32], strides = [1, 1]} : vector<2x128xf32> to vector<2x32xf32>
    %548 = arith.negf %547 : vector<2x32xf32>
    %549 = math.exp %548 : vector<2x32xf32>
    %cst_143 = arith.constant 1.000000e+00 : f32
    %550 = vector.broadcast %cst_143 : f32 to vector<2x32xf32>
    %551 = arith.addf %550, %549 : vector<2x32xf32>
    %552 = arith.divf %550, %551 : vector<2x32xf32>
    %553 = arith.mulf %544, %490 : vector<2x32xf32>
    %554 = arith.mulf %538, %546 : vector<2x32xf32>
    %555 = arith.addf %553, %554 : vector<2x32xf32>
    %556 = math.tanh %555 : vector<2x32xf32>
    %557 = arith.mulf %552, %556 : vector<2x32xf32>
    %cst_144 = arith.constant dense<0.000000e+00> : vector<2x128xf32>
    %558 = tpu.matmul %557, %8, %cst_144 {dimension_numbers = #tpu.dot_dimension_numbers<[1], [0], [0], [1], [0, 0, 1, 1], [], []>} : vector<2x32xf32>, vector<32x128xf32>, vector<2x128xf32> -> vector<2x128xf32>
    %559 = arith.addf %558, %11 : vector<2x128xf32>
    %560 = arith.index_cast %c5_i32_139 : i32 to index
    %c0_145 = arith.constant 0 : index
    %c0_146 = arith.constant 0 : index
    %561 = vector.load %arg10[%560, %c0_145, %c0_146] : memref<8x2x128xf32, #tpu.memory_space<vmem>>, vector<1x2x128xf32>
    %562 = vector.shape_cast %561 : vector<1x2x128xf32> to vector<2x128xf32>
    %563 = vector.shape_cast %559 : vector<2x128xf32> to vector<1x2x128xf32>
    tpu.vector_store %arg10[%560, %c0_145, %c0_146], %563 {strides = array<i32>} : memref<8x2x128xf32, #tpu.memory_space<vmem>>, vector<1x2x128xf32>,
    %c16_i32_147 = arith.constant 16 : i32
    %564 = vector.broadcast %c16_i32_147 : i32 to vector<2x128xi32>
    %565 = arith.cmpi slt, %13, %564 : vector<2x128xi32>
    %cst_148 = arith.constant 0xFF800000 : f32
    %566 = vector.broadcast %cst_148 : f32 to vector<2x128xf32>
    %567 = arith.select %565, %559, %566 : vector<2x128xi1>, vector<2x128xf32>
    %cst_149 = arith.constant dense<0xFF800000> : vector<2xf32>
    %568 = vector.multi_reduction <maximumf>, %567, %cst_149 [1] : vector<2x128xf32> to vector<2xf32>
    %569 = vector.shape_cast %568 : vector<2xf32> to vector<2x1xf32>
    %570 = vector.broadcast %569 : vector<2x1xf32> to vector<2x128xf32>
    %571 = arith.cmpf oeq, %567, %570 : vector<2x128xf32>
    %c128_i32_150 = arith.constant 128 : i32
    %572 = vector.broadcast %c128_i32_150 : i32 to vector<2x128xi32>
    %573 = arith.select %571, %13, %572 : vector<2x128xi1>, vector<2x128xi32>
    %cst_151 = arith.constant dense<2147483647> : vector<2xi32>
    %574 = vector.multi_reduction <minsi>, %573, %cst_151 [1] : vector<2x128xi32> to vector<2xi32>
    %575 = vector.shape_cast %574 : vector<2xi32> to vector<2x1xi32>
    %576 = vector.broadcast %575 : vector<2x1xi32> to vector<2x128xi32>
    %577 = arith.cmpi eq, %13, %576 : vector<2x128xi32>
    %578 = arith.extui %577 : vector<2x128xi1> to vector<2x128xi32>
    %579 = arith.sitofp %578 : vector<2x128xi32> to vector<2x128xf32>
    %cst_152 = arith.constant dense<0.000000e+00> : vector<2x32xf32>
    %580 = tpu.matmul %579, %12, %cst_152 {dimension_numbers = #tpu.dot_dimension_numbers<[1], [0], [0], [1], [0, 0, 1, 1], [], []>} : vector<2x128xf32>, vector<128x32xf32>, vector<2x32xf32> -> vector<2x32xf32>
    %581 = arith.index_cast %c5_i32_139 : i32 to index
    %582 = memref.load %arg0[%581] : memref<8xi32, #tpu.memory_space<smem>>
    %c0_i32_153 = arith.constant 0 : i32
    %583 = arith.cmpi ne, %582, %c0_i32_153 : i32
    %584 = arith.extui %583 : i1 to i32
    %585 = arith.sitofp %584 : i32 to f32
    %586 = arith.index_cast %c5_i32_139 : i32 to index
    %c0_154 = arith.constant 0 : index
    %c0_155 = arith.constant 0 : index
    %587 = vector.load %arg2[%586, %c0_154, %c0_155] : memref<8x2x32xf32, #tpu.memory_space<vmem>>, vector<1x2x32xf32>
    %588 = vector.shape_cast %587 : vector<1x2x32xf32> to vector<2x32xf32>
    %589 = vector.broadcast %585 : f32 to vector<2x32xf32>
    %590 = arith.mulf %589, %588 : vector<2x32xf32>
    %cst_156 = arith.constant 1.000000e+00 : f32
    %591 = arith.subf %cst_156, %585 : f32
    %592 = vector.broadcast %591 : f32 to vector<2x32xf32>
    %593 = arith.mulf %592, %580 : vector<2x32xf32>
    %594 = arith.addf %590, %593 : vector<2x32xf32>
    %c6_i32_157 = arith.constant 6 : i32
    %595 = tpu.concatenate %594, %557 in 1 : vector<2x32xf32>, vector<2x32xf32> -> vector<2x64xf32>
    %cst_158 = arith.constant dense<0.000000e+00> : vector<2x128xf32>
    %596 = tpu.matmul %595, %1, %cst_158 {dimension_numbers = #tpu.dot_dimension_numbers<[1], [0], [0], [1], [0, 0, 1, 1], [], []>} : vector<2x64xf32>, vector<64x128xf32>, vector<2x128xf32> -> vector<2x128xf32>
    %597 = arith.addf %596, %7 : vector<2x128xf32>
    %598 = vector.extract_strided_slice %597 {offsets = [0, 0], sizes = [2, 32], strides = [1, 1]} : vector<2x128xf32> to vector<2x32xf32>
    %599 = arith.negf %598 : vector<2x32xf32>
    %600 = math.exp %599 : vector<2x32xf32>
    %cst_159 = arith.constant 1.000000e+00 : f32
    %601 = vector.broadcast %cst_159 : f32 to vector<2x32xf32>
    %602 = arith.addf %601, %600 : vector<2x32xf32>
    %603 = arith.divf %601, %602 : vector<2x32xf32>
    %604 = vector.extract_strided_slice %597 {offsets = [0, 32], sizes = [2, 32], strides = [1, 1]} : vector<2x128xf32> to vector<2x32xf32>
    %605 = arith.negf %604 : vector<2x32xf32>
    %606 = math.exp %605 : vector<2x32xf32>
    %cst_160 = arith.constant 1.000000e+00 : f32
    %607 = vector.broadcast %cst_160 : f32 to vector<2x32xf32>
    %608 = arith.addf %607, %606 : vector<2x32xf32>
    %609 = arith.divf %607, %608 : vector<2x32xf32>
    %610 = vector.extract_strided_slice %597 {offsets = [0, 64], sizes = [2, 32], strides = [1, 1]} : vector<2x128xf32> to vector<2x32xf32>
    %611 = math.tanh %610 : vector<2x32xf32>
    %612 = vector.extract_strided_slice %597 {offsets = [0, 96], sizes = [2, 32], strides = [1, 1]} : vector<2x128xf32> to vector<2x32xf32>
    %613 = arith.negf %612 : vector<2x32xf32>
    %614 = math.exp %613 : vector<2x32xf32>
    %cst_161 = arith.constant 1.000000e+00 : f32
    %615 = vector.broadcast %cst_161 : f32 to vector<2x32xf32>
    %616 = arith.addf %615, %614 : vector<2x32xf32>
    %617 = arith.divf %615, %616 : vector<2x32xf32>
    %618 = arith.mulf %609, %555 : vector<2x32xf32>
    %619 = arith.mulf %603, %611 : vector<2x32xf32>
    %620 = arith.addf %618, %619 : vector<2x32xf32>
    %621 = math.tanh %620 : vector<2x32xf32>
    %622 = arith.mulf %617, %621 : vector<2x32xf32>
    %cst_162 = arith.constant dense<0.000000e+00> : vector<2x128xf32>
    %623 = tpu.matmul %622, %8, %cst_162 {dimension_numbers = #tpu.dot_dimension_numbers<[1], [0], [0], [1], [0, 0, 1, 1], [], []>} : vector<2x32xf32>, vector<32x128xf32>, vector<2x128xf32> -> vector<2x128xf32>
    %624 = arith.addf %623, %11 : vector<2x128xf32>
    %625 = arith.index_cast %c6_i32_157 : i32 to index
    %c0_163 = arith.constant 0 : index
    %c0_164 = arith.constant 0 : index
    %626 = vector.load %arg10[%625, %c0_163, %c0_164] : memref<8x2x128xf32, #tpu.memory_space<vmem>>, vector<1x2x128xf32>
    %627 = vector.shape_cast %626 : vector<1x2x128xf32> to vector<2x128xf32>
    %628 = vector.shape_cast %624 : vector<2x128xf32> to vector<1x2x128xf32>
    tpu.vector_store %arg10[%625, %c0_163, %c0_164], %628 {strides = array<i32>} : memref<8x2x128xf32, #tpu.memory_space<vmem>>, vector<1x2x128xf32>,
    %c16_i32_165 = arith.constant 16 : i32
    %629 = vector.broadcast %c16_i32_165 : i32 to vector<2x128xi32>
    %630 = arith.cmpi slt, %13, %629 : vector<2x128xi32>
    %cst_166 = arith.constant 0xFF800000 : f32
    %631 = vector.broadcast %cst_166 : f32 to vector<2x128xf32>
    %632 = arith.select %630, %624, %631 : vector<2x128xi1>, vector<2x128xf32>
    %cst_167 = arith.constant dense<0xFF800000> : vector<2xf32>
    %633 = vector.multi_reduction <maximumf>, %632, %cst_167 [1] : vector<2x128xf32> to vector<2xf32>
    %634 = vector.shape_cast %633 : vector<2xf32> to vector<2x1xf32>
    %635 = vector.broadcast %634 : vector<2x1xf32> to vector<2x128xf32>
    %636 = arith.cmpf oeq, %632, %635 : vector<2x128xf32>
    %c128_i32_168 = arith.constant 128 : i32
    %637 = vector.broadcast %c128_i32_168 : i32 to vector<2x128xi32>
    %638 = arith.select %636, %13, %637 : vector<2x128xi1>, vector<2x128xi32>
    %cst_169 = arith.constant dense<2147483647> : vector<2xi32>
    %639 = vector.multi_reduction <minsi>, %638, %cst_169 [1] : vector<2x128xi32> to vector<2xi32>
    %640 = vector.shape_cast %639 : vector<2xi32> to vector<2x1xi32>
    %641 = vector.broadcast %640 : vector<2x1xi32> to vector<2x128xi32>
    %642 = arith.cmpi eq, %13, %641 : vector<2x128xi32>
    %643 = arith.extui %642 : vector<2x128xi1> to vector<2x128xi32>
    %644 = arith.sitofp %643 : vector<2x128xi32> to vector<2x128xf32>
    %cst_170 = arith.constant dense<0.000000e+00> : vector<2x32xf32>
    %645 = tpu.matmul %644, %12, %cst_170 {dimension_numbers = #tpu.dot_dimension_numbers<[1], [0], [0], [1], [0, 0, 1, 1], [], []>} : vector<2x128xf32>, vector<128x32xf32>, vector<2x32xf32> -> vector<2x32xf32>
    %646 = arith.index_cast %c6_i32_157 : i32 to index
    %647 = memref.load %arg0[%646] : memref<8xi32, #tpu.memory_space<smem>>
    %c0_i32_171 = arith.constant 0 : i32
    %648 = arith.cmpi ne, %647, %c0_i32_171 : i32
    %649 = arith.extui %648 : i1 to i32
    %650 = arith.sitofp %649 : i32 to f32
    %651 = arith.index_cast %c6_i32_157 : i32 to index
    %c0_172 = arith.constant 0 : index
    %c0_173 = arith.constant 0 : index
    %652 = vector.load %arg2[%651, %c0_172, %c0_173] : memref<8x2x32xf32, #tpu.memory_space<vmem>>, vector<1x2x32xf32>
    %653 = vector.shape_cast %652 : vector<1x2x32xf32> to vector<2x32xf32>
    %654 = vector.broadcast %650 : f32 to vector<2x32xf32>
    %655 = arith.mulf %654, %653 : vector<2x32xf32>
    %cst_174 = arith.constant 1.000000e+00 : f32
    %656 = arith.subf %cst_174, %650 : f32
    %657 = vector.broadcast %656 : f32 to vector<2x32xf32>
    %658 = arith.mulf %657, %645 : vector<2x32xf32>
    %659 = arith.addf %655, %658 : vector<2x32xf32>
    %c7_i32_175 = arith.constant 7 : i32
    %660 = tpu.concatenate %659, %622 in 1 : vector<2x32xf32>, vector<2x32xf32> -> vector<2x64xf32>
    %cst_176 = arith.constant dense<0.000000e+00> : vector<2x128xf32>
    %661 = tpu.matmul %660, %1, %cst_176 {dimension_numbers = #tpu.dot_dimension_numbers<[1], [0], [0], [1], [0, 0, 1, 1], [], []>} : vector<2x64xf32>, vector<64x128xf32>, vector<2x128xf32> -> vector<2x128xf32>
    %662 = arith.addf %661, %7 : vector<2x128xf32>
    %663 = vector.extract_strided_slice %662 {offsets = [0, 0], sizes = [2, 32], strides = [1, 1]} : vector<2x128xf32> to vector<2x32xf32>
    %664 = arith.negf %663 : vector<2x32xf32>
    %665 = math.exp %664 : vector<2x32xf32>
    %cst_177 = arith.constant 1.000000e+00 : f32
    %666 = vector.broadcast %cst_177 : f32 to vector<2x32xf32>
    %667 = arith.addf %666, %665 : vector<2x32xf32>
    %668 = arith.divf %666, %667 : vector<2x32xf32>
    %669 = vector.extract_strided_slice %662 {offsets = [0, 32], sizes = [2, 32], strides = [1, 1]} : vector<2x128xf32> to vector<2x32xf32>
    %670 = arith.negf %669 : vector<2x32xf32>
    %671 = math.exp %670 : vector<2x32xf32>
    %cst_178 = arith.constant 1.000000e+00 : f32
    %672 = vector.broadcast %cst_178 : f32 to vector<2x32xf32>
    %673 = arith.addf %672, %671 : vector<2x32xf32>
    %674 = arith.divf %672, %673 : vector<2x32xf32>
    %675 = vector.extract_strided_slice %662 {offsets = [0, 64], sizes = [2, 32], strides = [1, 1]} : vector<2x128xf32> to vector<2x32xf32>
    %676 = math.tanh %675 : vector<2x32xf32>
    %677 = vector.extract_strided_slice %662 {offsets = [0, 96], sizes = [2, 32], strides = [1, 1]} : vector<2x128xf32> to vector<2x32xf32>
    %678 = arith.negf %677 : vector<2x32xf32>
    %679 = math.exp %678 : vector<2x32xf32>
    %cst_179 = arith.constant 1.000000e+00 : f32
    %680 = vector.broadcast %cst_179 : f32 to vector<2x32xf32>
    %681 = arith.addf %680, %679 : vector<2x32xf32>
    %682 = arith.divf %680, %681 : vector<2x32xf32>
    %683 = arith.mulf %674, %620 : vector<2x32xf32>
    %684 = arith.mulf %668, %676 : vector<2x32xf32>
    %685 = arith.addf %683, %684 : vector<2x32xf32>
    %686 = math.tanh %685 : vector<2x32xf32>
    %687 = arith.mulf %682, %686 : vector<2x32xf32>
    %cst_180 = arith.constant dense<0.000000e+00> : vector<2x128xf32>
    %688 = tpu.matmul %687, %8, %cst_180 {dimension_numbers = #tpu.dot_dimension_numbers<[1], [0], [0], [1], [0, 0, 1, 1], [], []>} : vector<2x32xf32>, vector<32x128xf32>, vector<2x128xf32> -> vector<2x128xf32>
    %689 = arith.addf %688, %11 : vector<2x128xf32>
    %690 = arith.index_cast %c7_i32_175 : i32 to index
    %c0_181 = arith.constant 0 : index
    %c0_182 = arith.constant 0 : index
    %691 = vector.load %arg10[%690, %c0_181, %c0_182] : memref<8x2x128xf32, #tpu.memory_space<vmem>>, vector<1x2x128xf32>
    %692 = vector.shape_cast %691 : vector<1x2x128xf32> to vector<2x128xf32>
    %693 = vector.shape_cast %689 : vector<2x128xf32> to vector<1x2x128xf32>
    tpu.vector_store %arg10[%690, %c0_181, %c0_182], %693 {strides = array<i32>} : memref<8x2x128xf32, #tpu.memory_space<vmem>>, vector<1x2x128xf32>,
    %c16_i32_183 = arith.constant 16 : i32
    %694 = vector.broadcast %c16_i32_183 : i32 to vector<2x128xi32>
    %695 = arith.cmpi slt, %13, %694 : vector<2x128xi32>
    %cst_184 = arith.constant 0xFF800000 : f32
    %696 = vector.broadcast %cst_184 : f32 to vector<2x128xf32>
    %697 = arith.select %695, %689, %696 : vector<2x128xi1>, vector<2x128xf32>
    %cst_185 = arith.constant dense<0xFF800000> : vector<2xf32>
    %698 = vector.multi_reduction <maximumf>, %697, %cst_185 [1] : vector<2x128xf32> to vector<2xf32>
    %699 = vector.shape_cast %698 : vector<2xf32> to vector<2x1xf32>
    %700 = vector.broadcast %699 : vector<2x1xf32> to vector<2x128xf32>
    %701 = arith.cmpf oeq, %697, %700 : vector<2x128xf32>
    %c128_i32_186 = arith.constant 128 : i32
    %702 = vector.broadcast %c128_i32_186 : i32 to vector<2x128xi32>
    %703 = arith.select %701, %13, %702 : vector<2x128xi1>, vector<2x128xi32>
    %cst_187 = arith.constant dense<2147483647> : vector<2xi32>
    %704 = vector.multi_reduction <minsi>, %703, %cst_187 [1] : vector<2x128xi32> to vector<2xi32>
    %705 = vector.shape_cast %704 : vector<2xi32> to vector<2x1xi32>
    %706 = vector.broadcast %705 : vector<2x1xi32> to vector<2x128xi32>
    %707 = arith.cmpi eq, %13, %706 : vector<2x128xi32>
    %708 = arith.extui %707 : vector<2x128xi1> to vector<2x128xi32>
    %709 = arith.sitofp %708 : vector<2x128xi32> to vector<2x128xf32>
    %cst_188 = arith.constant dense<0.000000e+00> : vector<2x32xf32>
    %710 = tpu.matmul %709, %12, %cst_188 {dimension_numbers = #tpu.dot_dimension_numbers<[1], [0], [0], [1], [0, 0, 1, 1], [], []>} : vector<2x128xf32>, vector<128x32xf32>, vector<2x32xf32> -> vector<2x32xf32>
    %711 = arith.index_cast %c7_i32_175 : i32 to index
    %712 = memref.load %arg0[%711] : memref<8xi32, #tpu.memory_space<smem>>
    %c0_i32_189 = arith.constant 0 : i32
    %713 = arith.cmpi ne, %712, %c0_i32_189 : i32
    %714 = arith.extui %713 : i1 to i32
    %715 = arith.sitofp %714 : i32 to f32
    %716 = arith.index_cast %c7_i32_175 : i32 to index
    %c0_190 = arith.constant 0 : index
    %c0_191 = arith.constant 0 : index
    %717 = vector.load %arg2[%716, %c0_190, %c0_191] : memref<8x2x32xf32, #tpu.memory_space<vmem>>, vector<1x2x32xf32>
    %718 = vector.shape_cast %717 : vector<1x2x32xf32> to vector<2x32xf32>
    %719 = vector.broadcast %715 : f32 to vector<2x32xf32>
    %720 = arith.mulf %719, %718 : vector<2x32xf32>
    %cst_192 = arith.constant 1.000000e+00 : f32
    %721 = arith.subf %cst_192, %715 : f32
    %722 = vector.broadcast %721 : f32 to vector<2x32xf32>
    %723 = arith.mulf %722, %710 : vector<2x32xf32>
    %724 = arith.addf %720, %723 : vector<2x32xf32>
    %c7_i32_193 = arith.constant 7 : i32
    return
  }
}

</mosaic_0001>

<bundles_post_ra>
// kernel: _forward_impl.1
= control target key start
LH: loop header
LB: loop body
LE: loop exit
PB: predicated region body
PF: predicated region fallthrough
CT: control target
= control target key end

     0   :  { %15 = vsyncpa [#allocation3], 0  ;;  %s5131_s0 = inlined_call_operand.vmem [shape: s32[8], index: 0, kind: input, shape index: {}]   ;;  %s5132_s1 = inlined_call_operand.vmem [shape: f32[8,2,32], index: 1, kind: input, shape index: {}]   ;;  %s5133_s2 = inlined_call_operand.vmem [shape: f32[8,2,32], index: 2, kind: input, shape index: {}]   ;;  %s5134_s3 = inlined_call_operand.vmem [shape: f32[64,128], index: 3, kind: input, shape index: {}]   ;;  %s5135_s4 = inlined_call_operand.vmem [shape: f32[1,128], index: 4, kind: input, shape index: {}]   ;;  %s5136_s5 = inlined_call_operand.vmem [shape: f32[64,128], index: 5, kind: input, shape index: {}]   ;;  %s5137_s6 = inlined_call_operand.vmem [shape: f32[1,128], index: 6, kind: input, shape index: {}]   ;;  %s5138_s7 = inlined_call_operand.vmem [shape: f32[32,128], index: 7, kind: input, shape index: {}]   ;;  %s5139_s8 = inlined_call_operand.vmem [shape: f32[1,128], index: 8, kind: input, shape index: {}]   ;;  %s5140_s9 = inlined_call_operand.vmem [shape: f32[128,32], index: 9, kind: input, shape index: {}]   ;;  %s5141_s10 = inlined_call_operand.vmem [shape: f32[8,2,128], index: 10, kind: output, shape index: {}]  }
   0x1   :  { %s22_s15 = sshll.u32 %s5131_s0, 4  ;;  %s23_s15 = int_to_ptr.vmem [resolvable:$true] %s22_s15 }
   0x2   :  { %s3906_s16 = scalar_lea.vmem %s23_s15, 16  ;;  %p3911_p1 = scmp.lt.s32.totalorder %s23_s15, %s23_s15 }
   0x3   :  { %p3907_p0 = scmp.ne.s32.totalorder %s23_s15, %s3906_s16  ;;  %p3912_p2 = scmp.lt.s32.totalorder %s3906_s16, %s3906_s16 }
   0x5   :  { %p3913_p3 = por %p3912_p2, %p3911_p1 }
   0x7   :  { %p3914_p4 = pnand %p3913_p3, %p3907_p0 }
   0x9   :  { %3917 = shalt.err (!%p3914_p4)
}
   0xa   :  { %s3920_s17 = smov [#allocation2]  }
   0xb   :  { %25 = dma.vmem_to_smem %s23_s15, 16, %s3920_s17, [#allocation3]  }
   0xc   :  { %3918 = dma.done.wait [#allocation3], 16  }
   0xd   :  { %3919 = vsyncadd [#allocation3], 4294967280 }
   0xe   :  { %47 = sfence }
   0xf   :  { %v3987_v0 = vld [vmem:[%s5134_s3 + $0x38] sm:$0xff]  ;;  %v3921_v1 = vmov 0.0   ;;  %v3997_v2 = vld [vmem:[%s5134_s3 + $0x30] sm:$0xff]  ;;  %vm3922_vm0 = vmmov 0   ;;  %v4007_v3 = vld [vmem:[%s5134_s3 + $0x28] sm:$0xff]  ;;  %vm108_vm1 = vcmask 261120  }
  0x10   :  { %3178 = vmatprep.subr.mxu0 %v3921_v1  ;;  %936 = vst [vmem:[%s5141_s10] sm:$0x3] %v3921_v1  ;;  %3194 = vmatprep.mubr.msk.f32.mxu0 %vm3922_vm0, %v3921_v1  ;;  %v4016_v4 = vld [vmem:[%s5134_s3 + $0x20] sm:$0xff]  ;;  %v4025_v5 = vld [vmem:[%s5134_s3 + $0x18] sm:$0xff]  ;;  %v4034_v6 = vld [vmem:[%s5134_s3 + $0x10] sm:$0xff]  ;;  %vm110_vm2 = vcmask 523264   ;;  %s3923_s18 = smov 64  }
  0x11   :  { %3179 = vmatpush3.msra.mxu0 %v3987_v0  ;;  %3197 = vmatprep.subr.mxu1 %v3921_v1  ;;  %v4043_v7 = vld [vmem:[%s5134_s3 + $0x8] sm:$0xff]  ;;  %v107_v8 = vld [vmem:[%s5132_s1] sm:$0x3]  ;;  %s3924_s19 = smov 32   ;;  %v2833_v28 = vld [vmem:[%s5132_s1 + $0x2] sm:$0x3] }
  0x12   :  { %3180 = vmatprep.subr.mxu0 %v3921_v1  ;;  %3198 = vmatpush3.msra.mxu1 %v3987_v0  ;;  %v4055_v9 = vld [vmem:[%s5134_s3] sm:$0xff]  ;;  %v109_v10 = vsel %vm108_vm1, %v107_v8, 0.0  ;;  %vm1119_vm4 = vcmask 1041408   ;;  %s2860_s30 = sld [smem:[#allocation2 + $0x1]] }
  0x13   :  { %3181 = vmatpush3.msra.mxu0 %v3997_v2  ;;  %3199 = vmatprep.subr.mxu1 %v3921_v1  ;;  %v4092_v11 = vld [vmem:[%s5135_s4] ss:$0 sm:$0xff]  ;;  %v2836_v47 = vld [vmem:[%s5132_s1 + $0x4] sm:$0x3]  ;;  %s2868_s3 = sld [smem:[#allocation2 + $0x2]] }
  0x14   :  { %3182 = vmatprep.subr.mxu0 %v3921_v1  ;;  %3200 = vmatpush3.msra.mxu1 %v3997_v2  ;;  %s2876_s24 = sld [smem:[#allocation2 + $0x3]] }
  0x15   :  { %3183 = vmatpush3.msra.mxu0 %v4007_v3  ;;  %3201 = vmatprep.subr.mxu1 %v3921_v1 }
  0x16   :  { %3184 = vmatprep.subr.mxu0 %v3921_v1  ;;  %3202 = vmatpush3.msra.mxu1 %v4007_v3 }
  0x17   :  { %3185 = vmatpush3.msra.mxu0 %v4016_v4  ;;  %3203 = vmatprep.subr.mxu1 %v3921_v1 }
  0x18   :  { %3186 = vmatprep.subr.mxu0 %v3921_v1  ;;  %3204 = vmatpush3.msra.mxu1 %v4016_v4  ;;  %p1214_p5 = scmp.ne.s32.totalorder %s2860_s30, 0 }
  0x19   :  { %3187 = vmatpush3.msra.mxu0 %v4025_v5  ;;  %3205 = vmatprep.subr.mxu1 %v3921_v1  ;;  %p1498_p6 = scmp.ne.s32.totalorder %s2868_s3, 0 }
  0x1a   :  { %3188 = vmatprep.subr.mxu0 %v3921_v1  ;;  %3206 = vmatpush3.msra.mxu1 %v4025_v5  ;;  %s1215_s11 = scalar_select %p1214_p5, 1, 0 }
  0x1b   :  { %3189 = vmatpush3.msra.mxu0 %v4034_v6  ;;  %3207 = vmatprep.subr.mxu1 %v3921_v1  ;;  %s1499_s17 = scalar_select %p1498_p6, 1, 0 }
  0x1c   :  { %3190 = vmatprep.subr.mxu0 %v3921_v1  ;;  %3208 = vmatpush3.msra.mxu1 %v4034_v6  ;;  %p1782_p7 = scmp.ne.s32.totalorder %s2876_s24, 0 }
  0x1d   :  { %3191 = vmatpush3.msra.mxu0 %v4043_v7  ;;  %3209 = vmatprep.subr.mxu1 %v3921_v1  ;;  %s1500_s4 = scvt.s32.f32 %s1499_s17 }
  0x1e   :  { %3192 = vmatprep.subr.mxu0 %v3921_v1  ;;  %3210 = vmatpush3.msra.mxu1 %v4043_v7  ;;  %s1783_s25 = scalar_select %p1782_p7, 1, 0 }
  0x1f   :  { %3193 = vmatpush3.msra.mxu0 %v4055_v9  ;;  %3211 = vmatprep.subr.mxu1 %v3921_v1  ;;  %s1505_s0 = ssub.f32 1.0, %s1500_s4 }
  0x20   :  { %3195 = vmatmul.mubr.msk.f32.vlgmr.msra.gmra.mxu0 %vm110_vm2, %v109_v10  ;;  %3212 = vmatpush3.msra.mxu1 %v4055_v9  ;;  %s1784_s26 = scvt.s32.f32 %s1783_s25 }
  0x21   :  { %3213 = vmatprep.mubr.msk.f32.mxu1 %vm3922_vm0, %v3921_v1  ;;  %3216 = vmatprep.subr.mxu0 %v3921_v1 }
  0x22   :  { %3217 = vmatpush3.msra.mxu0 %v3987_v0  ;;  %3232 = vmatprep.mubr.msk.f32.mxu0 %vm3922_vm0, %v3921_v1  ;;  %s1789_s27 = ssub.f32 1.0, %s1784_s26 }
  0x23   :  { %3218 = vmatprep.subr.mxu0 %v3921_v1  ;;  %3235 = vmatprep.subr.mxu1 %v3921_v1 }
  0x24   :  { %3219 = vmatpush3.msra.mxu0 %v3997_v2 }
  0x25   :  { %3220 = vmatprep.subr.mxu0 %v3921_v1 }
  0x26   :  { %3221 = vmatpush3.msra.mxu0 %v4007_v3 }
  0x27   :  { %3222 = vmatprep.subr.mxu0 %v3921_v1 }
  0x28   :  { %3223 = vmatpush3.msra.mxu0 %v4016_v4 }
  0x29   :  { %3224 = vmatprep.subr.mxu0 %v3921_v1 }
  0x2a   :  { %3225 = vmatpush3.msra.mxu0 %v4025_v5 }
  0x2b   :  { %3226 = vmatprep.subr.mxu0 %v3921_v1 }
  0x2c   :  { %3227 = vmatpush3.msra.mxu0 %v4034_v6 }
  0x2d   :  { %3228 = vmatprep.subr.mxu0 %v3921_v1 }
  0x2e   :  { %3229 = vmatpush3.msra.mxu0 %v4043_v7 }
  0x2f   :  { %3230 = vmatprep.subr.mxu0 %v3921_v1 }
  0x30   :  { %3231 = vmatpush3.msra.mxu0 %v4055_v9 }
  0x31   :  { %3254 = vmatprep.subr.mxu0 %v3921_v1 }
  0xe0   :  { %v180_v12 = vpop.f32.mrf.mxu0 }
  0xe1   :  { %v181_v13 = vadd.f32 %v4092_v11, %v180_v12  ;;  %v2839_v12 = vld [vmem:[%s5132_s1 + $0x6] sm:$0x3] }
  0xe2   :  { %v3196_v14 = vpop.f32.mrf.mxu0 }
  0xe3   :  { %3756 = vtanh.f32 %v181_v13  ;;  %v2832_v16 = vmul.f32 -1.442695, %v181_v13 }
  0xe5   :  { %3758 = vpow2.f32 %v2832_v16 }
  0xf0   :  { %v3757_v15 = vpop.eup %3756 }
  0xf1   :  { %193 = vrot.lane.b32.xlu0 %v3757_v15, %s3923_s18 }
  0xf2   :  { %v3759_v17 = vpop.eup %3758 }
  0xf3   :  { %v187_v18 = vadd.f32 1.0, %v3759_v17 }
  0xf5   :  { %3760 = vrcp.f32 %v187_v18 }
 0x102   :  { %v3761_v19 = vpop.eup %3760 }
 0x103   :  { %v191_v22 = vmul.f32 0.0, %v3761_v19 }
 0x163   :  { %v194_v20 = vpop.permute.xlu0 %193 }
 0x164   :  { %v196_v21 = vmul.f32 %v3761_v19, %v194_v20 }
 0x166   :  { %198 = vrot.lane.b32.xlu0 %v196_v21, %s3924_s19 }
 0x1d8   :  { %v199_v23 = vpop.permute.xlu0 %198 }
 0x1d9   :  { %v201_v24 = vadd.f32 %v199_v23, %v191_v22 }
 0x1db   :  { %3762 = vtanh.f32 %v201_v24 }
 0x1e8   :  { %v3763_v25 = vpop.eup %3762 }
 0x1e9   :  { %204 = vrot.lane.b32.xlu1 %v3763_v25, %s3923_s18 }
 0x25b   :  { %v205_v26 = vpop.permute.xlu1 %204 }
 0x25c   :  { %v207_v27 = vmul.f32 %v3761_v19, %v205_v26 }
 0x25e   :  { %211 = vrot.lane.b32.xlu1 %v207_v27, %s3923_s18 }
 0x2d0   :  { %v212_v29 = vpop.permute.xlu1 %211 }
 0x2d1   :  { %v214_v30 = vsel %vm108_vm1, %v2833_v28, %v212_v29 }
 0x2d2   :  { %3214 = vmatmul.mubr.msk.f32.vlgmr.msra.gmra.mxu1 %vm110_vm2, %v214_v30 }
 0x2d3   :  { %3236 = vmatpush3.msra.mxu1 %v3987_v0  ;;  %3251 = vmatprep.mubr.msk.f32.mxu1 %vm3922_vm0, %v3921_v1 }
 0x2d4   :  { %3237 = vmatprep.subr.mxu1 %v3921_v1 }
 0x2d5   :  { %3238 = vmatpush3.msra.mxu1 %v3997_v2 }
 0x2d6   :  { %3239 = vmatprep.subr.mxu1 %v3921_v1 }
 0x2d7   :  { %3240 = vmatpush3.msra.mxu1 %v4007_v3 }
 0x2d8   :  { %3241 = vmatprep.subr.mxu1 %v3921_v1 }
 0x2d9   :  { %3242 = vmatpush3.msra.mxu1 %v4016_v4 }
 0x2da   :  { %3243 = vmatprep.subr.mxu1 %v3921_v1 }
 0x2db   :  { %3244 = vmatpush3.msra.mxu1 %v4025_v5 }
 0x2dc   :  { %3245 = vmatprep.subr.mxu1 %v3921_v1 }
 0x2dd   :  { %3246 = vmatpush3.msra.mxu1 %v4034_v6 }
 0x2de   :  { %3247 = vmatprep.subr.mxu1 %v3921_v1 }
 0x2df   :  { %3248 = vmatpush3.msra.mxu1 %v4043_v7 }
 0x2e0   :  { %3249 = vmatprep.subr.mxu1 %v3921_v1 }
 0x2e1   :  { %3250 = vmatpush3.msra.mxu1 %v4055_v9 }
 0x2e2   :  { %3273 = vmatprep.subr.mxu1 %v3921_v1 }
 0x392   :  { %v284_v31 = vpop.f32.mrf.mxu1 }
 0x393   :  { %v285_v32 = vadd.f32 %v4092_v11, %v284_v31  ;;  %v2842_v31 = vld [vmem:[%s5132_s1 + $0x8] sm:$0x3] }
 0x394   :  { %v3215_v33 = vpop.f32.mrf.mxu1 }
 0x395   :  { %3764 = vtanh.f32 %v285_v32  ;;  %v2835_v35 = vmul.f32 -1.442695, %v285_v32 }
 0x397   :  { %3766 = vpow2.f32 %v2835_v35 }
 0x3a2   :  { %v3765_v34 = vpop.eup %3764 }
 0x3a3   :  { %297 = vrot.lane.b32.xlu0 %v3765_v34, %s3923_s18 }
 0x3a4   :  { %v3767_v36 = vpop.eup %3766 }
 0x3a5   :  { %v291_v37 = vadd.f32 1.0, %v3767_v36 }
 0x3a7   :  { %3768 = vrcp.f32 %v291_v37 }
 0x3b4   :  { %v3769_v38 = vpop.eup %3768 }
 0x3b5   :  { %v295_v41 = vmul.f32 %v3769_v38, %v201_v24 }
 0x415   :  { %v298_v39 = vpop.permute.xlu0 %297 }
 0x416   :  { %v300_v40 = vmul.f32 %v3769_v38, %v298_v39 }
 0x418   :  { %302 = vrot.lane.b32.xlu1 %v300_v40, %s3924_s19 }
 0x48a   :  { %v303_v42 = vpop.permute.xlu1 %302 }
 0x48b   :  { %v305_v43 = vadd.f32 %v303_v42, %v295_v41 }
 0x48d   :  { %3770 = vtanh.f32 %v305_v43 }
 0x49a   :  { %v3771_v44 = vpop.eup %3770 }
 0x49b   :  { %308 = vrot.lane.b32.xlu0 %v3771_v44, %s3923_s18 }
 0x50d   :  { %v309_v45 = vpop.permute.xlu0 %308 }
 0x50e   :  { %v311_v46 = vmul.f32 %v3769_v38, %v309_v45 }
 0x510   :  { %315 = vrot.lane.b32.xlu1 %v311_v46, %s3923_s18 }
 0x582   :  { %v316_v48 = vpop.permute.xlu1 %315 }
 0x583   :  { %v318_v49 = vsel %vm108_vm1, %v2836_v47, %v316_v48 }
 0x584   :  { %3233 = vmatmul.mubr.msk.f32.vlgmr.msra.gmra.mxu0 %vm110_vm2, %v318_v49 }
 0x585   :  { %3255 = vmatpush3.msra.mxu0 %v3987_v0  ;;  %3270 = vmatprep.mubr.msk.f32.mxu0 %vm3922_vm0, %v3921_v1 }
 0x586   :  { %3256 = vmatprep.subr.mxu0 %v3921_v1 }
 0x587   :  { %3257 = vmatpush3.msra.mxu0 %v3997_v2 }
 0x588   :  { %3258 = vmatprep.subr.mxu0 %v3921_v1 }
 0x589   :  { %3259 = vmatpush3.msra.mxu0 %v4007_v3 }
 0x58a   :  { %3260 = vmatprep.subr.mxu0 %v3921_v1 }
 0x58b   :  { %3261 = vmatpush3.msra.mxu0 %v4016_v4 }
 0x58c   :  { %3262 = vmatprep.subr.mxu0 %v3921_v1 }
 0x58d   :  { %3263 = vmatpush3.msra.mxu0 %v4025_v5 }
 0x58e   :  { %3264 = vmatprep.subr.mxu0 %v3921_v1 }
 0x58f   :  { %3265 = vmatpush3.msra.mxu0 %v4034_v6 }
 0x590   :  { %3266 = vmatprep.subr.mxu0 %v3921_v1 }
 0x591   :  { %3267 = vmatpush3.msra.mxu0 %v4043_v7 }
 0x592   :  { %3268 = vmatprep.subr.mxu0 %v3921_v1 }
 0x593   :  { %3269 = vmatpush3.msra.mxu0 %v4055_v9 }
 0x594   :  { %3292 = vmatprep.subr.mxu0 %v3921_v1 }
 0x644   :  { %v388_v50 = vpop.f32.mrf.mxu0 }
 0x645   :  { %v389_v51 = vadd.f32 %v4092_v11, %v388_v50  ;;  %v2845_v50 = vld [vmem:[%s5132_s1 + $0xa] sm:$0x3] }
 0x646   :  { %v3234_v52 = vpop.f32.mrf.mxu0 }
 0x647   :  { %3772 = vtanh.f32 %v389_v51  ;;  %v2838_v54 = vmul.f32 -1.442695, %v389_v51 }
 0x649   :  { %3774 = vpow2.f32 %v2838_v54 }
 0x654   :  { %v3773_v53 = vpop.eup %3772 }
 0x655   :  { %401 = vrot.lane.b32.xlu0 %v3773_v53, %s3923_s18 }
 0x656   :  { %v3775_v55 = vpop.eup %3774 }
 0x657   :  { %v395_v56 = vadd.f32 1.0, %v3775_v55 }
 0x659   :  { %3776 = vrcp.f32 %v395_v56 }
 0x666   :  { %v3777_v57 = vpop.eup %3776 }
 0x667   :  { %v399_v60 = vmul.f32 %v3777_v57, %v305_v43 }
 0x6c7   :  { %v402_v58 = vpop.permute.xlu0 %401 }
 0x6c8   :  { %v404_v59 = vmul.f32 %v3777_v57, %v402_v58 }
 0x6ca   :  { %406 = vrot.lane.b32.xlu1 %v404_v59, %s3924_s19 }
 0x73c   :  { %v407_v61 = vpop.permute.xlu1 %406 }
 0x73d   :  { %v409_v62 = vadd.f32 %v407_v61, %v399_v60  ;;  %v2848_v61 = vld [vmem:[%s5132_s1 + $0xc] sm:$0x3] }
 0x73f   :  { %3778 = vtanh.f32 %v409_v62 }
 0x74c   :  { %v3779_v63 = vpop.eup %3778 }
 0x74d   :  { %412 = vrot.lane.b32.xlu0 %v3779_v63, %s3923_s18 }
 0x7bf   :  { %v413_v8 = vpop.permute.xlu0 %412 }
 0x7c0   :  { %v415_v10 = vmul.f32 %v3777_v57, %v413_v8 }
 0x7c2   :  { %419 = vrot.lane.b32.xlu1 %v415_v10, %s3923_s18 }
 0x834   :  { %v420_v13 = vpop.permute.xlu1 %419 }
 0x835   :  { %v422_v14 = vsel %vm108_vm1, %v2839_v12, %v420_v13 }
 0x836   :  { %3252 = vmatmul.mubr.msk.f32.vlgmr.msra.gmra.mxu1 %vm110_vm2, %v422_v14 }
 0x837   :  { %3274 = vmatpush3.msra.mxu1 %v3987_v0  ;;  %3289 = vmatprep.mubr.msk.f32.mxu1 %vm3922_vm0, %v3921_v1 }
 0x838   :  { %3275 = vmatprep.subr.mxu1 %v3921_v1 }
 0x839   :  { %3276 = vmatpush3.msra.mxu1 %v3997_v2 }
 0x83a   :  { %3277 = vmatprep.subr.mxu1 %v3921_v1 }
 0x83b   :  { %3278 = vmatpush3.msra.mxu1 %v4007_v3 }
 0x83c   :  { %3279 = vmatprep.subr.mxu1 %v3921_v1 }
 0x83d   :  { %3280 = vmatpush3.msra.mxu1 %v4016_v4 }
 0x83e   :  { %3281 = vmatprep.subr.mxu1 %v3921_v1 }
 0x83f   :  { %3282 = vmatpush3.msra.mxu1 %v4025_v5 }
 0x840   :  { %3283 = vmatprep.subr.mxu1 %v3921_v1 }
 0x841   :  { %3284 = vmatpush3.msra.mxu1 %v4034_v6 }
 0x842   :  { %3285 = vmatprep.subr.mxu1 %v3921_v1 }
 0x843   :  { %3286 = vmatpush3.msra.mxu1 %v4043_v7 }
 0x844   :  { %3287 = vmatprep.subr.mxu1 %v3921_v1 }
 0x845   :  { %3288 = vmatpush3.msra.mxu1 %v4055_v9 }
 0x846   :  { %3311 = vmatprep.subr.mxu1 %v3921_v1 }
 0x8f6   :  { %v492_v15 = vpop.f32.mrf.mxu1 }
 0x8f7   :  { %v493_v16 = vadd.f32 %v4092_v11, %v492_v15 }
 0x8f8   :  { %v3253_v17 = vpop.f32.mrf.mxu1 }
 0x8f9   :  { %3780 = vtanh.f32 %v493_v16  ;;  %v2841_v19 = vmul.f32 -1.442695, %v493_v16 }
 0x8fb   :  { %3782 = vpow2.f32 %v2841_v19 }
 0x906   :  { %v3781_v18 = vpop.eup %3780 }
 0x907   :  { %505 = vrot.lane.b32.xlu0 %v3781_v18, %s3923_s18 }
 0x908   :  { %v3783_v20 = vpop.eup %3782 }
 0x909   :  { %v499_v21 = vadd.f32 1.0, %v3783_v20 }
 0x90b   :  { %3784 = vrcp.f32 %v499_v21 }
 0x918   :  { %v3785_v22 = vpop.eup %3784 }
 0x919   :  { %v503_v25 = vmul.f32 %v3785_v22, %v409_v62 }
 0x979   :  { %v506_v23 = vpop.permute.xlu0 %505 }
 0x97a   :  { %v508_v24 = vmul.f32 %v3785_v22, %v506_v23 }
 0x97c   :  { %510 = vrot.lane.b32.xlu1 %v508_v24, %s3924_s19 }
 0x9ee   :  { %v511_v26 = vpop.permute.xlu1 %510 }
 0x9ef   :  { %v513_v27 = vadd.f32 %v511_v26, %v503_v25  ;;  %v2851_v26 = vld [vmem:[%s5132_s1 + $0xe] sm:$0x3]  ;;  %s1216_s1 = scvt.s32.f32 %s1215_s11 }
 0x9f1   :  { %3786 = vtanh.f32 %v513_v27  ;;  %s1221_s12 = ssub.f32 1.0, %s1216_s1 }
 0x9fe   :  { %v3787_v28 = vpop.eup %3786 }
 0x9ff   :  { %516 = vrot.lane.b32.xlu0 %v3787_v28, %s3923_s18 }
 0xa71   :  { %v517_v29 = vpop.permute.xlu0 %516 }
 0xa72   :  { %v519_v30 = vmul.f32 %v3785_v22, %v517_v29 }
 0xa74   :  { %523 = vrot.lane.b32.xlu1 %v519_v30, %s3923_s18 }
 0xae6   :  { %v524_v32 = vpop.permute.xlu1 %523 }
 0xae7   :  { %v526_v33 = vsel %vm108_vm1, %v2842_v31, %v524_v32 }
 0xae8   :  { %3271 = vmatmul.mubr.msk.f32.vlgmr.msra.gmra.mxu0 %vm110_vm2, %v526_v33 }
 0xae9   :  { %3293 = vmatpush3.msra.mxu0 %v3987_v0  ;;  %3308 = vmatprep.mubr.msk.f32.mxu0 %vm3922_vm0, %v3921_v1 }
 0xaea   :  { %3294 = vmatprep.subr.mxu0 %v3921_v1 }
 0xaeb   :  { %3295 = vmatpush3.msra.mxu0 %v3997_v2 }
 0xaec   :  { %3296 = vmatprep.subr.mxu0 %v3921_v1 }
 0xaed   :  { %3297 = vmatpush3.msra.mxu0 %v4007_v3 }
 0xaee   :  { %3298 = vmatprep.subr.mxu0 %v3921_v1 }
 0xaef   :  { %3299 = vmatpush3.msra.mxu0 %v4016_v4 }
 0xaf0   :  { %3300 = vmatprep.subr.mxu0 %v3921_v1 }
 0xaf1   :  { %3301 = vmatpush3.msra.mxu0 %v4025_v5 }
 0xaf2   :  { %3302 = vmatprep.subr.mxu0 %v3921_v1 }
 0xaf3   :  { %3303 = vmatpush3.msra.mxu0 %v4034_v6 }
 0xaf4   :  { %3304 = vmatprep.subr.mxu0 %v3921_v1 }
 0xaf5   :  { %3305 = vmatpush3.msra.mxu0 %v4043_v7 }
 0xaf6   :  { %3306 = vmatprep.subr.mxu0 %v3921_v1 }
 0xaf7   :  { %3307 = vmatpush3.msra.mxu0 %v4055_v9 }
 0xaf8   :  { %3330 = vmatprep.subr.mxu0 %v3921_v1 }
 0xba8   :  { %v596_v34 = vpop.f32.mrf.mxu0 }
 0xba9   :  { %v597_v35 = vadd.f32 %v4092_v11, %v596_v34 }
 0xbaa   :  { %v3272_v36 = vpop.f32.mrf.mxu0 }
 0xbab   :  { %3788 = vtanh.f32 %v597_v35  ;;  %v2844_v38 = vmul.f32 -1.442695, %v597_v35 }
 0xbad   :  { %3790 = vpow2.f32 %v2844_v38 }
 0xbb8   :  { %v3789_v37 = vpop.eup %3788 }
 0xbb9   :  { %609 = vrot.lane.b32.xlu0 %v3789_v37, %s3923_s18 }
 0xbba   :  { %v3791_v39 = vpop.eup %3790 }
 0xbbb   :  { %v603_v40 = vadd.f32 1.0, %v3791_v39 }
 0xbbd   :  { %3792 = vrcp.f32 %v603_v40 }
 0xbca   :  { %v3793_v41 = vpop.eup %3792 }
 0xbcb   :  { %v607_v44 = vmul.f32 %v3793_v41, %v513_v27 }
 0xc2b   :  { %v610_v42 = vpop.permute.xlu0 %609 }
 0xc2c   :  { %v612_v43 = vmul.f32 %v3793_v41, %v610_v42  ;;  %v4272_v42 = vld [vmem:[%s5136_s5 + $0x30] sm:$0xff] }
 0xc2e   :  { %614 = vrot.lane.b32.xlu1 %v612_v43, %s3924_s19  ;;  %v4279_v43 = vld [vmem:[%s5136_s5 + $0x28] sm:$0xff] }
 0xca0   :  { %v615_v45 = vpop.permute.xlu1 %614 }
 0xca1   :  { %v617_v46 = vadd.f32 %v615_v45, %v607_v44  ;;  %v4286_v44 = vld [vmem:[%s5136_s5 + $0x20] sm:$0xff]  ;;  %v4293_v45 = vld [vmem:[%s5136_s5 + $0x18] sm:$0xff] }
 0xca3   :  { %3794 = vtanh.f32 %v617_v46 }
 0xcb0   :  { %v3795_v47 = vpop.eup %3794 }
 0xcb1   :  { %620 = vrot.lane.b32.xlu0 %v3795_v47, %s3923_s18 }
 0xd23   :  { %v621_v48 = vpop.permute.xlu0 %620 }
 0xd24   :  { %v623_v49 = vmul.f32 %v3793_v41, %v621_v48  ;;  %v4307_v48 = vld [vmem:[%s5136_s5 + $0x8] sm:$0xff] }
 0xd26   :  { %627 = vrot.lane.b32.xlu1 %v623_v49, %s3923_s18  ;;  %v4317_v49 = vld [vmem:[%s5136_s5] sm:$0xff] }
 0xd98   :  { %v628_v51 = vpop.permute.xlu1 %627 }
 0xd99   :  { %v630_v52 = vsel %vm108_vm1, %v2845_v50, %v628_v51 }
 0xd9a   :  { %3290 = vmatmul.mubr.msk.f32.vlgmr.msra.gmra.mxu1 %vm110_vm2, %v630_v52  ;;  %v937_v52 = vld [vmem:[%s5133_s2] sm:$0x3] }
 0xd9b   :  { %3312 = vmatpush3.msra.mxu1 %v3987_v0  ;;  %3327 = vmatprep.mubr.msk.f32.mxu1 %vm3922_vm0, %v3921_v1 }
 0xd9c   :  { %3313 = vmatprep.subr.mxu1 %v3921_v1 }
 0xd9d   :  { %3314 = vmatpush3.msra.mxu1 %v3997_v2 }
 0xd9e   :  { %3315 = vmatprep.subr.mxu1 %v3921_v1 }
 0xd9f   :  { %3316 = vmatpush3.msra.mxu1 %v4007_v3 }
 0xda0   :  { %3317 = vmatprep.subr.mxu1 %v3921_v1 }
 0xda1   :  { %3318 = vmatpush3.msra.mxu1 %v4016_v4 }
 0xda2   :  { %3319 = vmatprep.subr.mxu1 %v3921_v1 }
 0xda3   :  { %3320 = vmatpush3.msra.mxu1 %v4025_v5 }
 0xda4   :  { %3321 = vmatprep.subr.mxu1 %v3921_v1 }
 0xda5   :  { %3322 = vmatpush3.msra.mxu1 %v4034_v6 }
 0xda6   :  { %3323 = vmatprep.subr.mxu1 %v3921_v1 }
 0xda7   :  { %3324 = vmatpush3.msra.mxu1 %v4043_v7 }
 0xda8   :  { %3325 = vmatprep.subr.mxu1 %v3921_v1 }
 0xda9   :  { %3326 = vmatpush3.msra.mxu1 %v4055_v9 }
 0xdaa   :  { %3349 = vmatprep.subr.mxu1 %v3921_v1 }
 0xe5a   :  { %v700_v0 = vpop.f32.mrf.mxu1 }
 0xe5b   :  { %v701_v2 = vadd.f32 %v4092_v11, %v700_v0 }
 0xe5c   :  { %v3291_v3 = vpop.f32.mrf.mxu1 }
 0xe5d   :  { %3796 = vtanh.f32 %v701_v2  ;;  %v2847_v5 = vmul.f32 -1.442695, %v701_v2  ;;  %v4348_v3 = vld [vmem:[%s5137_s6] ss:$0 sm:$0xff] }
 0xe5f   :  { %3798 = vpow2.f32 %v2847_v5 }
 0xe6a   :  { %v3797_v4 = vpop.eup %3796 }
 0xe6b   :  { %713 = vrot.lane.b32.xlu0 %v3797_v4, %s3923_s18 }
 0xe6c   :  { %v3799_v6 = vpop.eup %3798 }
 0xe6d   :  { %v707_v53 = vadd.f32 1.0, %v3799_v6 }
 0xe6f   :  { %3800 = vrcp.f32 %v707_v53 }
 0xe7c   :  { %v3801_v7 = vpop.eup %3800 }
 0xe7d   :  { %v711_v9 = vmul.f32 %v3801_v7, %v617_v46  ;;  %v4300_v46 = vld [vmem:[%s5136_s5 + $0x10] sm:$0xff] }
 0xedd   :  { %v714_v54 = vpop.permute.xlu0 %713 }
 0xede   :  { %v716_v55 = vmul.f32 %v3801_v7, %v714_v54 }
 0xee0   :  { %718 = vrot.lane.b32.xlu1 %v716_v55, %s3924_s19 }
 0xf52   :  { %v719_v56 = vpop.permute.xlu1 %718 }
 0xf53   :  { %v721_v57 = vadd.f32 %v719_v56, %v711_v9 }
 0xf55   :  { %3802 = vtanh.f32 %v721_v57 }
 0xf62   :  { %v3803_v58 = vpop.eup %3802 }
 0xf63   :  { %724 = vrot.lane.b32.xlu0 %v3803_v58, %s3923_s18 }
 0xfd5   :  { %v725_v59 = vpop.permute.xlu0 %724 }
 0xfd6   :  { %v727_v60 = vmul.f32 %v3801_v7, %v725_v59 }
 0xfd8   :  { %731 = vrot.lane.b32.xlu1 %v727_v60, %s3923_s18 }
0x104a   :  { %v732_v62 = vpop.permute.xlu1 %731 }
0x104b   :  { %v734_v63 = vsel %vm108_vm1, %v2848_v61, %v732_v62  ;;  %v4360_v61 = vld [vmem:[%s5138_s7 + $0x18] sm:$0xff]  ;;  %v4365_v62 = vld [vmem:[%s5138_s7 + $0x10] sm:$0xff] }
0x104c   :  { %3309 = vmatmul.mubr.msk.f32.vlgmr.msra.gmra.mxu0 %vm110_vm2, %v734_v63  ;;  %v4372_v63 = vld [vmem:[%s5138_s7 + $0x8] sm:$0xff] }
0x104d   :  { %3346 = vmatprep.mubr.msk.f32.mxu0 %vm3922_vm0, %v3921_v1 }
0x110c   :  { %v804_v8 = vpop.f32.mrf.mxu0 }
0x110d   :  { %v805_v10 = vadd.f32 %v4092_v11, %v804_v8  ;;  %v4379_v8 = vld [vmem:[%s5138_s7] sm:$0xff] }
0x110e   :  { %v3310_v12 = vpop.f32.mrf.mxu0 }
0x110f   :  { %3804 = vtanh.f32 %v805_v10  ;;  %v2850_v14 = vmul.f32 -1.442695, %v805_v10 }
0x1111   :  { %3806 = vpow2.f32 %v2850_v14 }
0x111c   :  { %v3805_v13 = vpop.eup %3804 }
0x111d   :  { %817 = vrot.lane.b32.xlu0 %v3805_v13, %s3923_s18 }
0x111e   :  { %v3807_v15 = vpop.eup %3806 }
0x111f   :  { %v811_v16 = vadd.f32 1.0, %v3807_v15  ;;  %v105_v15 = vlaneseq }
0x1121   :  { %3808 = vrcp.f32 %v811_v16  ;;  %v4393_v16 = vand.u32 127, %v105_v15 }
0x1123   :  { %vm1117_vm3 = vcmp.lt.s32.totalorder %v4393_v16, 16 }
0x112e   :  { %v3809_v17 = vpop.eup %3808 }
0x112f   :  { %v815_v20 = vmul.f32 %v3809_v17, %v721_v57 }
0x118f   :  { %v818_v18 = vpop.permute.xlu0 %817 }
0x1190   :  { %v820_v19 = vmul.f32 %v3809_v17, %v818_v18 }
0x1192   :  { %822 = vrot.lane.b32.xlu1 %v820_v19, %s3924_s19 }
0x1204   :  { %v823_v21 = vpop.permute.xlu1 %822 }
0x1205   :  { %v825_v22 = vadd.f32 %v823_v21, %v815_v20 }
0x1207   :  { %3810 = vtanh.f32 %v825_v22 }
0x1214   :  { %v3811_v23 = vpop.eup %3810 }
0x1215   :  { %828 = vrot.lane.b32.xlu0 %v3811_v23, %s3923_s18 }
0x1287   :  { %v829_v24 = vpop.permute.xlu0 %828 }
0x1288   :  { %v831_v25 = vmul.f32 %v3809_v17, %v829_v24  ;;  %v4398_v17 = vld [vmem:[%s5139_s8] ss:$0 sm:$0xff] }
0x128a   :  { %835 = vrot.lane.b32.xlu1 %v831_v25, %s3923_s18 }
0x12fc   :  { %v836_v27 = vpop.permute.xlu1 %835 }
0x12fd   :  { %v838_v28 = vsel %vm108_vm1, %v2851_v26, %v836_v27 }
0x12fe   :  { %3328 = vmatmul.mubr.msk.f32.vlgmr.msra.gmra.mxu1 %vm110_vm2, %v838_v28  ;;  %v4413_v28 = vld [vmem:[%s5140_s9 + $0x78] sm:$0xff] }
0x12ff   :  { %3357 = vmatprep.mubr.msk.f32.mxu1 %vm3922_vm0, %v3921_v1  ;;  %3350 = vmatpush3.msra.mxu1 %v4360_v61 }
0x1300   :  { %3351 = vmatprep.subr.mxu1 %v3921_v1 }
0x1301   :  { %3352 = vmatpush3.msra.mxu1 %v4365_v62 }
0x1302   :  { %3353 = vmatprep.subr.mxu1 %v3921_v1 }
0x1303   :  { %3354 = vmatpush3.msra.mxu1 %v4372_v63 }
0x1304   :  { %3355 = vmatprep.subr.mxu1 %v3921_v1 }
0x1305   :  { %3356 = vmatpush3.msra.mxu1 %v4379_v8 }
0x1306   :  { %3360 = vmatprep.subr.mxu1 %v3921_v1 }
0x13be   :  { %v908_v29 = vpop.f32.mrf.mxu1 }
0x13bf   :  { %v909_v30 = vadd.f32 %v4092_v11, %v908_v29  ;;  %v4267_v11 = vld [vmem:[%s5136_s5 + $0x38] sm:$0xff]  ;;  %v4418_v29 = vld [vmem:[%s5140_s9 + $0x70] sm:$0xff] }
0x13c0   :  { %v3329_v31 = vpop.f32.mrf.mxu1  ;;  %3331 = vmatpush3.msra.mxu0 %v4267_v11 }
0x13c1   :  { %3812 = vtanh.f32 %v909_v30  ;;  %v2853_v33 = vmul.f32 -1.442695, %v909_v30  ;;  %3332 = vmatprep.subr.mxu0 %v3921_v1  ;;  %v4425_v30 = vld [vmem:[%s5140_s9 + $0x68] sm:$0xff]  ;;  %v4432_v31 = vld [vmem:[%s5140_s9 + $0x60] sm:$0xff] }
0x13c2   :  { %3333 = vmatpush3.msra.mxu0 %v4272_v42 }
0x13c3   :  { %3814 = vpow2.f32 %v2853_v33  ;;  %3334 = vmatprep.subr.mxu0 %v3921_v1  ;;  %v4446_v33 = vld [vmem:[%s5140_s9 + $0x50] sm:$0xff] }
0x13c4   :  { %3335 = vmatpush3.msra.mxu0 %v4279_v43 }
0x13c5   :  { %3336 = vmatprep.subr.mxu0 %v3921_v1 }
0x13c6   :  { %3337 = vmatpush3.msra.mxu0 %v4286_v44 }
0x13c7   :  { %3338 = vmatprep.subr.mxu0 %v3921_v1 }
0x13c8   :  { %3339 = vmatpush3.msra.mxu0 %v4293_v45 }
0x13c9   :  { %3340 = vmatprep.subr.mxu0 %v3921_v1 }
0x13ca   :  { %3341 = vmatpush3.msra.mxu0 %v4300_v46 }
0x13cb   :  { %3342 = vmatprep.subr.mxu0 %v3921_v1 }
0x13cc   :  { %3343 = vmatpush3.msra.mxu0 %v4307_v48 }
0x13cd   :  { %3344 = vmatprep.subr.mxu0 %v3921_v1 }
0x13ce   :  { %v3813_v32 = vpop.eup %3812  ;;  %3345 = vmatpush3.msra.mxu0 %v4317_v49 }
0x13cf   :  { %921 = vrot.lane.b32.xlu0 %v3813_v32, %s3923_s18  ;;  %3395 = vmatprep.subr.mxu0 %v3921_v1  ;;  %v4439_v32 = vld [vmem:[%s5140_s9 + $0x58] sm:$0xff] }
0x13d0   :  { %v3815_v34 = vpop.eup %3814 }
0x13d1   :  { %v915_v35 = vadd.f32 1.0, %v3815_v34  ;;  %v4453_v34 = vld [vmem:[%s5140_s9 + $0x48] sm:$0xff] }
0x13d3   :  { %3816 = vrcp.f32 %v915_v35  ;;  %v4460_v35 = vld [vmem:[%s5140_s9 + $0x40] sm:$0xff] }
0x13e0   :  { %v3817_v36 = vpop.eup %3816 }
0x13e1   :  { %v919_v39 = vmul.f32 %v3817_v36, %v825_v22 }
0x1441   :  { %v922_v37 = vpop.permute.xlu0 %921 }
0x1442   :  { %v924_v38 = vmul.f32 %v3817_v36, %v922_v37  ;;  %v4474_v37 = vld [vmem:[%s5140_s9 + $0x30] sm:$0xff] }
0x1444   :  { %926 = vrot.lane.b32.xlu1 %v924_v38, %s3924_s19  ;;  %v4481_v38 = vld [vmem:[%s5140_s9 + $0x28] sm:$0xff] }
0x14b6   :  { %v927_v40 = vpop.permute.xlu1 %926 }
0x14b7   :  { %v4261_v41 = vadd.f32 %v927_v40, %v919_v39  ;;  %v4488_v39 = vld [vmem:[%s5140_s9 + $0x20] sm:$0xff]  ;;  %v4495_v40 = vld [vmem:[%s5140_s9 + $0x18] sm:$0xff] }
0x14b9   :  { %3818 = vtanh.f32 %v4261_v41 }
0x14c6   :  { %v3819_v47 = vpop.eup %3818 }
0x14c7   :  { %932 = vrot.lane.b32.xlu0 %v3819_v47, %s3923_s18 }
0x1539   :  { %v933_v50 = vpop.permute.xlu0 %932 }
0x153a   :  { %v935_v51 = vmul.f32 %v3817_v36, %v933_v50  ;;  %v4467_v36 = vld [vmem:[%s5140_s9 + $0x38] sm:$0xff] }
0x153c   :  { %939 = vrot.lane.b32.xlu1 %v935_v51, %s3923_s18 }
0x15ae   :  { %v940_v0 = vpop.permute.xlu1 %939 }
0x15af   :  { %v942_v2 = vsel %vm108_vm1, %v937_v52, %v940_v0  ;;  %v4504_v52 = vld [vmem:[%s5140_s9 + $0x10] sm:$0xff]  ;;  %v4511_v0 = vld [vmem:[%s5140_s9 + $0x8] sm:$0xff] }
0x15b0   :  { %3347 = vmatmul.mubr.msk.f32.vlgmr.msra.gmra.mxu0 %vm110_vm2, %v942_v2  ;;  %v4518_v2 = vld [vmem:[%s5140_s9] sm:$0xff] }
0x15b1   :  { %3396 = vmatpush3.msra.mxu0 %v4267_v11  ;;  %3411 = vmatprep.mubr.msk.f32.mxu0 %vm3922_vm0, %v3921_v1 }
0x15b2   :  { %3397 = vmatprep.subr.mxu0 %v3921_v1 }
0x15b3   :  { %3398 = vmatpush3.msra.mxu0 %v4272_v42 }
0x15b4   :  { %3399 = vmatprep.subr.mxu0 %v3921_v1 }
0x15b5   :  { %3400 = vmatpush3.msra.mxu0 %v4279_v43 }
0x15b6   :  { %3401 = vmatprep.subr.mxu0 %v3921_v1 }
0x15b7   :  { %3402 = vmatpush3.msra.mxu0 %v4286_v44 }
0x15b8   :  { %3403 = vmatprep.subr.mxu0 %v3921_v1 }
0x15b9   :  { %3404 = vmatpush3.msra.mxu0 %v4293_v45 }
0x15ba   :  { %3405 = vmatprep.subr.mxu0 %v3921_v1 }
0x15bb   :  { %3406 = vmatpush3.msra.mxu0 %v4300_v46 }
0x15bc   :  { %3407 = vmatprep.subr.mxu0 %v3921_v1 }
0x15bd   :  { %3408 = vmatpush3.msra.mxu0 %v4307_v48 }
0x15be   :  { %3409 = vmatprep.subr.mxu0 %v3921_v1 }
0x15bf   :  { %3410 = vmatpush3.msra.mxu0 %v4317_v49 }
0x15c0   :  { %3414 = vmatprep.subr.mxu0 %v3921_v1 }
0x1670   :  { %v1012_v4 = vpop.f32.mrf.mxu0 }
0x1671   :  { %v1013_v5 = vadd.f32 %v4348_v3, %v1012_v4 }
0x1672   :  { %v3348_v6 = vpop.f32.mrf.mxu0 }
0x1673   :  { %3820 = vtanh.f32 %v1013_v5  ;;  %v2855_v7 = vmul.f32 -1.442695, %v1013_v5 }
0x1675   :  { %3822 = vpow2.f32 %v2855_v7 }
0x1680   :  { %v3821_v53 = vpop.eup %3820 }
0x1681   :  { %1025 = vrot.lane.b32.xlu0 %v3821_v53, %s3923_s18 }
0x1682   :  { %v3823_v54 = vpop.eup %3822 }
0x1683   :  { %v1019_v55 = vadd.f32 1.0, %v3823_v54  ;;  %v3925_v54 = vmov 1.0  }
0x1685   :  { %3824 = vrcp.f32 %v1019_v55  ;;  %v2861_v55 = vld [vmem:[%s5133_s2 + $0x2] sm:$0x3] }
0x1692   :  { %v3825_v9 = vpop.eup %3824 }
0x1693   :  { %v1023_v58 = vmul.f32 %v3825_v9, %v4261_v41 }
0x16f3   :  { %v1026_v56 = vpop.permute.xlu0 %1025 }
0x16f4   :  { %v1028_v57 = vmul.f32 %v3825_v9, %v1026_v56  ;;  %v1222_v56 = vstv %s1221_s12 }
0x16f6   :  { %1030 = vrot.lane.b32.xlu1 %v1028_v57, %s3924_s19 }
0x1768   :  { %v1031_v59 = vpop.permute.xlu1 %1030 }
0x1769   :  { %v4354_v60 = vadd.f32 %v1031_v59, %v1023_v58 }
0x176b   :  { %3826 = vtanh.f32 %v4354_v60 }
0x1778   :  { %v3827_v10 = vpop.eup %3826 }
0x1779   :  { %1036 = vrot.lane.b32.xlu0 %v3827_v10, %s3923_s18 }
0x17eb   :  { %v1037_v12 = vpop.permute.xlu0 %1036 }
0x17ec   :  { %v4386_v13 = vmul.f32 %v3825_v9, %v1037_v12  ;;  %v1219_v9 = vstv %s1216_s1 }
0x17ed   :  { %v1220_v57 = vmul.f32 %v2861_v55, %v1219_v9 }
0x17ee   :  { %1041 = vrot.lane.b32.xlu1 %v4386_v13, %s3924_s19 }
0x1860   :  { %v1042_v14 = vpop.permute.xlu1 %1041 }
0x1861   :  { %3358 = vmatmul.mubr.msk.f32.vlgmr.msra.gmra.mxu1 %vm108_vm1, %v1042_v14 }
0x1862   :  { %3392 = vmatprep.mubr.msk.f32.mxu1 %vm3922_vm0, %v3921_v1  ;;  %3361 = vmatpush3.msra.mxu1 %v4413_v28 }
0x1863   :  { %3362 = vmatprep.subr.mxu1 %v3921_v1 }
0x1864   :  { %3363 = vmatpush3.msra.mxu1 %v4418_v29 }
0x1865   :  { %3364 = vmatprep.subr.mxu1 %v3921_v1 }
0x1866   :  { %3365 = vmatpush3.msra.mxu1 %v4425_v30 }
0x1867   :  { %3366 = vmatprep.subr.mxu1 %v3921_v1 }
0x1868   :  { %3367 = vmatpush3.msra.mxu1 %v4432_v31 }
0x1869   :  { %3368 = vmatprep.subr.mxu1 %v3921_v1 }
0x186a   :  { %3369 = vmatpush3.msra.mxu1 %v4439_v32 }
0x186b   :  { %3370 = vmatprep.subr.mxu1 %v3921_v1 }
0x186c   :  { %3371 = vmatpush3.msra.mxu1 %v4446_v33 }
0x186d   :  { %3372 = vmatprep.subr.mxu1 %v3921_v1 }
0x186e   :  { %3373 = vmatpush3.msra.mxu1 %v4453_v34 }
0x186f   :  { %3374 = vmatprep.subr.mxu1 %v3921_v1 }
0x1870   :  { %3375 = vmatpush3.msra.mxu1 %v4460_v35 }
0x1871   :  { %3376 = vmatprep.subr.mxu1 %v3921_v1 }
0x1872   :  { %3377 = vmatpush3.msra.mxu1 %v4467_v36 }
0x1873   :  { %3378 = vmatprep.subr.mxu1 %v3921_v1 }
0x1874   :  { %3379 = vmatpush3.msra.mxu1 %v4474_v37 }
0x1875   :  { %3380 = vmatprep.subr.mxu1 %v3921_v1 }
0x1876   :  { %3381 = vmatpush3.msra.mxu1 %v4481_v38 }
0x1877   :  { %3382 = vmatprep.subr.mxu1 %v3921_v1 }
0x1878   :  { %3383 = vmatpush3.msra.mxu1 %v4488_v39 }
0x1879   :  { %3384 = vmatprep.subr.mxu1 %v3921_v1 }
0x187a   :  { %3385 = vmatpush3.msra.mxu1 %v4495_v40 }
0x187b   :  { %3386 = vmatprep.subr.mxu1 %v3921_v1 }
0x187c   :  { %3387 = vmatpush3.msra.mxu1 %v4504_v52 }
0x187d   :  { %3388 = vmatprep.subr.mxu1 %v3921_v1 }
0x187e   :  { %3389 = vmatpush3.msra.mxu1 %v4511_v0 }
0x187f   :  { %3390 = vmatprep.subr.mxu1 %v3921_v1 }
0x1880   :  { %3391 = vmatpush3.msra.mxu1 %v4518_v2 }
0x1881   :  { %3460 = vmatprep.subr.mxu1 %v3921_v1 }
0x1921   :  { %v1111_v18 = vpop.f32.mrf.mxu1 }
0x1922   :  { %v1112_v19 = vadd.f32 %v4398_v17, %v1111_v18 }
0x1923   :  { %v3359_v20 = vpop.f32.mrf.mxu1 }
0x1924   :  { %2857 = vst [vmem:[%s5141_s10 + $0x2] sm:$0x3] %v1112_v19  ;;  %v1118_v21 = vsel %vm1117_vm3, %v1112_v19, -inf }
0x1925   :  { %v1120_v22 = vsel %vm1119_vm4, %v1118_v21, -inf }
0x1926   :  { %1121 = vmax.xlane.f32.xlu0 %v1120_v22 }
0x19af   :  { %v1122_v23 = vpop.xlane.xlu0 %1121 }
0x19b0   :  { %vm1123_vm5 = vcmp.eq.f32.partialorder %v1118_v21, %v1122_v23 }
0x19b1   :  { %v1124_v24 = vsel %vm1123_vm5, %v4393_v16, 128 }
0x19b2   :  { %v1125_v25 = vsel %vm1119_vm4, %v1124_v24, 2147483647 }
0x19b3   :  { %v1127_v26 = vshra.s32 %v1125_v25, 16  ;;  %v1126_v41 = vand.u32 65535, %v1125_v25 }
0x19b5   :  { %v1129_v27 = vcvt.s32.f32 %v1127_v26  ;;  %v1128_v50 = vcvt.s32.f32 %v1126_v41 }
0x19b7   :  { %1130 = vmin.xlane.f32.xlu1 %v1129_v27 }
0x1a40   :  { %v1131_v47 = vpop.xlane.xlu1 %1130 }
0x1a41   :  { %vm1132_vm6 = vcmp.eq.f32.partialorder %v1129_v27, %v1131_v47  ;;  %v1137_v4 = vcvt.f32.s32 %v1131_v47 }
0x1a42   :  { %v1133_v51 = vsel %vm1132_vm6, %v1128_v50, inf }
0x1a43   :  { %1134 = vmin.xlane.f32.xlu0 %v1133_v51  ;;  %v1138_v6 = vshll.u32 %v1137_v4, 16 }
0x1a59   :  { %1225 = vrot.lane.b32.xlu0 %v4386_v13, %s3923_s18 }
0x1acc   :  { %v1135_v5 = vpop.xlane.xlu0 %1134 }
0x1acd   :  { %v1136_v53 = vcvt.f32.s32 %v1135_v5 }
0x1acf   :  { %v1139_v7 = vadd.s32 %v1138_v6, %v1136_v53 }
0x1ad0   :  { %v1226_v13 = vpop.permute.xlu0 %1225 }
0x1ad1   :  { %vm1140_vm7 = vcmp.eq.s32.totalorder %v4393_v16, %v1139_v7 }
0x1ad2   :  { %3393 = vmatmul.mubr.msk.f32.vlgmr.msra.gmra.mxu1 %vm1140_vm7, %v3925_v54 }
0x1ad3   :  { %3461 = vmatpush3.msra.mxu1 %v4267_v11  ;;  %3476 = vmatprep.mubr.msk.f32.mxu1 %vm3922_vm0, %v3921_v1 }
0x1ad4   :  { %3462 = vmatprep.subr.mxu1 %v3921_v1 }
0x1ad5   :  { %3463 = vmatpush3.msra.mxu1 %v4272_v42 }
0x1ad6   :  { %3464 = vmatprep.subr.mxu1 %v3921_v1 }
0x1ad7   :  { %3465 = vmatpush3.msra.mxu1 %v4279_v43 }
0x1ad8   :  { %3466 = vmatprep.subr.mxu1 %v3921_v1 }
0x1ad9   :  { %3467 = vmatpush3.msra.mxu1 %v4286_v44 }
0x1ada   :  { %3468 = vmatprep.subr.mxu1 %v3921_v1 }
0x1adb   :  { %3469 = vmatpush3.msra.mxu1 %v4293_v45 }
0x1adc   :  { %3470 = vmatprep.subr.mxu1 %v3921_v1 }
0x1add   :  { %3471 = vmatpush3.msra.mxu1 %v4300_v46 }
0x1ade   :  { %3472 = vmatprep.subr.mxu1 %v3921_v1 }
0x1adf   :  { %3473 = vmatpush3.msra.mxu1 %v4307_v48 }
0x1ae0   :  { %3474 = vmatprep.subr.mxu1 %v3921_v1 }
0x1ae1   :  { %3475 = vmatpush3.msra.mxu1 %v4317_v49 }
0x1ae2   :  { %3479 = vmatprep.subr.mxu1 %v3921_v1 }
0x1b92   :  { %v1209_v58 = vpop.f32.mrf.mxu1 }
0x1b93   :  { %v1223_v59 = vmul.f32 %v1222_v56, %v1209_v58 }
0x1b94   :  { %v3394_v10 = vpop.f32.mrf.mxu1 }
0x1b95   :  { %v1224_v12 = vadd.f32 %v1223_v59, %v1220_v57 }
0x1b97   :  { %v1228_v14 = vsel %vm108_vm1, %v1224_v12, %v1226_v13 }
0x1b98   :  { %3412 = vmatmul.mubr.msk.f32.vlgmr.msra.gmra.mxu0 %vm110_vm2, %v1228_v14 }
0x1b99   :  { %3415 = vmatpush3.msra.mxu0 %v4360_v61  ;;  %3422 = vmatprep.mubr.msk.f32.mxu0 %vm3922_vm0, %v3921_v1 }
0x1b9a   :  { %3416 = vmatprep.subr.mxu0 %v3921_v1 }
0x1b9b   :  { %3417 = vmatpush3.msra.mxu0 %v4365_v62 }
0x1b9c   :  { %3418 = vmatprep.subr.mxu0 %v3921_v1 }
0x1b9d   :  { %3419 = vmatpush3.msra.mxu0 %v4372_v63 }
0x1b9e   :  { %3420 = vmatprep.subr.mxu0 %v3921_v1 }
0x1b9f   :  { %3421 = vmatpush3.msra.mxu0 %v4379_v8 }
0x1ba0   :  { %3425 = vmatprep.subr.mxu0 %v3921_v1 }
0x1c58   :  { %v1298_v15 = vpop.f32.mrf.mxu0 }
0x1c59   :  { %v1299_v18 = vadd.f32 %v4348_v3, %v1298_v15 }
0x1c5a   :  { %v3413_v19 = vpop.f32.mrf.mxu0 }
0x1c5b   :  { %3828 = vtanh.f32 %v1299_v18  ;;  %v2863_v21 = vmul.f32 -1.442695, %v1299_v18 }
0x1c5d   :  { %3830 = vpow2.f32 %v2863_v21 }
0x1c68   :  { %v3829_v20 = vpop.eup %3828 }
0x1c69   :  { %1311 = vrot.lane.b32.xlu1 %v3829_v20, %s3923_s18 }
0x1c6a   :  { %v3831_v22 = vpop.eup %3830 }
0x1c6b   :  { %v1305_v23 = vadd.f32 1.0, %v3831_v22  ;;  %v2869_v22 = vld [vmem:[%s5133_s2 + $0x4] sm:$0x3] }
0x1c6d   :  { %3832 = vrcp.f32 %v1305_v23  ;;  %v1503_v23 = vstv %s1500_s4 }
0x1c7a   :  { %v3833_v24 = vpop.eup %3832 }
0x1c7b   :  { %v1309_v27 = vmul.f32 %v3833_v24, %v4354_v60 }
0x1cdb   :  { %v1312_v25 = vpop.permute.xlu1 %1311 }
0x1cdc   :  { %v1314_v26 = vmul.f32 %v3833_v24, %v1312_v25  ;;  %v1504_v25 = vmul.f32 %v2869_v22, %v1503_v23 }
0x1cde   :  { %1316 = vrot.lane.b32.xlu1 %v1314_v26, %s3924_s19 }
0x1d50   :  { %v1317_v41 = vpop.permute.xlu1 %1316 }
0x1d51   :  { %v4563_v47 = vadd.f32 %v1317_v41, %v1309_v27 }
0x1d53   :  { %3834 = vtanh.f32 %v4563_v47 }
0x1d60   :  { %v3835_v50 = vpop.eup %3834 }
0x1d61   :  { %1322 = vrot.lane.b32.xlu0 %v3835_v50, %s3923_s18 }
0x1dd3   :  { %v1323_v51 = vpop.permute.xlu0 %1322 }
0x1dd4   :  { %v1325_v4 = vmul.f32 %v3833_v24, %v1323_v51  ;;  %v1506_v24 = vstv %s1505_s0 }
0x1dd6   :  { %1327 = vrot.lane.b32.xlu1 %v1325_v4, %s3924_s19 }
0x1e48   :  { %v1328_v5 = vpop.permute.xlu1 %1327 }
0x1e49   :  { %3423 = vmatmul.mubr.msk.f32.vlgmr.msra.gmra.mxu0 %vm108_vm1, %v1328_v5 }
0x1e4a   :  { %3426 = vmatpush3.msra.mxu0 %v4413_v28  ;;  %3457 = vmatprep.mubr.msk.f32.mxu0 %vm3922_vm0, %v3921_v1 }
0x1e4b   :  { %3427 = vmatprep.subr.mxu0 %v3921_v1 }
0x1e4c   :  { %3428 = vmatpush3.msra.mxu0 %v4418_v29 }
0x1e4d   :  { %3429 = vmatprep.subr.mxu0 %v3921_v1 }
0x1e4e   :  { %3430 = vmatpush3.msra.mxu0 %v4425_v30 }
0x1e4f   :  { %3431 = vmatprep.subr.mxu0 %v3921_v1 }
0x1e50   :  { %3432 = vmatpush3.msra.mxu0 %v4432_v31 }
0x1e51   :  { %3433 = vmatprep.subr.mxu0 %v3921_v1 }
0x1e52   :  { %3434 = vmatpush3.msra.mxu0 %v4439_v32 }
0x1e53   :  { %3435 = vmatprep.subr.mxu0 %v3921_v1 }
0x1e54   :  { %3436 = vmatpush3.msra.mxu0 %v4446_v33 }
0x1e55   :  { %3437 = vmatprep.subr.mxu0 %v3921_v1 }
0x1e56   :  { %3438 = vmatpush3.msra.mxu0 %v4453_v34 }
0x1e57   :  { %3439 = vmatprep.subr.mxu0 %v3921_v1 }
0x1e58   :  { %3440 = vmatpush3.msra.mxu0 %v4460_v35 }
0x1e59   :  { %3441 = vmatprep.subr.mxu0 %v3921_v1 }
0x1e5a   :  { %3442 = vmatpush3.msra.mxu0 %v4467_v36 }
0x1e5b   :  { %3443 = vmatprep.subr.mxu0 %v3921_v1 }
0x1e5c   :  { %3444 = vmatpush3.msra.mxu0 %v4474_v37 }
0x1e5d   :  { %3445 = vmatprep.subr.mxu0 %v3921_v1 }
0x1e5e   :  { %3446 = vmatpush3.msra.mxu0 %v4481_v38 }
0x1e5f   :  { %3447 = vmatprep.subr.mxu0 %v3921_v1 }
0x1e60   :  { %3448 = vmatpush3.msra.mxu0 %v4488_v39 }
0x1e61   :  { %3449 = vmatprep.subr.mxu0 %v3921_v1 }
0x1e62   :  { %3450 = vmatpush3.msra.mxu0 %v4495_v40 }
0x1e63   :  { %3451 = vmatprep.subr.mxu0 %v3921_v1 }
0x1e64   :  { %3452 = vmatpush3.msra.mxu0 %v4504_v52 }
0x1e65   :  { %3453 = vmatprep.subr.mxu0 %v3921_v1 }
0x1e66   :  { %3454 = vmatpush3.msra.mxu0 %v4511_v0 }
0x1e67   :  { %3455 = vmatprep.subr.mxu0 %v3921_v1 }
0x1e68   :  { %3456 = vmatpush3.msra.mxu0 %v4518_v2 }
0x1e69   :  { %3525 = vmatprep.subr.mxu0 %v3921_v1 }
0x1f09   :  { %v1397_v60 = vpop.f32.mrf.mxu0 }
0x1f0a   :  { %v1398_v6 = vadd.f32 %v4398_v17, %v1397_v60 }
0x1f0b   :  { %v3424_v53 = vpop.f32.mrf.mxu0 }
0x1f0c   :  { %2865 = vst [vmem:[%s5141_s10 + $0x4] sm:$0x3] %v1398_v6  ;;  %v1403_v7 = vsel %vm1117_vm3, %v1398_v6, -inf }
0x1f0d   :  { %v1404_v55 = vsel %vm1119_vm4, %v1403_v7, -inf }
0x1f0e   :  { %1405 = vmax.xlane.f32.xlu0 %v1404_v55 }
0x1f97   :  { %v1406_v9 = vpop.xlane.xlu0 %1405 }
0x1f98   :  { %vm1407_vm8 = vcmp.eq.f32.partialorder %v1403_v7, %v1406_v9 }
0x1f99   :  { %v1408_v56 = vsel %vm1407_vm8, %v4393_v16, 128 }
0x1f9a   :  { %v1409_v57 = vsel %vm1119_vm4, %v1408_v56, 2147483647 }
0x1f9b   :  { %v1411_v58 = vshra.s32 %v1409_v57, 16  ;;  %v1410_v10 = vand.u32 65535, %v1409_v57 }
0x1f9d   :  { %v1413_v59 = vcvt.s32.f32 %v1411_v58  ;;  %v1412_v13 = vcvt.s32.f32 %v1410_v10 }
0x1f9f   :  { %1414 = vmin.xlane.f32.xlu1 %v1413_v59 }
0x2028   :  { %v1415_v12 = vpop.xlane.xlu1 %1414 }
0x2029   :  { %vm1416_vm9 = vcmp.eq.f32.partialorder %v1413_v59, %v1415_v12  ;;  %v1421_v15 = vcvt.f32.s32 %v1415_v12 }
0x202a   :  { %v1417_v14 = vsel %vm1416_vm9, %v1412_v13, inf }
0x202b   :  { %1418 = vmin.xlane.f32.xlu0 %v1417_v14  ;;  %v1422_v19 = vshll.u32 %v1421_v15, 16 }
0x2041   :  { %1509 = vrot.lane.b32.xlu0 %v1325_v4, %s3923_s18 }
0x20b4   :  { %v1419_v18 = vpop.xlane.xlu0 %1418 }
0x20b5   :  { %v1420_v20 = vcvt.f32.s32 %v1419_v18 }
0x20b7   :  { %v1423_v21 = vadd.s32 %v1422_v19, %v1420_v20 }
0x20b8   :  { %v1510_v51 = vpop.permute.xlu0 %1509 }
0x20b9   :  { %vm1424_vm10 = vcmp.eq.s32.totalorder %v4393_v16, %v1423_v21 }
0x20ba   :  { %3458 = vmatmul.mubr.msk.f32.vlgmr.msra.gmra.mxu0 %vm1424_vm10, %v3925_v54 }
0x20bb   :  { %3526 = vmatpush3.msra.mxu0 %v4267_v11  ;;  %3541 = vmatprep.mubr.msk.f32.mxu0 %vm3922_vm0, %v3921_v1 }
0x20bc   :  { %3527 = vmatprep.subr.mxu0 %v3921_v1 }
0x20bd   :  { %3528 = vmatpush3.msra.mxu0 %v4272_v42 }
0x20be   :  { %3529 = vmatprep.subr.mxu0 %v3921_v1 }
0x20bf   :  { %3530 = vmatpush3.msra.mxu0 %v4279_v43 }
0x20c0   :  { %3531 = vmatprep.subr.mxu0 %v3921_v1 }
0x20c1   :  { %3532 = vmatpush3.msra.mxu0 %v4286_v44 }
0x20c2   :  { %3533 = vmatprep.subr.mxu0 %v3921_v1 }
0x20c3   :  { %3534 = vmatpush3.msra.mxu0 %v4293_v45 }
0x20c4   :  { %3535 = vmatprep.subr.mxu0 %v3921_v1 }
0x20c5   :  { %3536 = vmatpush3.msra.mxu0 %v4300_v46 }
0x20c6   :  { %3537 = vmatprep.subr.mxu0 %v3921_v1 }
0x20c7   :  { %3538 = vmatpush3.msra.mxu0 %v4307_v48 }
0x20c8   :  { %3539 = vmatprep.subr.mxu0 %v3921_v1 }
0x20c9   :  { %3540 = vmatpush3.msra.mxu0 %v4317_v49 }
0x20ca   :  { %3544 = vmatprep.subr.mxu0 %v3921_v1 }
0x217a   :  { %v1493_v26 = vpop.f32.mrf.mxu0 }
0x217b   :  { %v1507_v27 = vmul.f32 %v1506_v24, %v1493_v26 }
0x217c   :  { %v3459_v41 = vpop.f32.mrf.mxu0 }
0x217d   :  { %v1508_v50 = vadd.f32 %v1507_v27, %v1504_v25 }
0x217f   :  { %v1512_v4 = vsel %vm108_vm1, %v1508_v50, %v1510_v51 }
0x2180   :  { %3477 = vmatmul.mubr.msk.f32.vlgmr.msra.gmra.mxu1 %vm110_vm2, %v1512_v4 }
0x2181   :  { %3480 = vmatpush3.msra.mxu1 %v4360_v61  ;;  %3487 = vmatprep.mubr.msk.f32.mxu1 %vm3922_vm0, %v3921_v1 }
0x2182   :  { %3481 = vmatprep.subr.mxu1 %v3921_v1 }
0x2183   :  { %3482 = vmatpush3.msra.mxu1 %v4365_v62 }
0x2184   :  { %3483 = vmatprep.subr.mxu1 %v3921_v1 }
0x2185   :  { %3484 = vmatpush3.msra.mxu1 %v4372_v63 }
0x2186   :  { %3485 = vmatprep.subr.mxu1 %v3921_v1 }
0x2187   :  { %3486 = vmatpush3.msra.mxu1 %v4379_v8 }
0x2188   :  { %3490 = vmatprep.subr.mxu1 %v3921_v1 }
0x2240   :  { %v1582_v5 = vpop.f32.mrf.mxu1 }
0x2241   :  { %v1583_v60 = vadd.f32 %v4348_v3, %v1582_v5 }
0x2242   :  { %v3478_v6 = vpop.f32.mrf.mxu1 }
0x2243   :  { %3836 = vtanh.f32 %v1583_v60  ;;  %v2871_v7 = vmul.f32 -1.442695, %v1583_v60 }
0x2245   :  { %3838 = vpow2.f32 %v2871_v7 }
0x2250   :  { %v3837_v53 = vpop.eup %3836 }
0x2251   :  { %1595 = vrot.lane.b32.xlu1 %v3837_v53, %s3923_s18 }
0x2252   :  { %v3839_v55 = vpop.eup %3838 }
0x2253   :  { %v1589_v9 = vadd.f32 1.0, %v3839_v55 }
0x2255   :  { %3840 = vrcp.f32 %v1589_v9 }
0x2262   :  { %v3841_v56 = vpop.eup %3840 }
0x2263   :  { %v1593_v59 = vmul.f32 %v3841_v56, %v4563_v47 }
0x22c3   :  { %v1596_v57 = vpop.permute.xlu1 %1595 }
0x22c4   :  { %v1598_v58 = vmul.f32 %v3841_v56, %v1596_v57 }
0x22c6   :  { %1600 = vrot.lane.b32.xlu1 %v1598_v58, %s3924_s19 }
0x2338   :  { %v1601_v10 = vpop.permute.xlu1 %1600 }
0x2339   :  { %v4652_v12 = vadd.f32 %v1601_v10, %v1593_v59 }
0x233b   :  { %3842 = vtanh.f32 %v4652_v12 }
0x2348   :  { %v3843_v13 = vpop.eup %3842 }
0x2349   :  { %1606 = vrot.lane.b32.xlu0 %v3843_v13, %s3923_s18 }
0x23bb   :  { %v1607_v14 = vpop.permute.xlu0 %1606 }
0x23bc   :  { %v1609_v15 = vmul.f32 %v3841_v56, %v1607_v14 }
0x23be   :  { %1611 = vrot.lane.b32.xlu1 %v1609_v15, %s3924_s19 }
0x2430   :  { %v1612_v18 = vpop.permute.xlu1 %1611 }
0x2431   :  { %3488 = vmatmul.mubr.msk.f32.vlgmr.msra.gmra.mxu1 %vm108_vm1, %v1612_v18 }
0x2432   :  { %3491 = vmatpush3.msra.mxu1 %v4413_v28  ;;  %3522 = vmatprep.mubr.msk.f32.mxu1 %vm3922_vm0, %v3921_v1 }
0x2433   :  { %3492 = vmatprep.subr.mxu1 %v3921_v1 }
0x2434   :  { %3493 = vmatpush3.msra.mxu1 %v4418_v29 }
0x2435   :  { %3494 = vmatprep.subr.mxu1 %v3921_v1 }
0x2436   :  { %3495 = vmatpush3.msra.mxu1 %v4425_v30 }
0x2437   :  { %3496 = vmatprep.subr.mxu1 %v3921_v1 }
0x2438   :  { %3497 = vmatpush3.msra.mxu1 %v4432_v31 }
0x2439   :  { %3498 = vmatprep.subr.mxu1 %v3921_v1 }
0x243a   :  { %3499 = vmatpush3.msra.mxu1 %v4439_v32 }
0x243b   :  { %3500 = vmatprep.subr.mxu1 %v3921_v1 }
0x243c   :  { %3501 = vmatpush3.msra.mxu1 %v4446_v33 }
0x243d   :  { %3502 = vmatprep.subr.mxu1 %v3921_v1 }
0x243e   :  { %3503 = vmatpush3.msra.mxu1 %v4453_v34 }
0x243f   :  { %3504 = vmatprep.subr.mxu1 %v3921_v1 }
0x2440   :  { %3505 = vmatpush3.msra.mxu1 %v4460_v35 }
0x2441   :  { %3506 = vmatprep.subr.mxu1 %v3921_v1 }
0x2442   :  { %3507 = vmatpush3.msra.mxu1 %v4467_v36 }
0x2443   :  { %3508 = vmatprep.subr.mxu1 %v3921_v1 }
0x2444   :  { %3509 = vmatpush3.msra.mxu1 %v4474_v37 }
0x2445   :  { %3510 = vmatprep.subr.mxu1 %v3921_v1 }
0x2446   :  { %3511 = vmatpush3.msra.mxu1 %v4481_v38 }
0x2447   :  { %3512 = vmatprep.subr.mxu1 %v3921_v1 }
0x2448   :  { %3513 = vmatpush3.msra.mxu1 %v4488_v39 }
0x2449   :  { %3514 = vmatprep.subr.mxu1 %v3921_v1 }
0x244a   :  { %3515 = vmatpush3.msra.mxu1 %v4495_v40 }
0x244b   :  { %3516 = vmatprep.subr.mxu1 %v3921_v1 }
0x244c   :  { %3517 = vmatpush3.msra.mxu1 %v4504_v52 }
0x244d   :  { %3518 = vmatprep.subr.mxu1 %v3921_v1 }
0x244e   :  { %3519 = vmatpush3.msra.mxu1 %v4511_v0 }
0x244f   :  { %3520 = vmatprep.subr.mxu1 %v3921_v1 }
0x2450   :  { %3521 = vmatpush3.msra.mxu1 %v4518_v2 }
0x2451   :  { %3590 = vmatprep.subr.mxu1 %v3921_v1 }
0x24f1   :  { %v1681_v47 = vpop.f32.mrf.mxu1 }
0x24f2   :  { %v1682_v19 = vadd.f32 %v4398_v17, %v1681_v47 }
0x24f3   :  { %v3489_v20 = vpop.f32.mrf.mxu1 }
0x24f4   :  { %2873 = vst [vmem:[%s5141_s10 + $0x6] sm:$0x3] %v1682_v19  ;;  %v1687_v21 = vsel %vm1117_vm3, %v1682_v19, -inf }
0x24f5   :  { %v1688_v22 = vsel %vm1119_vm4, %v1687_v21, -inf }
0x24f6   :  { %1689 = vmax.xlane.f32.xlu0 %v1688_v22 }
0x257f   :  { %v1690_v23 = vpop.xlane.xlu0 %1689 }
0x2580   :  { %vm1691_vm11 = vcmp.eq.f32.partialorder %v1687_v21, %v1690_v23 }
0x2581   :  { %v1692_v24 = vsel %vm1691_vm11, %v4393_v16, 128 }
0x2582   :  { %v1693_v25 = vsel %vm1119_vm4, %v1692_v24, 2147483647 }
0x2583   :  { %v1695_v26 = vshra.s32 %v1693_v25, 16  ;;  %v1694_v41 = vand.u32 65535, %v1693_v25 }
0x2585   :  { %v1697_v27 = vcvt.s32.f32 %v1695_v26  ;;  %v1696_v51 = vcvt.s32.f32 %v1694_v41  ;;  %v4796_v41 = vld [vmem:[%s5136_s5 + $0x38] sm:$0xff] }
0x2587   :  { %1698 = vmin.xlane.f32.xlu1 %v1697_v27 }
0x2610   :  { %v1699_v50 = vpop.xlane.xlu1 %1698 }
0x2611   :  { %vm1700_vm12 = vcmp.eq.f32.partialorder %v1697_v27, %v1699_v50  ;;  %v1705_v5 = vcvt.f32.s32 %v1699_v50  ;;  %v4805_v50 = vld [vmem:[%s5136_s5 + $0x30] sm:$0xff] }
0x2612   :  { %v1701_v4 = vsel %vm1700_vm12, %v1696_v51, inf  ;;  %v4812_v51 = vld [vmem:[%s5136_s5 + $0x28] sm:$0xff] }
0x2613   :  { %1702 = vmin.xlane.f32.xlu0 %v1701_v4  ;;  %v1706_v6 = vshll.u32 %v1705_v5, 16  ;;  %v4819_v4 = vld [vmem:[%s5136_s5 + $0x20] sm:$0xff]  ;;  %v4826_v5 = vld [vmem:[%s5136_s5 + $0x18] sm:$0xff] }
0x2629   :  { %1793 = vrot.lane.b32.xlu0 %v1609_v15, %s3923_s18 }
0x269c   :  { %v1703_v60 = vpop.xlane.xlu0 %1702 }
0x269d   :  { %v1704_v53 = vcvt.f32.s32 %v1703_v60  ;;  %v4833_v60 = vld [vmem:[%s5136_s5 + $0x10] sm:$0xff] }
0x269f   :  { %v1707_v7 = vadd.s32 %v1706_v6, %v1704_v53  ;;  %v4840_v6 = vld [vmem:[%s5136_s5 + $0x8] sm:$0xff]  ;;  %v4847_v53 = vld [vmem:[%s5136_s5] sm:$0xff] }
0x26a0   :  { %v1794_v9 = vpop.permute.xlu0 %1793 }
0x26a1   :  { %vm1708_vm13 = vcmp.eq.s32.totalorder %v4393_v16, %v1707_v7  ;;  %v2885_v7 = vld [vmem:[%s5133_s2 + $0x8] sm:$0x3] }
0x26a2   :  { %3523 = vmatmul.mubr.msk.f32.vlgmr.msra.gmra.mxu1 %vm1708_vm13, %v3925_v54 }
0x26a3   :  { %3591 = vmatpush3.msra.mxu1 %v4267_v11  ;;  %3606 = vmatprep.mubr.msk.f32.mxu1 %vm3922_vm0, %v3921_v1  ;;  %v2877_v11 = vld [vmem:[%s5133_s2 + $0x6] sm:$0x3] }
0x26a4   :  { %3592 = vmatprep.subr.mxu1 %v3921_v1 }
0x26a5   :  { %3593 = vmatpush3.msra.mxu1 %v4272_v42  ;;  %v1787_v42 = vstv %s1784_s26  ;;  %s2884_s26 = sld [smem:[#allocation2 + $0x4]] }
0x26a6   :  { %3594 = vmatprep.subr.mxu1 %v3921_v1 }
0x26a7   :  { %3595 = vmatpush3.msra.mxu1 %v4279_v43  ;;  %v1790_v43 = vstv %s1789_s27 }
0x26a8   :  { %3596 = vmatprep.subr.mxu1 %v3921_v1 }
0x26a9   :  { %3597 = vmatpush3.msra.mxu1 %v4286_v44  ;;  %v1788_v44 = vmul.f32 %v2877_v11, %v1787_v42 }
0x26aa   :  { %3598 = vmatprep.subr.mxu1 %v3921_v1 }
0x26ab   :  { %3599 = vmatpush3.msra.mxu1 %v4293_v45  ;;  %p2066_p8 = scmp.ne.s32.totalorder %s2884_s26, 0 }
0x26ac   :  { %3600 = vmatprep.subr.mxu1 %v3921_v1 }
0x26ad   :  { %3601 = vmatpush3.msra.mxu1 %v4300_v46  ;;  %s2067_s27 = scalar_select %p2066_p8, 1, 0 }
0x26ae   :  { %3602 = vmatprep.subr.mxu1 %v3921_v1 }
0x26af   :  { %3603 = vmatpush3.msra.mxu1 %v4307_v48  ;;  %s2068_s28 = scvt.s32.f32 %s2067_s27 }
0x26b0   :  { %3604 = vmatprep.subr.mxu1 %v3921_v1 }
0x26b1   :  { %3605 = vmatpush3.msra.mxu1 %v4317_v49  ;;  %s2073_s29 = ssub.f32 1.0, %s2068_s28  ;;  %v2071_v11 = vstv %s2068_s28 }
0x26b2   :  { %3609 = vmatprep.subr.mxu1 %v3921_v1 }
0x26b3   :  { %v2074_v42 = vstv %s2073_s29 }
0x2762   :  { %v1777_v45 = vpop.f32.mrf.mxu1 }
0x2763   :  { %v1791_v46 = vmul.f32 %v1790_v43, %v1777_v45  ;;  %v2072_v43 = vmul.f32 %v2885_v7, %v2071_v11 }
0x2764   :  { %v3524_v48 = vpop.f32.mrf.mxu1 }
0x2765   :  { %v1792_v55 = vadd.f32 %v1791_v46, %v1788_v44 }
0x2767   :  { %v1796_v49 = vsel %vm108_vm1, %v1792_v55, %v1794_v9 }
0x2768   :  { %3542 = vmatmul.mubr.msk.f32.vlgmr.msra.gmra.mxu0 %vm110_vm2, %v1796_v49  ;;  %v4859_v49 = vld [vmem:[%s5138_s7 + $0x18] sm:$0xff] }
0x2769   :  { %3545 = vmatpush3.msra.mxu0 %v4360_v61  ;;  %3552 = vmatprep.mubr.msk.f32.mxu0 %vm3922_vm0, %v3921_v1 }
0x276a   :  { %3546 = vmatprep.subr.mxu0 %v3921_v1 }
0x276b   :  { %3547 = vmatpush3.msra.mxu0 %v4365_v62 }
0x276c   :  { %3548 = vmatprep.subr.mxu0 %v3921_v1 }
0x276d   :  { %3549 = vmatpush3.msra.mxu0 %v4372_v63 }
0x276e   :  { %3550 = vmatprep.subr.mxu0 %v3921_v1 }
0x276f   :  { %3551 = vmatpush3.msra.mxu0 %v4379_v8 }
0x2770   :  { %3555 = vmatprep.subr.mxu0 %v3921_v1 }
0x2828   :  { %v1866_v56 = vpop.f32.mrf.mxu0 }
0x2829   :  { %v1867_v61 = vadd.f32 %v4348_v3, %v1866_v56  ;;  %v4868_v56 = vld [vmem:[%s5138_s7 + $0x10] sm:$0xff] }
0x282a   :  { %v3543_v57 = vpop.f32.mrf.mxu0 }
0x282b   :  { %3844 = vtanh.f32 %v1867_v61  ;;  %v2879_v59 = vmul.f32 -1.442695, %v1867_v61  ;;  %v4875_v61 = vld [vmem:[%s5138_s7 + $0x8] sm:$0xff]  ;;  %v4882_v57 = vld [vmem:[%s5138_s7] sm:$0xff] }
0x282d   :  { %3846 = vpow2.f32 %v2879_v59  ;;  %v4889_v59 = vld [vmem:[%s5137_s6] ss:$0 sm:$0xff] }
0x2838   :  { %v3845_v58 = vpop.eup %3844 }
0x2839   :  { %1879 = vrot.lane.b32.xlu1 %v3845_v58, %s3923_s18 }
0x283a   :  { %v3847_v62 = vpop.eup %3846 }
0x283b   :  { %v1873_v10 = vadd.f32 1.0, %v3847_v62 }
0x283d   :  { %3848 = vrcp.f32 %v1873_v10 }
0x284a   :  { %v3849_v63 = vpop.eup %3848 }
0x284b   :  { %v1877_v8 = vmul.f32 %v3849_v63, %v4652_v12 }
0x28ab   :  { %v1880_v13 = vpop.permute.xlu1 %1879 }
0x28ac   :  { %v1882_v14 = vmul.f32 %v3849_v63, %v1880_v13 }
0x28ae   :  { %1884 = vrot.lane.b32.xlu1 %v1882_v14, %s3924_s19 }
0x2920   :  { %v1885_v15 = vpop.permute.xlu1 %1884 }
0x2921   :  { %v4741_v18 = vadd.f32 %v1885_v15, %v1877_v8 }
0x2923   :  { %3850 = vtanh.f32 %v4741_v18 }
0x2930   :  { %v3851_v3 = vpop.eup %3850 }
0x2931   :  { %1890 = vrot.lane.b32.xlu0 %v3851_v3, %s3923_s18 }
0x29a3   :  { %v1891_v47 = vpop.permute.xlu0 %1890 }
0x29a4   :  { %v1893_v19 = vmul.f32 %v3849_v63, %v1891_v47 }
0x29a6   :  { %1895 = vrot.lane.b32.xlu1 %v1893_v19, %s3924_s19 }
0x2a18   :  { %v1896_v20 = vpop.permute.xlu1 %1895 }
0x2a19   :  { %3553 = vmatmul.mubr.msk.f32.vlgmr.msra.gmra.mxu0 %vm108_vm1, %v1896_v20 }
0x2a1a   :  { %3556 = vmatpush3.msra.mxu0 %v4413_v28  ;;  %3587 = vmatprep.mubr.msk.f32.mxu0 %vm3922_vm0, %v3921_v1 }
0x2a1b   :  { %3557 = vmatprep.subr.mxu0 %v3921_v1 }
0x2a1c   :  { %3558 = vmatpush3.msra.mxu0 %v4418_v29 }
0x2a1d   :  { %3559 = vmatprep.subr.mxu0 %v3921_v1 }
0x2a1e   :  { %3560 = vmatpush3.msra.mxu0 %v4425_v30 }
0x2a1f   :  { %3561 = vmatprep.subr.mxu0 %v3921_v1 }
0x2a20   :  { %3562 = vmatpush3.msra.mxu0 %v4432_v31 }
0x2a21   :  { %3563 = vmatprep.subr.mxu0 %v3921_v1 }
0x2a22   :  { %3564 = vmatpush3.msra.mxu0 %v4439_v32 }
0x2a23   :  { %3565 = vmatprep.subr.mxu0 %v3921_v1 }
0x2a24   :  { %3566 = vmatpush3.msra.mxu0 %v4446_v33 }
0x2a25   :  { %3567 = vmatprep.subr.mxu0 %v3921_v1 }
0x2a26   :  { %3568 = vmatpush3.msra.mxu0 %v4453_v34 }
0x2a27   :  { %3569 = vmatprep.subr.mxu0 %v3921_v1 }
0x2a28   :  { %3570 = vmatpush3.msra.mxu0 %v4460_v35 }
0x2a29   :  { %3571 = vmatprep.subr.mxu0 %v3921_v1 }
0x2a2a   :  { %3572 = vmatpush3.msra.mxu0 %v4467_v36 }
0x2a2b   :  { %3573 = vmatprep.subr.mxu0 %v3921_v1 }
0x2a2c   :  { %3574 = vmatpush3.msra.mxu0 %v4474_v37 }
0x2a2d   :  { %3575 = vmatprep.subr.mxu0 %v3921_v1 }
0x2a2e   :  { %3576 = vmatpush3.msra.mxu0 %v4481_v38 }
0x2a2f   :  { %3577 = vmatprep.subr.mxu0 %v3921_v1 }
0x2a30   :  { %3578 = vmatpush3.msra.mxu0 %v4488_v39 }
0x2a31   :  { %3579 = vmatprep.subr.mxu0 %v3921_v1 }
0x2a32   :  { %3580 = vmatpush3.msra.mxu0 %v4495_v40 }
0x2a33   :  { %3581 = vmatprep.subr.mxu0 %v3921_v1 }
0x2a34   :  { %3582 = vmatpush3.msra.mxu0 %v4504_v52 }
0x2a35   :  { %3583 = vmatprep.subr.mxu0 %v3921_v1 }
0x2a36   :  { %3584 = vmatpush3.msra.mxu0 %v4511_v0 }
0x2a37   :  { %3585 = vmatprep.subr.mxu0 %v3921_v1 }
0x2a38   :  { %3586 = vmatpush3.msra.mxu0 %v4518_v2 }
0x2a39   :  { %3655 = vmatprep.subr.mxu0 %v3921_v1 }
0x2ad9   :  { %v1965_v28 = vpop.f32.mrf.mxu0 }
0x2ada   :  { %v1966_v29 = vadd.f32 %v4398_v17, %v1965_v28 }
0x2adb   :  { %v3554_v30 = vpop.f32.mrf.mxu0 }
0x2adc   :  { %2881 = vst [vmem:[%s5141_s10 + $0x8] sm:$0x3] %v1966_v29  ;;  %v1971_v31 = vsel %vm1117_vm3, %v1966_v29, -inf }
0x2add   :  { %v1972_v32 = vsel %vm1119_vm4, %v1971_v31, -inf }
0x2ade   :  { %1973 = vmax.xlane.f32.xlu0 %v1972_v32 }
0x2b67   :  { %v1974_v33 = vpop.xlane.xlu0 %1973 }
0x2b68   :  { %vm1975_vm14 = vcmp.eq.f32.partialorder %v1971_v31, %v1974_v33  ;;  %v4916_v33 = vld [vmem:[%s5140_s9 + $0x70] sm:$0xff] }
0x2b69   :  { %v1976_v34 = vsel %vm1975_vm14, %v4393_v16, 128 }
0x2b6a   :  { %v1977_v35 = vsel %vm1119_vm4, %v1976_v34, 2147483647  ;;  %v4923_v34 = vld [vmem:[%s5140_s9 + $0x68] sm:$0xff] }
0x2b6b   :  { %v1979_v36 = vshra.s32 %v1977_v35, 16  ;;  %v1978_v17 = vand.u32 65535, %v1977_v35  ;;  %v4930_v35 = vld [vmem:[%s5140_s9 + $0x60] sm:$0xff] }
0x2b6d   :  { %v1981_v37 = vcvt.s32.f32 %v1979_v36  ;;  %v1980_v21 = vcvt.s32.f32 %v1978_v17  ;;  %v4937_v36 = vld [vmem:[%s5140_s9 + $0x58] sm:$0xff]  ;;  %v4951_v17 = vld [vmem:[%s5140_s9 + $0x48] sm:$0xff] }
0x2b6f   :  { %1982 = vmin.xlane.f32.xlu1 %v1981_v37 }
0x2bf8   :  { %v1983_v12 = vpop.xlane.xlu1 %1982 }
0x2bf9   :  { %vm1984_vm15 = vcmp.eq.f32.partialorder %v1981_v37, %v1983_v12  ;;  %v1989_v23 = vcvt.f32.s32 %v1983_v12  ;;  %v4944_v37 = vld [vmem:[%s5140_s9 + $0x50] sm:$0xff]  ;;  %v4958_v12 = vld [vmem:[%s5140_s9 + $0x40] sm:$0xff] }
0x2bfa   :  { %v1985_v22 = vsel %vm1984_vm15, %v1980_v21, inf  ;;  %v4965_v21 = vld [vmem:[%s5140_s9 + $0x38] sm:$0xff] }
0x2bfb   :  { %1986 = vmin.xlane.f32.xlu0 %v1985_v22  ;;  %v1990_v25 = vshll.u32 %v1989_v23, 16  ;;  %v4972_v22 = vld [vmem:[%s5140_s9 + $0x30] sm:$0xff] }
0x2c11   :  { %2077 = vrot.lane.b32.xlu0 %v1893_v19, %s3923_s18 }
0x2c84   :  { %v1987_v24 = vpop.xlane.xlu0 %1986 }
0x2c85   :  { %v1988_v26 = vcvt.f32.s32 %v1987_v24 }
0x2c87   :  { %v1991_v27 = vadd.s32 %v1990_v25, %v1988_v26 }
0x2c88   :  { %v2078_v55 = vpop.permute.xlu0 %2077 }
0x2c89   :  { %vm1992_vm5 = vcmp.eq.s32.totalorder %v4393_v16, %v1991_v27 }
0x2c8a   :  { %3588 = vmatmul.mubr.msk.f32.vlgmr.msra.gmra.mxu0 %vm1992_vm5, %v3925_v54 }
0x2c8b   :  { %3656 = vmatpush3.msra.mxu0 %v4796_v41  ;;  %3671 = vmatprep.mubr.msk.f32.mxu0 %vm3922_vm0, %v3921_v1 }
0x2c8c   :  { %3657 = vmatprep.subr.mxu0 %v3921_v1 }
0x2c8d   :  { %3658 = vmatpush3.msra.mxu0 %v4805_v50 }
0x2c8e   :  { %3659 = vmatprep.subr.mxu0 %v3921_v1 }
0x2c8f   :  { %3660 = vmatpush3.msra.mxu0 %v4812_v51 }
0x2c90   :  { %3661 = vmatprep.subr.mxu0 %v3921_v1 }
0x2c91   :  { %3662 = vmatpush3.msra.mxu0 %v4819_v4 }
0x2c92   :  { %3663 = vmatprep.subr.mxu0 %v3921_v1 }
0x2c93   :  { %3664 = vmatpush3.msra.mxu0 %v4826_v5 }
0x2c94   :  { %3665 = vmatprep.subr.mxu0 %v3921_v1 }
0x2c95   :  { %3666 = vmatpush3.msra.mxu0 %v4833_v60 }
0x2c96   :  { %3667 = vmatprep.subr.mxu0 %v3921_v1 }
0x2c97   :  { %3668 = vmatpush3.msra.mxu0 %v4840_v6 }
0x2c98   :  { %3669 = vmatprep.subr.mxu0 %v3921_v1 }
0x2c99   :  { %3670 = vmatpush3.msra.mxu0 %v4847_v53 }
0x2c9a   :  { %3674 = vmatprep.subr.mxu0 %v3921_v1 }
0x2d4a   :  { %v2061_v44 = vpop.f32.mrf.mxu0 }
0x2d4b   :  { %v2075_v45 = vmul.f32 %v2074_v42, %v2061_v44 }
0x2d4c   :  { %v3589_v46 = vpop.f32.mrf.mxu0 }
0x2d4d   :  { %v2076_v48 = vadd.f32 %v2075_v45, %v2072_v43 }
0x2d4f   :  { %v2080_v9 = vsel %vm108_vm1, %v2076_v48, %v2078_v55 }
0x2d50   :  { %3607 = vmatmul.mubr.msk.f32.vlgmr.msra.gmra.mxu1 %vm110_vm2, %v2080_v9 }
0x2d51   :  { %3610 = vmatpush3.msra.mxu1 %v4859_v49  ;;  %3617 = vmatprep.mubr.msk.f32.mxu1 %vm3922_vm0, %v3921_v1 }
0x2d52   :  { %3611 = vmatprep.subr.mxu1 %v3921_v1 }
0x2d53   :  { %3612 = vmatpush3.msra.mxu1 %v4868_v56 }
0x2d54   :  { %3613 = vmatprep.subr.mxu1 %v3921_v1 }
0x2d55   :  { %3614 = vmatpush3.msra.mxu1 %v4875_v61 }
0x2d56   :  { %3615 = vmatprep.subr.mxu1 %v3921_v1 }
0x2d57   :  { %3616 = vmatpush3.msra.mxu1 %v4882_v57 }
0x2d58   :  { %3620 = vmatprep.subr.mxu1 %v3921_v1 }
0x2e10   :  { %v2150_v58 = vpop.f32.mrf.mxu1 }
0x2e11   :  { %v2151_v62 = vadd.f32 %v4889_v59, %v2150_v58 }
0x2e12   :  { %v3608_v10 = vpop.f32.mrf.mxu1 }
0x2e13   :  { %3852 = vtanh.f32 %v2151_v62  ;;  %v2887_v13 = vmul.f32 -1.442695, %v2151_v62 }
0x2e15   :  { %3854 = vpow2.f32 %v2887_v13 }
0x2e20   :  { %v3853_v63 = vpop.eup %3852 }
0x2e21   :  { %2163 = vrot.lane.b32.xlu1 %v3853_v63, %s3923_s18 }
0x2e22   :  { %v3855_v14 = vpop.eup %3854 }
0x2e23   :  { %v2157_v8 = vadd.f32 1.0, %v3855_v14 }
0x2e25   :  { %3856 = vrcp.f32 %v2157_v8 }
0x2e32   :  { %v3857_v15 = vpop.eup %3856 }
0x2e33   :  { %v2161_v19 = vmul.f32 %v3857_v15, %v4741_v18  ;;  %v4907_v18 = vld [vmem:[%s5140_s9 + $0x78] sm:$0xff] }
0x2e93   :  { %v2164_v3 = vpop.permute.xlu1 %2163 }
0x2e94   :  { %v2166_v47 = vmul.f32 %v3857_v15, %v2164_v3 }
0x2e96   :  { %2168 = vrot.lane.b32.xlu1 %v2166_v47, %s3924_s19 }
0x2f08   :  { %v2169_v20 = vpop.permute.xlu1 %2168 }
0x2f09   :  { %v4895_v28 = vadd.f32 %v2169_v20, %v2161_v19 }
0x2f0b   :  { %3858 = vtanh.f32 %v4895_v28 }
0x2f18   :  { %v3859_v29 = vpop.eup %3858 }
0x2f19   :  { %2174 = vrot.lane.b32.xlu0 %v3859_v29, %s3923_s18 }
0x2f8b   :  { %v2175_v30 = vpop.permute.xlu0 %2174 }
0x2f8c   :  { %v4899_v31 = vmul.f32 %v3857_v15, %v2175_v30 }
0x2f8e   :  { %2179 = vrot.lane.b32.xlu1 %v4899_v31, %s3924_s19 }
0x3000   :  { %v2180_v32 = vpop.permute.xlu1 %2179 }
0x3001   :  { %3618 = vmatmul.mubr.msk.f32.vlgmr.msra.gmra.mxu1 %vm108_vm1, %v2180_v32 }
0x3002   :  { %3621 = vmatpush3.msra.mxu1 %v4907_v18  ;;  %3652 = vmatprep.mubr.msk.f32.mxu1 %vm3922_vm0, %v3921_v1 }
0x3003   :  { %3622 = vmatprep.subr.mxu1 %v3921_v1 }
0x3004   :  { %3623 = vmatpush3.msra.mxu1 %v4916_v33 }
0x3005   :  { %3624 = vmatprep.subr.mxu1 %v3921_v1 }
0x3006   :  { %3625 = vmatpush3.msra.mxu1 %v4923_v34 }
0x3007   :  { %3626 = vmatprep.subr.mxu1 %v3921_v1 }
0x3008   :  { %3627 = vmatpush3.msra.mxu1 %v4930_v35 }
0x3009   :  { %3628 = vmatprep.subr.mxu1 %v3921_v1 }
0x300a   :  { %3629 = vmatpush3.msra.mxu1 %v4937_v36 }
0x300b   :  { %3630 = vmatprep.subr.mxu1 %v3921_v1 }
0x300c   :  { %3631 = vmatpush3.msra.mxu1 %v4944_v37 }
0x300d   :  { %3632 = vmatprep.subr.mxu1 %v3921_v1 }
0x300e   :  { %3633 = vmatpush3.msra.mxu1 %v4951_v17 }
0x300f   :  { %3634 = vmatprep.subr.mxu1 %v3921_v1 }
0x3010   :  { %3635 = vmatpush3.msra.mxu1 %v4958_v12 }
0x3011   :  { %3636 = vmatprep.subr.mxu1 %v3921_v1 }
0x3012   :  { %3637 = vmatpush3.msra.mxu1 %v4965_v21 }
0x3013   :  { %3638 = vmatprep.subr.mxu1 %v3921_v1 }
0x3014   :  { %3639 = vmatpush3.msra.mxu1 %v4972_v22 }
0x3015   :  { %3640 = vmatprep.subr.mxu1 %v3921_v1 }
0x3016   :  { %3641 = vmatpush3.msra.mxu1 %v4481_v38 }
0x3017   :  { %3642 = vmatprep.subr.mxu1 %v3921_v1 }
0x3018   :  { %3643 = vmatpush3.msra.mxu1 %v4488_v39  ;;  %v4991_v39 = vld [vmem:[%s5139_s8] ss:$0 sm:$0xff]  ;;  %s2892_s8 = sld [smem:[#allocation2 + $0x5]] }
0x3019   :  { %3644 = vmatprep.subr.mxu1 %v3921_v1 }
0x301a   :  { %3645 = vmatpush3.msra.mxu1 %v4495_v40 }
0x301b   :  { %3646 = vmatprep.subr.mxu1 %v3921_v1 }
0x301c   :  { %3647 = vmatpush3.msra.mxu1 %v4504_v52 }
0x301d   :  { %3648 = vmatprep.subr.mxu1 %v3921_v1 }
0x301e   :  { %3649 = vmatpush3.msra.mxu1 %v4511_v0  ;;  %p2350_p9 = scmp.ne.s32.totalorder %s2892_s8, 0 }
0x301f   :  { %3650 = vmatprep.subr.mxu1 %v3921_v1 }
0x3020   :  { %3651 = vmatpush3.msra.mxu1 %v4518_v2  ;;  %s2351_s4 = scalar_select %p2350_p9, 1, 0 }
0x3021   :  { %3720 = vmatprep.subr.mxu1 %v3921_v1 }
0x3022   :  { %s2352_s6 = scvt.s32.f32 %s2351_s4 }
0x3024   :  { %s2357_s7 = ssub.f32 1.0, %s2352_s6 }
0x30c1   :  { %v2249_v38 = vpop.f32.mrf.mxu1 }
0x30c2   :  { %v2250_v40 = vadd.f32 %v4991_v39, %v2249_v38 }
0x30c3   :  { %v3619_v23 = vpop.f32.mrf.mxu1 }
0x30c4   :  { %2889 = vst [vmem:[%s5141_s10 + $0xa] sm:$0x3] %v2250_v40  ;;  %v2255_v52 = vsel %vm1117_vm3, %v2250_v40, -inf }
0x30c5   :  { %v2256_v0 = vsel %vm1119_vm4, %v2255_v52, -inf }
0x30c6   :  { %2257 = vmax.xlane.f32.xlu0 %v2256_v0 }
0x314f   :  { %v2258_v2 = vpop.xlane.xlu0 %2257 }
0x3150   :  { %vm2259_vm6 = vcmp.eq.f32.partialorder %v2255_v52, %v2258_v2 }
0x3151   :  { %v2260_v24 = vsel %vm2259_vm6, %v4393_v16, 128 }
0x3152   :  { %v2261_v25 = vsel %vm1119_vm4, %v2260_v24, 2147483647 }
0x3153   :  { %v2263_v26 = vshra.s32 %v2261_v25, 16  ;;  %v2262_v7 = vand.u32 65535, %v2261_v25 }
0x3155   :  { %v2265_v27 = vcvt.s32.f32 %v2263_v26  ;;  %v2264_v42 = vcvt.s32.f32 %v2262_v7 }
0x3157   :  { %2266 = vmin.xlane.f32.xlu1 %v2265_v27 }
0x31e0   :  { %v2267_v11 = vpop.xlane.xlu1 %2266 }
0x31e1   :  { %vm2268_vm7 = vcmp.eq.f32.partialorder %v2265_v27, %v2267_v11  ;;  %v2273_v44 = vcvt.f32.s32 %v2267_v11 }
0x31e2   :  { %v2269_v43 = vsel %vm2268_vm7, %v2264_v42, inf }
0x31e3   :  { %2270 = vmin.xlane.f32.xlu0 %v2269_v43  ;;  %v2274_v46 = vshll.u32 %v2273_v44, 16 }
0x31f9   :  { %2361 = vrot.lane.b32.xlu0 %v4899_v31, %s3923_s18 }
0x326c   :  { %v2271_v45 = vpop.xlane.xlu0 %2270 }
0x326d   :  { %v2272_v48 = vcvt.f32.s32 %v2271_v45 }
0x326f   :  { %v2275_v55 = vadd.s32 %v2274_v46, %v2272_v48  ;;  %v2901_v46 = vld [vmem:[%s5133_s2 + $0xc] sm:$0x3] }
0x3270   :  { %v2362_v58 = vpop.permute.xlu0 %2361 }
0x3271   :  { %vm2276_vm8 = vcmp.eq.s32.totalorder %v4393_v16, %v2275_v55 }
0x3272   :  { %3653 = vmatmul.mubr.msk.f32.vlgmr.msra.gmra.mxu1 %vm2276_vm8, %v3925_v54 }
0x3273   :  { %3721 = vmatpush3.msra.mxu1 %v4796_v41  ;;  %3736 = vmatprep.mubr.msk.f32.mxu1 %vm3922_vm0, %v3921_v1  ;;  %v2893_v41 = vld [vmem:[%s5133_s2 + $0xa] sm:$0x3] }
0x3274   :  { %3722 = vmatprep.subr.mxu1 %v3921_v1 }
0x3275   :  { %3723 = vmatpush3.msra.mxu1 %v4805_v50  ;;  %v2355_v50 = vstv %s2352_s6 }
0x3276   :  { %3724 = vmatprep.subr.mxu1 %v3921_v1 }
0x3277   :  { %3725 = vmatpush3.msra.mxu1 %v4812_v51  ;;  %v2358_v51 = vstv %s2357_s7 }
0x3278   :  { %3726 = vmatprep.subr.mxu1 %v3921_v1 }
0x3279   :  { %3727 = vmatpush3.msra.mxu1 %v4819_v4  ;;  %v2356_v4 = vmul.f32 %v2893_v41, %v2355_v50 }
0x327a   :  { %3728 = vmatprep.subr.mxu1 %v3921_v1 }
0x327b   :  { %3729 = vmatpush3.msra.mxu1 %v4826_v5 }
0x327c   :  { %3730 = vmatprep.subr.mxu1 %v3921_v1 }
0x327d   :  { %3731 = vmatpush3.msra.mxu1 %v4833_v60 }
0x327e   :  { %3732 = vmatprep.subr.mxu1 %v3921_v1 }
0x327f   :  { %3733 = vmatpush3.msra.mxu1 %v4840_v6 }
0x3280   :  { %3734 = vmatprep.subr.mxu1 %v3921_v1 }
0x3281   :  { %3735 = vmatpush3.msra.mxu1 %v4847_v53 }
0x3282   :  { %3739 = vmatprep.subr.mxu1 %v3921_v1 }
0x3332   :  { %v2345_v5 = vpop.f32.mrf.mxu1 }
0x3333   :  { %v2359_v60 = vmul.f32 %v2358_v51, %v2345_v5 }
0x3334   :  { %v3654_v6 = vpop.f32.mrf.mxu1 }
0x3335   :  { %v2360_v9 = vadd.f32 %v2359_v60, %v2356_v4 }
0x3337   :  { %v2364_v53 = vsel %vm108_vm1, %v2360_v9, %v2362_v58 }
0x3338   :  { %3672 = vmatmul.mubr.msk.f32.vlgmr.msra.gmra.mxu0 %vm110_vm2, %v2364_v53 }
0x3339   :  { %3675 = vmatpush3.msra.mxu0 %v4859_v49  ;;  %3682 = vmatprep.mubr.msk.f32.mxu0 %vm3922_vm0, %v3921_v1 }
0x333a   :  { %3676 = vmatprep.subr.mxu0 %v3921_v1 }
0x333b   :  { %3677 = vmatpush3.msra.mxu0 %v4868_v56 }
0x333c   :  { %3678 = vmatprep.subr.mxu0 %v3921_v1 }
0x333d   :  { %3679 = vmatpush3.msra.mxu0 %v4875_v61 }
0x333e   :  { %3680 = vmatprep.subr.mxu0 %v3921_v1 }
0x333f   :  { %3681 = vmatpush3.msra.mxu0 %v4882_v57 }
0x3340   :  { %3685 = vmatprep.subr.mxu0 %v3921_v1 }
0x33f8   :  { %v2434_v62 = vpop.f32.mrf.mxu0 }
0x33f9   :  { %v2435_v10 = vadd.f32 %v4889_v59, %v2434_v62 }
0x33fa   :  { %v3673_v63 = vpop.f32.mrf.mxu0 }
0x33fb   :  { %3860 = vtanh.f32 %v2435_v10  ;;  %v2895_v14 = vmul.f32 -1.442695, %v2435_v10 }
0x33fd   :  { %3862 = vpow2.f32 %v2895_v14 }
0x3408   :  { %v3861_v13 = vpop.eup %3860 }
0x3409   :  { %2447 = vrot.lane.b32.xlu1 %v3861_v13, %s3923_s18 }
0x340a   :  { %v3863_v8 = vpop.eup %3862 }
0x340b   :  { %v2441_v15 = vadd.f32 1.0, %v3863_v8 }
0x340d   :  { %3864 = vrcp.f32 %v2441_v15 }
0x341a   :  { %v3865_v3 = vpop.eup %3864 }
0x341b   :  { %v2445_v20 = vmul.f32 %v3865_v3, %v4895_v28  ;;  %v3900_v28 = vld [vmem:[%s5140_s9 + $0x28] sm:$0xff] }
0x347b   :  { %v2448_v47 = vpop.permute.xlu1 %2447 }
0x347c   :  { %v2450_v19 = vmul.f32 %v3865_v3, %v2448_v47 }
0x347e   :  { %2452 = vrot.lane.b32.xlu1 %v2450_v19, %s3924_s19 }
0x34f0   :  { %v2453_v29 = vpop.permute.xlu1 %2452 }
0x34f1   :  { %v5043_v30 = vadd.f32 %v2453_v29, %v2445_v20 }
0x34f3   :  { %3866 = vtanh.f32 %v5043_v30 }
0x3500   :  { %v3867_v31 = vpop.eup %3866 }
0x3501   :  { %2458 = vrot.lane.b32.xlu0 %v3867_v31, %s3923_s18 }
0x3573   :  { %v2459_v32 = vpop.permute.xlu0 %2458 }
0x3574   :  { %v2461_v38 = vmul.f32 %v3865_v3, %v2459_v32 }
0x3576   :  { %2463 = vrot.lane.b32.xlu1 %v2461_v38, %s3924_s19 }
0x35e8   :  { %v2464_v40 = vpop.permute.xlu1 %2463 }
0x35e9   :  { %3683 = vmatmul.mubr.msk.f32.vlgmr.msra.gmra.mxu0 %vm108_vm1, %v2464_v40 }
0x35ea   :  { %3686 = vmatpush3.msra.mxu0 %v4907_v18  ;;  %3717 = vmatprep.mubr.msk.f32.mxu0 %vm3922_vm0, %v3921_v1  ;;  %v3901_v18 = vld [vmem:[%s5140_s9 + $0x20] sm:$0xff] }
0x35eb   :  { %3687 = vmatprep.subr.mxu0 %v3921_v1 }
0x35ec   :  { %3688 = vmatpush3.msra.mxu0 %v4916_v33  ;;  %v3902_v33 = vld [vmem:[%s5140_s9 + $0x18] sm:$0xff] }
0x35ed   :  { %3689 = vmatprep.subr.mxu0 %v3921_v1 }
0x35ee   :  { %3690 = vmatpush3.msra.mxu0 %v4923_v34  ;;  %v3903_v34 = vld [vmem:[%s5140_s9 + $0x10] sm:$0xff] }
0x35ef   :  { %3691 = vmatprep.subr.mxu0 %v3921_v1 }
0x35f0   :  { %3692 = vmatpush3.msra.mxu0 %v4930_v35  ;;  %v3904_v35 = vld [vmem:[%s5140_s9 + $0x8] sm:$0xff] }
0x35f1   :  { %3693 = vmatprep.subr.mxu0 %v3921_v1 }
0x35f2   :  { %3694 = vmatpush3.msra.mxu0 %v4937_v36  ;;  %v3905_v36 = vld [vmem:[%s5140_s9] sm:$0xff]  ;;  %s2900_s9 = sld [smem:[#allocation2 + $0x6]] }
0x35f3   :  { %3695 = vmatprep.subr.mxu0 %v3921_v1 }
0x35f4   :  { %3696 = vmatpush3.msra.mxu0 %v4944_v37 }
0x35f5   :  { %3697 = vmatprep.subr.mxu0 %v3921_v1 }
0x35f6   :  { %3698 = vmatpush3.msra.mxu0 %v4951_v17 }
0x35f7   :  { %3699 = vmatprep.subr.mxu0 %v3921_v1 }
0x35f8   :  { %3700 = vmatpush3.msra.mxu0 %v4958_v12  ;;  %p2634_p10 = scmp.ne.s32.totalorder %s2900_s9, 0 }
0x35f9   :  { %3701 = vmatprep.subr.mxu0 %v3921_v1 }
0x35fa   :  { %3702 = vmatpush3.msra.mxu0 %v4965_v21  ;;  %s2635_s13 = scalar_select %p2634_p10, 1, 0 }
0x35fb   :  { %3703 = vmatprep.subr.mxu0 %v3921_v1 }
0x35fc   :  { %3704 = vmatpush3.msra.mxu0 %v4972_v22  ;;  %s2636_s14 = scvt.s32.f32 %s2635_s13 }
0x35fd   :  { %3705 = vmatprep.subr.mxu0 %v3921_v1 }
0x35fe   :  { %3706 = vmatpush3.msra.mxu0 %v3900_v28  ;;  %s2641_s15 = ssub.f32 1.0, %s2636_s14  ;;  %v2639_v48 = vstv %s2636_s14 }
0x35ff   :  { %3707 = vmatprep.subr.mxu0 %v3921_v1  ;;  %v2640_v41 = vmul.f32 %v2901_v46, %v2639_v48 }
0x3600   :  { %3708 = vmatpush3.msra.mxu0 %v3901_v18  ;;  %v2642_v55 = vstv %s2641_s15 }
0x3601   :  { %3709 = vmatprep.subr.mxu0 %v3921_v1 }
0x3602   :  { %3710 = vmatpush3.msra.mxu0 %v3902_v33 }
0x3603   :  { %3711 = vmatprep.subr.mxu0 %v3921_v1 }
0x3604   :  { %3712 = vmatpush3.msra.mxu0 %v3903_v34 }
0x3605   :  { %3713 = vmatprep.subr.mxu0 %v3921_v1 }
0x3606   :  { %3714 = vmatpush3.msra.mxu0 %v3904_v35 }
0x3607   :  { %3715 = vmatprep.subr.mxu0 %v3921_v1 }
0x3608   :  { %3716 = vmatpush3.msra.mxu0 %v3905_v36 }
0x36a9   :  { %v2533_v37 = vpop.f32.mrf.mxu0 }
0x36aa   :  { %v2534_v17 = vadd.f32 %v4991_v39, %v2533_v37 }
0x36ab   :  { %v3684_v12 = vpop.f32.mrf.mxu0 }
0x36ac   :  { %2897 = vst [vmem:[%s5141_s10 + $0xc] sm:$0x3] %v2534_v17  ;;  %v2539_v21 = vsel %vm1117_vm3, %v2534_v17, -inf }
0x36ad   :  { %v2540_v22 = vsel %vm1119_vm4, %v2539_v21, -inf }
0x36ae   :  { %2541 = vmax.xlane.f32.xlu0 %v2540_v22 }
0x3737   :  { %v2542_v23 = vpop.xlane.xlu0 %2541 }
0x3738   :  { %vm2543_vm9 = vcmp.eq.f32.partialorder %v2539_v21, %v2542_v23 }
0x3739   :  { %v2544_v52 = vsel %vm2543_vm9, %v4393_v16, 128 }
0x373a   :  { %v2545_v0 = vsel %vm1119_vm4, %v2544_v52, 2147483647 }
0x373b   :  { %v2547_v2 = vshra.s32 %v2545_v0, 16  ;;  %v2546_v25 = vand.u32 65535, %v2545_v0 }
0x373d   :  { %v2549_v24 = vcvt.s32.f32 %v2547_v2  ;;  %v2548_v27 = vcvt.s32.f32 %v2546_v25 }
0x373f   :  { %2550 = vmin.xlane.f32.xlu1 %v2549_v24 }
0x37c8   :  { %v2551_v26 = vpop.xlane.xlu1 %2550 }
0x37c9   :  { %vm2552_vm10 = vcmp.eq.f32.partialorder %v2549_v24, %v2551_v26  ;;  %v2557_v11 = vcvt.f32.s32 %v2551_v26 }
0x37ca   :  { %v2553_v7 = vsel %vm2552_vm10, %v2548_v27, inf }
0x37cb   :  { %2554 = vmin.xlane.f32.xlu0 %v2553_v7  ;;  %v2558_v43 = vshll.u32 %v2557_v11, 16 }
0x37e1   :  { %2645 = vrot.lane.b32.xlu0 %v2461_v38, %s3923_s18 }
0x3854   :  { %v2555_v42 = vpop.xlane.xlu0 %2554 }
0x3855   :  { %v2556_v44 = vcvt.f32.s32 %v2555_v42 }
0x3857   :  { %v2559_v45 = vadd.s32 %v2558_v43, %v2556_v44 }
0x3858   :  { %v2646_v60 = vpop.permute.xlu0 %2645 }
0x3859   :  { %vm2560_vm3 = vcmp.eq.s32.totalorder %v4393_v16, %v2559_v45 }
0x385a   :  { %3718 = vmatmul.mubr.msk.f32.vlgmr.msra.gmra.mxu0 %vm2560_vm3, %v3925_v54 }
0x391a   :  { %v2629_v50 = vpop.f32.mrf.mxu0 }
0x391b   :  { %v2643_v51 = vmul.f32 %v2642_v55, %v2629_v50 }
0x391c   :  { %v3719_v4 = vpop.f32.mrf.mxu0 }
0x391d   :  { %v2644_v5 = vadd.f32 %v2643_v51, %v2640_v41 }
0x391f   :  { %v2648_v16 = vsel %vm108_vm1, %v2644_v5, %v2646_v60 }
0x3920   :  { %3737 = vmatmul.mubr.msk.f32.vlgmr.msra.gmra.mxu1 %vm110_vm2, %v2648_v16 }
0x3921   :  { %3740 = vmatpush3.msra.mxu1 %v4859_v49  ;;  %3747 = vmatprep.mubr.msk.f32.mxu1 %vm3922_vm0, %v3921_v1 }
0x3922   :  { %3741 = vmatprep.subr.mxu1 %v3921_v1 }
0x3923   :  { %3742 = vmatpush3.msra.mxu1 %v4868_v56 }
0x3924   :  { %3743 = vmatprep.subr.mxu1 %v3921_v1 }
0x3925   :  { %3744 = vmatpush3.msra.mxu1 %v4875_v61 }
0x3926   :  { %3745 = vmatprep.subr.mxu1 %v3921_v1 }
0x3927   :  { %3746 = vmatpush3.msra.mxu1 %v4882_v57 }
0x39e0   :  { %v2718_v54 = vpop.f32.mrf.mxu1 }
0x39e1   :  { %v2719_v6 = vadd.f32 %v4889_v59, %v2718_v54 }
0x39e2   :  { %v3738_v9 = vpop.f32.mrf.mxu1 }
0x39e3   :  { %3868 = vtanh.f32 %v2719_v6  ;;  %v2903_v58 = vmul.f32 -1.442695, %v2719_v6 }
0x39e5   :  { %3870 = vpow2.f32 %v2903_v58 }
0x39f0   :  { %v3869_v49 = vpop.eup %3868 }
0x39f1   :  { %2731 = vrot.lane.b32.xlu1 %v3869_v49, %s3923_s18 }
0x39f2   :  { %v3871_v53 = vpop.eup %3870 }
0x39f3   :  { %v2725_v56 = vadd.f32 1.0, %v3871_v53 }
0x39f5   :  { %3872 = vrcp.f32 %v2725_v56 }
0x3a02   :  { %v3873_v62 = vpop.eup %3872 }
0x3a03   :  { %v2729_v1 = vmul.f32 %v3873_v62, %v5043_v30 }
0x3a63   :  { %v2732_v10 = vpop.permute.xlu1 %2731 }
0x3a64   :  { %v2734_v61 = vmul.f32 %v3873_v62, %v2732_v10 }
0x3a66   :  { %2736 = vrot.lane.b32.xlu1 %v2734_v61, %s3924_s19 }
0x3ad8   :  { %v2737_v57 = vpop.permute.xlu1 %2736 }
0x3ad9   :  { %v2739_v63 = vadd.f32 %v2737_v57, %v2729_v1 }
0x3adb   :  { %3874 = vtanh.f32 %v2739_v63 }
0x3ae8   :  { %v3875_v59 = vpop.eup %3874 }
0x3ae9   :  { %2742 = vrot.lane.b32.xlu0 %v3875_v59, %s3923_s18 }
0x3b5b   :  { %v2743_v13 = vpop.permute.xlu0 %2742 }
0x3b5c   :  { %v2745_v14 = vmul.f32 %v3873_v62, %v2743_v13 }
0x3b5e   :  { %2747 = vrot.lane.b32.xlu1 %v2745_v14, %s3924_s19 }
0x3bd0   :  { %v2748_v8 = vpop.permute.xlu1 %2747 }
0x3bd1   :  { %3748 = vmatmul.mubr.msk.f32.vlgmr.msra.gmra.mxu1 %vm108_vm1, %v2748_v8 }
0x3c91   :  { %v2817_v15 = vpop.f32.mrf.mxu1 }
0x3c92   :  { %v2818_v3 = vadd.f32 %v4991_v39, %v2817_v15 }
0x3c93   :  { %v3749_v47 = vpop.f32.mrf.mxu1 }
0x3c94   :  { %2905 = vst [vmem:[%s5141_s10 + $0xe] sm:$0x3] %v2818_v3 }
0x3c95   :  { %2827 = vsyncpa [#allocation3], 1 }

</bundles_post_ra>
